<compile_context>
chip_gen: v6e
topology: v6e:2x2x1
jax: 0.10.0
libtpu: 0.0.40
codegen_flags: <defaults>
</compile_context>

<pallas_src>
import numpy as np

import jax
import jax.numpy as jnp
from jax.experimental import pallas as pl
from jax.experimental.pallas import tpu as pltpu

# ----------------------- small config (consistent with the module) -----------
BATCH = 2
ENC_LEN = 16          # encoder (image) tokens          (144 in the original)
SEQ_LEN = 8           # cfg.MODEL.SEQ_LEN               (17  in the original)
EMBED = 32
HEADS = 4
HEAD_DIM = EMBED // HEADS
DEPTH = 2
VOCAB = 64
FFN = EMBED * 4
EPS = 1e-5
SCALE = HEAD_DIM ** -0.5


def get_clip_mat(seq_len, enc_len):
    # TODO(synk): original get_clip_mat source is unavailable; use a deterministic
    # contiguous-window averaging matrix (each text slot averages its clip of image tokens).
    mat = np.zeros((seq_len, enc_len), dtype=np.float32)
    bounds = np.linspace(0, enc_len, seq_len + 1).astype(np.int64)
    for i in range(seq_len):
        lo, hi = int(bounds[i]), int(bounds[i + 1])
        hi = max(hi, lo + 1)
        mat[i, lo:hi] = 1.0 / (hi - lo)
    return mat


# ----------------------------- fused Pallas kernel ----------------------------
def _ln(x, g, b):
    """LayerNorm over last dim. g, b: (1, D)."""
    m = jnp.mean(x, axis=-1, keepdims=True)
    v = jnp.mean(jnp.square(x - m), axis=-1, keepdims=True)
    return (x - m) * jax.lax.rsqrt(v + EPS) * g + b


def _softmax(s):
    s = s - jnp.max(s, axis=-1, keepdims=True)
    p = jnp.exp(s)
    return p * pl.reciprocal(jnp.sum(p, axis=-1, keepdims=True), approx=True)


def _dot(a, b):
    return jnp.dot(a, b, preferred_element_type=jnp.float32)


def _dot_nt(a, b):
    """a @ b.T via dot_general contracting last dims (no materialized transpose)."""
    return jax.lax.dot_general(a, b, (((1,), (1,)), ((), ())),
                               preferred_element_type=jnp.float32)


def _mha(x_q, x_kv, w_all, b_all, self_attn):
    """Multi-head attention.  w_all: (E, 4E) = [Wq|Wk|Wv|Wo], b_all: (1, 4E)."""
    E = EMBED
    if self_attn:
        # One (S, E) x (E, 3E) matmul for q, k, v.
        qkv = _dot(x_q, w_all[:, 0:3 * E]) + b_all[:, 0:3 * E]
        q, k, v = qkv[:, 0:E], qkv[:, E:2 * E], qkv[:, 2 * E:3 * E]
    else:
        q = _dot(x_q, w_all[:, 0:E]) + b_all[:, 0:E]
        kv = _dot(x_kv, w_all[:, E:3 * E]) + b_all[:, E:3 * E]
        k, v = kv[:, 0:E], kv[:, E:2 * E]

    # Per-head attention via static column slices; the output projection is
    # accumulated head-by-head (concat(o_h) @ Wo == sum_h o_h @ Wo[h*hd:(h+1)*hd]).
    acc = None
    for h in range(HEADS):
        sl = slice(h * HEAD_DIM, (h + 1) * HEAD_DIM)
        s = _dot_nt(q[:, sl], k[:, sl]) * SCALE
        p = _softmax(s)
        o_h = _dot(p, v[:, sl])
        contrib = _dot(o_h, w_all[sl, 3 * E:4 * E])
        acc = contrib if acc is None else acc + contrib
    return acc + b_all[:, 3 * E:4 * E]


def _decoder_na_kernel(enc_ref, pro_w_ref, pro_vec_ref, vocab_ref, vocab_t_ref,
                       w_clip_ref, attn_w_ref, attn_b_ref, fc1_w_ref, fc1_b_ref,
                       fc2_w_ref, fc2_b_ref, ln_ref, a_w_ref, epi_ref,
                       gen_w_ref, gen_b_ref, out_ref):
    enc = enc_ref[0]                                   # (ENC_LEN, EMBED)

    # ---- prologue: img2text Linear + LayerNorm (+ Dropout identity) ----------
    pro = pro_vec_ref[...]                             # (3, E): [b, ln_g, ln_b]
    t = _dot(enc, pro_w_ref[...]) + pro[0:1]
    t = _ln(t, pro[1:2], pro[2:3])

    # ---- soft word-embedding lookup + clip aggregation ------------------------
    vocab = vocab_ref[...]                             # (V, E)
    logits = _dot(t, vocab_t_ref[...])                 # (ENC_LEN, V), pre-transposed vocab
    word_prob = _softmax(logits)
    word_emb = t + _dot(word_prob, vocab)
    x = _dot(w_clip_ref[...], word_emb)                # (S, E)
    x_self = x

    # ---- decoder layers (unrolled; DEPTH is small) -----------------------------
    for l in range(DEPTH):
        lnp = ln_ref[l]                                # (6, E)

        # word self-attention
        short_cut = x
        a = _mha(x, x, attn_w_ref[2 * l], attn_b_ref[2 * l], self_attn=True)
        x_self = a
        x = _ln(a + short_cut, lnp[0:1], lnp[1:2])

        # cross attention with encoder tokens
        short_cut = x
        a = _mha(x, enc, attn_w_ref[2 * l + 1], attn_b_ref[2 * l + 1], self_attn=False)
        x = _ln(a + short_cut, lnp[2:3], lnp[3:4])

        # feed-forward
        short_cut = x
        h = _dot(x, fc1_w_ref[l]) + fc1_b_ref[l]
        h = jnp.maximum(h, 0.0)
        y = _dot(h, fc2_w_ref[l]) + fc2_b_ref[l]
        x = _ln(y + short_cut, lnp[4:5], lnp[5:6])

    # ---- gated fusion + final LayerNorm + generator ----------------------------
    a_w = a_w_ref[...]                                 # (2E, E)
    epi = epi_ref[...]                                 # (3, E): [a_b, ln_g, ln_b]
    gate = jax.nn.sigmoid(_dot(x, a_w[:EMBED]) + _dot(x_self, a_w[EMBED:]) + epi[0:1])
    y = _ln(x * gate + x_self * (1.0 - gate), epi[1:2], epi[2:3])

    out = _dot(y, gen_w_ref[...]) + gen_b_ref[...]
    out_ref[0] = out.astype(out_ref.dtype)


# ------------------------------ wrapper / glue --------------------------------
def _const_spec(arr):
    nd = arr.ndim
    return pl.BlockSpec(arr.shape, lambda b, _nd=nd: (0,) * _nd)


def pack_params(p):
    """Pack the per-module params into a few VMEM-friendly slabs (host-side, once)."""
    pro_vec = jnp.stack([p["img2text_b"], p["img2text_ln"][0], p["img2text_ln"][1]])

    attn_w, attn_b = [], []
    fc1_w, fc1_b, fc2_w, fc2_b, ln_p = [], [], [], [], []
    for lp in p["layers"]:
        for name in ("word_attn", "cross_att"):
            ap = lp[name]
            attn_w.append(jnp.concatenate(
                [ap["q"][0], ap["k"][0], ap["v"][0], ap["o"][0]], axis=1))     # (E, 4E)
            attn_b.append(jnp.concatenate(
                [ap["q"][1], ap["k"][1], ap["v"][1], ap["o"][1]])[None, :])    # (1, 4E)
        fc1_w.append(lp["fc1"][0]); fc1_b.append(lp["fc1"][1][None, :])
        fc2_w.append(lp["fc2"][0]); fc2_b.append(lp["fc2"][1][None, :])
        ln_p.append(jnp.stack([lp["ln1"][0], lp["ln1"][1],
                               lp["ln2"][0], lp["ln2"][1],
                               lp["ln3"][0], lp["ln3"][1]]))

    return (
        p["img2text_w"],                     # pro_w       (E, E)
        pro_vec,                             # pro_vec     (3, E)
        p["vocab"],                          # vocab       (V, E)
        jnp.transpose(p["vocab"]),           # vocab_t     (E, V)  pre-transposed
        p["w_clip"],                         # w_clip      (S, ENC_LEN)
        jnp.stack(attn_w),                   # attn_w      (2*DEPTH, E, 4E)
        jnp.stack(attn_b),                   # attn_b      (2*DEPTH, 1, 4E)
        jnp.stack(fc1_w),                    # fc1_w       (DEPTH, E, FFN)
        jnp.stack(fc1_b),                    # fc1_b       (DEPTH, 1, FFN)
        jnp.stack(fc2_w),                    # fc2_w       (DEPTH, FFN, E)
        jnp.stack(fc2_b),                    # fc2_b       (DEPTH, 1, E)
        jnp.stack(ln_p),                     # ln_p        (DEPTH, 6, E)
        p["a_embed_w"],                      # a_w         (2E, E)
        jnp.stack([p["a_embed_b"], p["final_ln"][0], p["final_ln"][1]]),  # epi (3, E)
        p["gen_w"],                          # gen_w       (E, V)
        p["gen_b"][None, :],                 # gen_b       (1, V)
    )


@jax.jit
def decoder_na_forward(packed, encoder_out):
    B = encoder_out.shape[0]
    in_specs = ([pl.BlockSpec((1, ENC_LEN, EMBED), lambda b: (b, 0, 0))]
                + [_const_spec(x) for x in packed])
    return pl.pallas_call(
        _decoder_na_kernel,
        grid=(B,),
        out_shape=jax.ShapeDtypeStruct((B, SEQ_LEN, VOCAB), jnp.float32),
        in_specs=in_specs,
        out_specs=pl.BlockSpec((1, SEQ_LEN, VOCAB), lambda b: (b, 0, 0)),
        compiler_params=pltpu.CompilerParams(
            dimension_semantics=("parallel",)),   # v7x: one batch per TensorCore
    )(encoder_out, *packed)


# ------------------------------ parameters ------------------------------------
def init_params(key):
    keys = iter(jax.random.split(key, 64))

    def dense(din, dout):
        w = jax.random.normal(next(keys), (din, dout), jnp.float32) * 0.02
        return w, jnp.zeros((dout,), jnp.float32)

    def ln():
        return jnp.ones((EMBED,), jnp.float32), jnp.zeros((EMBED,), jnp.float32)

    p = {}
    p["img2text_w"], p["img2text_b"] = dense(EMBED, EMBED)
    p["img2text_ln"] = ln()
    p["vocab"] = jax.random.normal(next(keys), (VOCAB, EMBED), jnp.float32) * 0.02
    p["w_clip"] = jnp.asarray(get_clip_mat(SEQ_LEN, ENC_LEN))
    p["a_embed_w"], p["a_embed_b"] = dense(2 * EMBED, EMBED)
    p["final_ln"] = ln()
    p["gen_w"], p["gen_b"] = dense(EMBED, VOCAB)
    layers = []
    for _ in range(DEPTH):
        lp = {}
        for name in ("word_attn", "cross_att"):
            lp[name] = {n: dense(EMBED, EMBED) for n in ("q", "k", "v", "o")}
        lp["ln1"], lp["ln2"], lp["ln3"] = ln(), ln(), ln()
        lp["fc1"] = dense(EMBED, FFN)
        lp["fc2"] = dense(FFN, EMBED)
        layers.append(lp)
    p["layers"] = layers
    return p


# --------------------------- pure-JAX reference --------------------------------
def _ref_lin(x, w, b, act=None):
    y = jnp.dot(x, w, precision=jax.lax.Precision.HIGHEST) + b
    return jnp.maximum(y, 0.0) if act == "relu" else y


def _ref_ln(x, g, b):
    m = jnp.mean(x, -1, keepdims=True)
    v = jnp.mean((x - m) ** 2, -1, keepdims=True)
    return (x - m) / jnp.sqrt(v + EPS) * g + b


def _ref_mha(ap, q_in, k_in, v_in):
    B, Nq, D = q_in.shape
    Nk = k_in.shape[1]
    q = _ref_lin(q_in, *ap["q"]).reshape(B, Nq, HEADS, HEAD_DIM).transpose(0, 2, 1, 3)
    k = _ref_lin(k_in, *ap["k"]).reshape(B, Nk, HEADS, HEAD_DIM).transpose(0, 2, 1, 3)
    v = _ref_lin(v_in, *ap["v"]).reshape(B, Nk, HEADS, HEAD_DIM).transpose(0, 2, 1, 3)
    s = jnp.einsum("bhqd,bhkd->bhqk", q, k, precision=jax.lax.Precision.HIGHEST) * SCALE
    p = jax.nn.softmax(s, axis=-1)
    o = jnp.einsum("bhqk,bhkd->bhqd", p, v, precision=jax.lax.Precision.HIGHEST)
    o = o.transpose(0, 2, 1, 3).reshape(B, Nq, D)
    return _ref_lin(o, *ap["o"])


def ref_forward(p, enc):
    t = _ref_ln(_ref_lin(enc, p["img2text_w"], p["img2text_b"]), *p["img2text_ln"])
    vocab = p["vocab"]
    wp = jax.nn.softmax(jnp.dot(t, vocab.T, precision=jax.lax.Precision.HIGHEST), -1)
    we = t + jnp.dot(wp, vocab, precision=jax.lax.Precision.HIGHEST)
    x = jnp.einsum("se,bed->bsd", p["w_clip"], we, precision=jax.lax.Precision.HIGHEST)
    x_self = x
    for lp in p["layers"]:
        sc = x
        x = _ref_mha(lp["word_attn"], x, x, x)
        x_self = x
        x = _ref_ln(x + sc, *lp["ln1"])
        sc = x
        x = _ref_mha(lp["cross_att"], x, enc, enc)
        x = _ref_ln(x + sc, *lp["ln2"])
        sc = x
        x = _ref_lin(_ref_lin(x, *lp["fc1"], act="relu"), *lp["fc2"])
        x = _ref_ln(x + sc, *lp["ln3"])
    g = jax.nn.sigmoid(_ref_lin(jnp.concatenate([x, x_self], -1),
                                p["a_embed_w"], p["a_embed_b"]))
    x = _ref_ln(x * g + x_self * (1 - g), *p["final_ln"])
    return _ref_lin(x, p["gen_w"], p["gen_b"])


# ---------------------------------- main ---------------------------------------
if __name__ == "__main__":
    root = jax.random.PRNGKey(0)
    k_params, k_input = jax.random.split(root)
    params = init_params(k_params)
    packed = pack_params(params)          # packed once, host-side; not re-traced per call
    encoder_out = jax.random.normal(k_input, (BATCH, ENC_LEN, EMBED), jnp.float32)

    out = jax.block_until_ready(decoder_na_forward(packed, encoder_out))
    assert out.shape == (BATCH, SEQ_LEN, VOCAB), out.shape

    ref = jax.block_until_ready(ref_forward(params, encoder_out))
    np.testing.assert_allclose(np.asarray(out), np.asarray(ref), rtol=5e-3, atol=5e-3)

    print("KERNEL_OK")
</pallas_src>

<mosaic_0001>
module attributes {stable_mosaic.version = 11 : i64} {
  func.func @_decoder_na_kernel(%arg0: i32, %arg1: memref<1x16x32xf32, #tpu.memory_space<vmem>>, %arg2: memref<32x32xf32, #tpu.memory_space<vmem>>, %arg3: memref<3x32xf32, #tpu.memory_space<vmem>>, %arg4: memref<64x32xf32, #tpu.memory_space<vmem>>, %arg5: memref<32x64xf32, #tpu.memory_space<vmem>>, %arg6: memref<8x16xf32, #tpu.memory_space<vmem>>, %arg7: memref<4x32x128xf32, #tpu.memory_space<vmem>>, %arg8: memref<4x1x128xf32, #tpu.memory_space<vmem>>, %arg9: memref<2x32x128xf32, #tpu.memory_space<vmem>>, %arg10: memref<2x1x128xf32, #tpu.memory_space<vmem>>, %arg11: memref<2x128x32xf32, #tpu.memory_space<vmem>>, %arg12: memref<2x1x32xf32, #tpu.memory_space<vmem>>, %arg13: memref<2x6x32xf32, #tpu.memory_space<vmem>>, %arg14: memref<64x32xf32, #tpu.memory_space<vmem>>, %arg15: memref<3x32xf32, #tpu.memory_space<vmem>>, %arg16: memref<32x64xf32, #tpu.memory_space<vmem>>, %arg17: memref<1x64xf32, #tpu.memory_space<vmem>>, %arg18: memref<1x8x64xf32, #tpu.memory_space<vmem>>) attributes {dimension_semantics = [#tpu.dimension_semantics<parallel>], iteration_bounds = array<i64: 2>, scalar_prefetch = 0 : i64, scratch_operands = 0 : i64, tpu.core_type = #tpu.core_type<tc>, window_params = [{transform_indices = @transform_0, window_bounds = array<i64: 1, 16, 32>}, {pipeline_mode = #tpu.pipeline_mode<synchronous>, transform_indices = @transform_1, window_bounds = array<i64: 32, 32>}, {pipeline_mode = #tpu.pipeline_mode<synchronous>, transform_indices = @transform_2, window_bounds = array<i64: 3, 32>}, {pipeline_mode = #tpu.pipeline_mode<synchronous>, transform_indices = @transform_3, window_bounds = array<i64: 64, 32>}, {pipeline_mode = #tpu.pipeline_mode<synchronous>, transform_indices = @transform_4, window_bounds = array<i64: 32, 64>}, {pipeline_mode = #tpu.pipeline_mode<synchronous>, transform_indices = @transform_5, window_bounds = array<i64: 8, 16>}, {pipeline_mode = #tpu.pipeline_mode<synchronous>, transform_indices = @transform_6, window_bounds = array<i64: 4, 32, 128>}, {pipeline_mode = #tpu.pipeline_mode<synchronous>, transform_indices = @transform_7, window_bounds = array<i64: 4, 1, 128>}, {pipeline_mode = #tpu.pipeline_mode<synchronous>, transform_indices = @transform_8, window_bounds = array<i64: 2, 32, 128>}, {pipeline_mode = #tpu.pipeline_mode<synchronous>, transform_indices = @transform_9, window_bounds = array<i64: 2, 1, 128>}, {pipeline_mode = #tpu.pipeline_mode<synchronous>, transform_indices = @transform_10, window_bounds = array<i64: 2, 128, 32>}, {pipeline_mode = #tpu.pipeline_mode<synchronous>, transform_indices = @transform_11, window_bounds = array<i64: 2, 1, 32>}, {pipeline_mode = #tpu.pipeline_mode<synchronous>, transform_indices = @transform_12, window_bounds = array<i64: 2, 6, 32>}, {pipeline_mode = #tpu.pipeline_mode<synchronous>, transform_indices = @transform_13, window_bounds = array<i64: 64, 32>}, {pipeline_mode = #tpu.pipeline_mode<synchronous>, transform_indices = @transform_14, window_bounds = array<i64: 3, 32>}, {pipeline_mode = #tpu.pipeline_mode<synchronous>, transform_indices = @transform_15, window_bounds = array<i64: 32, 64>}, {pipeline_mode = #tpu.pipeline_mode<synchronous>, transform_indices = @transform_16, window_bounds = array<i64: 1, 64>}, {transform_indices = @transform_17, window_bounds = array<i64: 1, 8, 64>}]} {
    %c0 = arith.constant 0 : index
    %c0_0 = arith.constant 0 : index
    %c0_1 = arith.constant 0 : index
    %0 = vector.load %arg1[%c0, %c0_0, %c0_1] : memref<1x16x32xf32, #tpu.memory_space<vmem>>, vector<1x16x32xf32>
    %1 = vector.shape_cast %0 : vector<1x16x32xf32> to vector<16x32xf32>
    %c0_2 = arith.constant 0 : index
    %c0_3 = arith.constant 0 : index
    %2 = vector.load %arg3[%c0_2, %c0_3] : memref<3x32xf32, #tpu.memory_space<vmem>>, vector<3x32xf32>
    %c0_4 = arith.constant 0 : index
    %c0_5 = arith.constant 0 : index
    %3 = vector.load %arg2[%c0_4, %c0_5] : memref<32x32xf32, #tpu.memory_space<vmem>>, vector<32x32xf32>
    %cst = arith.constant dense<0.000000e+00> : vector<16x32xf32>
    %4 = tpu.matmul %1, %3, %cst {dimension_numbers = #tpu.dot_dimension_numbers<[1], [0], [0], [1], [0, 0, 1, 1], [], []>} : vector<16x32xf32>, vector<32x32xf32>, vector<16x32xf32> -> vector<16x32xf32>
    %5 = vector.extract_strided_slice %2 {offsets = [0, 0], sizes = [1, 32], strides = [1, 1]} : vector<3x32xf32> to vector<1x32xf32>
    %6 = vector.broadcast %5 : vector<1x32xf32> to vector<16x32xf32>
    %7 = arith.addf %4, %6 : vector<16x32xf32>
    %8 = vector.extract_strided_slice %2 {offsets = [1, 0], sizes = [1, 32], strides = [1, 1]} : vector<3x32xf32> to vector<1x32xf32>
    %9 = vector.extract_strided_slice %2 {offsets = [2, 0], sizes = [1, 32], strides = [1, 1]} : vector<3x32xf32> to vector<1x32xf32>
    %cst_6 = arith.constant dense<0.000000e+00> : vector<16xf32>
    %10 = vector.multi_reduction <add>, %7, %cst_6 [1] : vector<16x32xf32> to vector<16xf32>
    %11 = vector.shape_cast %10 : vector<16xf32> to vector<16x1xf32>
    %cst_7 = arith.constant 3.200000e+01 : f32
    %12 = vector.broadcast %cst_7 : f32 to vector<16x1xf32>
    %13 = arith.divf %11, %12 : vector<16x1xf32>
    %14 = vector.broadcast %13 : vector<16x1xf32> to vector<16x32xf32>
    %15 = arith.subf %7, %14 : vector<16x32xf32>
    %16 = arith.mulf %15, %15 : vector<16x32xf32>
    %cst_8 = arith.constant dense<0.000000e+00> : vector<16xf32>
    %17 = vector.multi_reduction <add>, %16, %cst_8 [1] : vector<16x32xf32> to vector<16xf32>
    %18 = vector.shape_cast %17 : vector<16xf32> to vector<16x1xf32>
    %cst_9 = arith.constant 3.200000e+01 : f32
    %19 = vector.broadcast %cst_9 : f32 to vector<16x1xf32>
    %20 = arith.divf %18, %19 : vector<16x1xf32>
    %21 = vector.broadcast %13 : vector<16x1xf32> to vector<16x32xf32>
    %22 = arith.subf %7, %21 : vector<16x32xf32>
    %cst_10 = arith.constant 9.99999974E-6 : f32
    %23 = vector.broadcast %cst_10 : f32 to vector<16x1xf32>
    %24 = arith.addf %20, %23 : vector<16x1xf32>
    %25 = math.rsqrt %24 : vector<16x1xf32>
    %26 = vector.broadcast %25 : vector<16x1xf32> to vector<16x32xf32>
    %27 = arith.mulf %22, %26 : vector<16x32xf32>
    %28 = vector.broadcast %8 : vector<1x32xf32> to vector<16x32xf32>
    %29 = arith.mulf %27, %28 : vector<16x32xf32>
    %30 = vector.broadcast %9 : vector<1x32xf32> to vector<16x32xf32>
    %31 = arith.addf %29, %30 : vector<16x32xf32>
    %c0_11 = arith.constant 0 : index
    %c0_12 = arith.constant 0 : index
    %32 = vector.load %arg4[%c0_11, %c0_12] : memref<64x32xf32, #tpu.memory_space<vmem>>, vector<64x32xf32>
    %c0_13 = arith.constant 0 : index
    %c0_14 = arith.constant 0 : index
    %33 = vector.load %arg5[%c0_13, %c0_14] : memref<32x64xf32, #tpu.memory_space<vmem>>, vector<32x64xf32>
    %cst_15 = arith.constant dense<0.000000e+00> : vector<16x64xf32>
    %34 = tpu.matmul %31, %33, %cst_15 {dimension_numbers = #tpu.dot_dimension_numbers<[1], [0], [0], [1], [0, 0, 1, 1], [], []>} : vector<16x32xf32>, vector<32x64xf32>, vector<16x64xf32> -> vector<16x64xf32>
    %cst_16 = arith.constant dense<0xFF800000> : vector<16xf32>
    %35 = vector.multi_reduction <maximumf>, %34, %cst_16 [1] : vector<16x64xf32> to vector<16xf32>
    %36 = vector.shape_cast %35 : vector<16xf32> to vector<16x1xf32>
    %37 = vector.broadcast %36 : vector<16x1xf32> to vector<16x64xf32>
    %38 = arith.subf %34, %37 : vector<16x64xf32>
    %39 = math.exp %38 : vector<16x64xf32>
    %cst_17 = arith.constant dense<0.000000e+00> : vector<16xf32>
    %40 = vector.multi_reduction <add>, %39, %cst_17 [1] : vector<16x64xf32> to vector<16xf32>
    %41 = vector.shape_cast %40 : vector<16xf32> to vector<16x1xf32>
    %42 = tpu.reciprocal %41 {approx = true} : vector<16x1xf32> -> vector<16x1xf32>
    %43 = vector.broadcast %42 : vector<16x1xf32> to vector<16x64xf32>
    %44 = arith.mulf %39, %43 : vector<16x64xf32>
    %cst_18 = arith.constant dense<0.000000e+00> : vector<16x32xf32>
    %45 = tpu.matmul %44, %32, %cst_18 {dimension_numbers = #tpu.dot_dimension_numbers<[1], [0], [0], [1], [0, 0, 1, 1], [], []>} : vector<16x64xf32>, vector<64x32xf32>, vector<16x32xf32> -> vector<16x32xf32>
    %46 = arith.addf %31, %45 : vector<16x32xf32>
    %c0_19 = arith.constant 0 : index
    %c0_20 = arith.constant 0 : index
    %47 = vector.load %arg6[%c0_19, %c0_20] : memref<8x16xf32, #tpu.memory_space<vmem>>, vector<8x16xf32>
    %cst_21 = arith.constant dense<0.000000e+00> : vector<8x32xf32>
    %48 = tpu.matmul %47, %46, %cst_21 {dimension_numbers = #tpu.dot_dimension_numbers<[1], [0], [0], [1], [0, 0, 1, 1], [], []>} : vector<8x16xf32>, vector<16x32xf32>, vector<8x32xf32> -> vector<8x32xf32>
    %c0_22 = arith.constant 0 : index
    %c0_23 = arith.constant 0 : index
    %c0_24 = arith.constant 0 : index
    %49 = vector.load %arg13[%c0_22, %c0_23, %c0_24] : memref<2x6x32xf32, #tpu.memory_space<vmem>>, vector<1x6x32xf32>
    %50 = vector.shape_cast %49 : vector<1x6x32xf32> to vector<6x32xf32>
    %c0_25 = arith.constant 0 : index
    %c0_26 = arith.constant 0 : index
    %c0_27 = arith.constant 0 : index
    %51 = vector.load %arg7[%c0_25, %c0_26, %c0_27] : memref<4x32x128xf32, #tpu.memory_space<vmem>>, vector<1x32x128xf32>
    %52 = vector.shape_cast %51 : vector<1x32x128xf32> to vector<32x128xf32>
    %c0_28 = arith.constant 0 : index
    %c0_29 = arith.constant 0 : index
    %c0_30 = arith.constant 0 : index
    %53 = vector.load %arg8[%c0_28, %c0_29, %c0_30] : memref<4x1x128xf32, #tpu.memory_space<vmem>>, vector<1x1x128xf32>
    %54 = vector.shape_cast %53 : vector<1x1x128xf32> to vector<1x128xf32>
    %55 = vector.extract_strided_slice %52 {offsets = [0, 0], sizes = [32, 96], strides = [1, 1]} : vector<32x128xf32> to vector<32x96xf32>
    %cst_31 = arith.constant dense<0.000000e+00> : vector<8x96xf32>
    %56 = tpu.matmul %48, %55, %cst_31 {dimension_numbers = #tpu.dot_dimension_numbers<[1], [0], [0], [1], [0, 0, 1, 1], [], []>} : vector<8x32xf32>, vector<32x96xf32>, vector<8x96xf32> -> vector<8x96xf32>
    %57 = vector.extract_strided_slice %54 {offsets = [0, 0], sizes = [1, 96], strides = [1, 1]} : vector<1x128xf32> to vector<1x96xf32>
    %58 = vector.broadcast %57 : vector<1x96xf32> to vector<8x96xf32>
    %59 = arith.addf %56, %58 : vector<8x96xf32>
    %60 = vector.extract_strided_slice %59 {offsets = [0, 0], sizes = [8, 32], strides = [1, 1]} : vector<8x96xf32> to vector<8x32xf32>
    %61 = vector.extract_strided_slice %59 {offsets = [0, 32], sizes = [8, 32], strides = [1, 1]} : vector<8x96xf32> to vector<8x32xf32>
    %62 = vector.extract_strided_slice %59 {offsets = [0, 64], sizes = [8, 32], strides = [1, 1]} : vector<8x96xf32> to vector<8x32xf32>
    %63 = vector.extract_strided_slice %60 {offsets = [0, 0], sizes = [8, 8], strides = [1, 1]} : vector<8x32xf32> to vector<8x8xf32>
    %64 = vector.extract_strided_slice %61 {offsets = [0, 0], sizes = [8, 8], strides = [1, 1]} : vector<8x32xf32> to vector<8x8xf32>
    %cst_32 = arith.constant dense<0.000000e+00> : vector<8x8xf32>
    %65 = tpu.matmul %63, %64, %cst_32 {dimension_numbers = #tpu.dot_dimension_numbers<[1], [1], [0], [0], [0, 0, 1, 0], [], []>} : vector<8x8xf32>, vector<8x8xf32>, vector<8x8xf32> -> vector<8x8xf32>
    %cst_33 = arith.constant 0.353553385 : f32
    %66 = vector.broadcast %cst_33 : f32 to vector<8x8xf32>
    %67 = arith.mulf %65, %66 : vector<8x8xf32>
    %cst_34 = arith.constant dense<0xFF800000> : vector<8xf32>
    %68 = vector.multi_reduction <maximumf>, %67, %cst_34 [1] : vector<8x8xf32> to vector<8xf32>
    %69 = vector.shape_cast %68 : vector<8xf32> to vector<8x1xf32>
    %70 = vector.broadcast %69 : vector<8x1xf32> to vector<8x8xf32>
    %71 = arith.subf %67, %70 : vector<8x8xf32>
    %72 = math.exp %71 : vector<8x8xf32>
    %cst_35 = arith.constant dense<0.000000e+00> : vector<8xf32>
    %73 = vector.multi_reduction <add>, %72, %cst_35 [1] : vector<8x8xf32> to vector<8xf32>
    %74 = vector.shape_cast %73 : vector<8xf32> to vector<8x1xf32>
    %75 = tpu.reciprocal %74 {approx = true} : vector<8x1xf32> -> vector<8x1xf32>
    %76 = vector.broadcast %75 : vector<8x1xf32> to vector<8x8xf32>
    %77 = arith.mulf %72, %76 : vector<8x8xf32>
    %78 = vector.extract_strided_slice %62 {offsets = [0, 0], sizes = [8, 8], strides = [1, 1]} : vector<8x32xf32> to vector<8x8xf32>
    %cst_36 = arith.constant dense<0.000000e+00> : vector<8x8xf32>
    %79 = tpu.matmul %77, %78, %cst_36 {dimension_numbers = #tpu.dot_dimension_numbers<[1], [0], [0], [1], [0, 0, 1, 1], [], []>} : vector<8x8xf32>, vector<8x8xf32>, vector<8x8xf32> -> vector<8x8xf32>
    %80 = vector.extract_strided_slice %52 {offsets = [0, 96], sizes = [8, 32], strides = [1, 1]} : vector<32x128xf32> to vector<8x32xf32>
    %cst_37 = arith.constant dense<0.000000e+00> : vector<8x32xf32>
    %81 = tpu.matmul %79, %80, %cst_37 {dimension_numbers = #tpu.dot_dimension_numbers<[1], [0], [0], [1], [0, 0, 1, 1], [], []>} : vector<8x8xf32>, vector<8x32xf32>, vector<8x32xf32> -> vector<8x32xf32>
    %82 = vector.extract_strided_slice %60 {offsets = [0, 8], sizes = [8, 8], strides = [1, 1]} : vector<8x32xf32> to vector<8x8xf32>
    %83 = vector.extract_strided_slice %61 {offsets = [0, 8], sizes = [8, 8], strides = [1, 1]} : vector<8x32xf32> to vector<8x8xf32>
    %cst_38 = arith.constant dense<0.000000e+00> : vector<8x8xf32>
    %84 = tpu.matmul %82, %83, %cst_38 {dimension_numbers = #tpu.dot_dimension_numbers<[1], [1], [0], [0], [0, 0, 1, 0], [], []>} : vector<8x8xf32>, vector<8x8xf32>, vector<8x8xf32> -> vector<8x8xf32>
    %cst_39 = arith.constant 0.353553385 : f32
    %85 = vector.broadcast %cst_39 : f32 to vector<8x8xf32>
    %86 = arith.mulf %84, %85 : vector<8x8xf32>
    %cst_40 = arith.constant dense<0xFF800000> : vector<8xf32>
    %87 = vector.multi_reduction <maximumf>, %86, %cst_40 [1] : vector<8x8xf32> to vector<8xf32>
    %88 = vector.shape_cast %87 : vector<8xf32> to vector<8x1xf32>
    %89 = vector.broadcast %88 : vector<8x1xf32> to vector<8x8xf32>
    %90 = arith.subf %86, %89 : vector<8x8xf32>
    %91 = math.exp %90 : vector<8x8xf32>
    %cst_41 = arith.constant dense<0.000000e+00> : vector<8xf32>
    %92 = vector.multi_reduction <add>, %91, %cst_41 [1] : vector<8x8xf32> to vector<8xf32>
    %93 = vector.shape_cast %92 : vector<8xf32> to vector<8x1xf32>
    %94 = tpu.reciprocal %93 {approx = true} : vector<8x1xf32> -> vector<8x1xf32>
    %95 = vector.broadcast %94 : vector<8x1xf32> to vector<8x8xf32>
    %96 = arith.mulf %91, %95 : vector<8x8xf32>
    %97 = vector.extract_strided_slice %62 {offsets = [0, 8], sizes = [8, 8], strides = [1, 1]} : vector<8x32xf32> to vector<8x8xf32>
    %cst_42 = arith.constant dense<0.000000e+00> : vector<8x8xf32>
    %98 = tpu.matmul %96, %97, %cst_42 {dimension_numbers = #tpu.dot_dimension_numbers<[1], [0], [0], [1], [0, 0, 1, 1], [], []>} : vector<8x8xf32>, vector<8x8xf32>, vector<8x8xf32> -> vector<8x8xf32>
    %99 = vector.extract_strided_slice %52 {offsets = [8, 96], sizes = [8, 32], strides = [1, 1]} : vector<32x128xf32> to vector<8x32xf32>
    %cst_43 = arith.constant dense<0.000000e+00> : vector<8x32xf32>
    %100 = tpu.matmul %98, %99, %cst_43 {dimension_numbers = #tpu.dot_dimension_numbers<[1], [0], [0], [1], [0, 0, 1, 1], [], []>} : vector<8x8xf32>, vector<8x32xf32>, vector<8x32xf32> -> vector<8x32xf32>
    %101 = arith.addf %81, %100 : vector<8x32xf32>
    %102 = vector.extract_strided_slice %60 {offsets = [0, 16], sizes = [8, 8], strides = [1, 1]} : vector<8x32xf32> to vector<8x8xf32>
    %103 = vector.extract_strided_slice %61 {offsets = [0, 16], sizes = [8, 8], strides = [1, 1]} : vector<8x32xf32> to vector<8x8xf32>
    %cst_44 = arith.constant dense<0.000000e+00> : vector<8x8xf32>
    %104 = tpu.matmul %102, %103, %cst_44 {dimension_numbers = #tpu.dot_dimension_numbers<[1], [1], [0], [0], [0, 0, 1, 0], [], []>} : vector<8x8xf32>, vector<8x8xf32>, vector<8x8xf32> -> vector<8x8xf32>
    %cst_45 = arith.constant 0.353553385 : f32
    %105 = vector.broadcast %cst_45 : f32 to vector<8x8xf32>
    %106 = arith.mulf %104, %105 : vector<8x8xf32>
    %cst_46 = arith.constant dense<0xFF800000> : vector<8xf32>
    %107 = vector.multi_reduction <maximumf>, %106, %cst_46 [1] : vector<8x8xf32> to vector<8xf32>
    %108 = vector.shape_cast %107 : vector<8xf32> to vector<8x1xf32>
    %109 = vector.broadcast %108 : vector<8x1xf32> to vector<8x8xf32>
    %110 = arith.subf %106, %109 : vector<8x8xf32>
    %111 = math.exp %110 : vector<8x8xf32>
    %cst_47 = arith.constant dense<0.000000e+00> : vector<8xf32>
    %112 = vector.multi_reduction <add>, %111, %cst_47 [1] : vector<8x8xf32> to vector<8xf32>
    %113 = vector.shape_cast %112 : vector<8xf32> to vector<8x1xf32>
    %114 = tpu.reciprocal %113 {approx = true} : vector<8x1xf32> -> vector<8x1xf32>
    %115 = vector.broadcast %114 : vector<8x1xf32> to vector<8x8xf32>
    %116 = arith.mulf %111, %115 : vector<8x8xf32>
    %117 = vector.extract_strided_slice %62 {offsets = [0, 16], sizes = [8, 8], strides = [1, 1]} : vector<8x32xf32> to vector<8x8xf32>
    %cst_48 = arith.constant dense<0.000000e+00> : vector<8x8xf32>
    %118 = tpu.matmul %116, %117, %cst_48 {dimension_numbers = #tpu.dot_dimension_numbers<[1], [0], [0], [1], [0, 0, 1, 1], [], []>} : vector<8x8xf32>, vector<8x8xf32>, vector<8x8xf32> -> vector<8x8xf32>
    %119 = vector.extract_strided_slice %52 {offsets = [16, 96], sizes = [8, 32], strides = [1, 1]} : vector<32x128xf32> to vector<8x32xf32>
    %cst_49 = arith.constant dense<0.000000e+00> : vector<8x32xf32>
    %120 = tpu.matmul %118, %119, %cst_49 {dimension_numbers = #tpu.dot_dimension_numbers<[1], [0], [0], [1], [0, 0, 1, 1], [], []>} : vector<8x8xf32>, vector<8x32xf32>, vector<8x32xf32> -> vector<8x32xf32>
    %121 = arith.addf %101, %120 : vector<8x32xf32>
    %122 = vector.extract_strided_slice %60 {offsets = [0, 24], sizes = [8, 8], strides = [1, 1]} : vector<8x32xf32> to vector<8x8xf32>
    %123 = vector.extract_strided_slice %61 {offsets = [0, 24], sizes = [8, 8], strides = [1, 1]} : vector<8x32xf32> to vector<8x8xf32>
    %cst_50 = arith.constant dense<0.000000e+00> : vector<8x8xf32>
    %124 = tpu.matmul %122, %123, %cst_50 {dimension_numbers = #tpu.dot_dimension_numbers<[1], [1], [0], [0], [0, 0, 1, 0], [], []>} : vector<8x8xf32>, vector<8x8xf32>, vector<8x8xf32> -> vector<8x8xf32>
    %cst_51 = arith.constant 0.353553385 : f32
    %125 = vector.broadcast %cst_51 : f32 to vector<8x8xf32>
    %126 = arith.mulf %124, %125 : vector<8x8xf32>
    %cst_52 = arith.constant dense<0xFF800000> : vector<8xf32>
    %127 = vector.multi_reduction <maximumf>, %126, %cst_52 [1] : vector<8x8xf32> to vector<8xf32>
    %128 = vector.shape_cast %127 : vector<8xf32> to vector<8x1xf32>
    %129 = vector.broadcast %128 : vector<8x1xf32> to vector<8x8xf32>
    %130 = arith.subf %126, %129 : vector<8x8xf32>
    %131 = math.exp %130 : vector<8x8xf32>
    %cst_53 = arith.constant dense<0.000000e+00> : vector<8xf32>
    %132 = vector.multi_reduction <add>, %131, %cst_53 [1] : vector<8x8xf32> to vector<8xf32>
    %133 = vector.shape_cast %132 : vector<8xf32> to vector<8x1xf32>
    %134 = tpu.reciprocal %133 {approx = true} : vector<8x1xf32> -> vector<8x1xf32>
    %135 = vector.broadcast %134 : vector<8x1xf32> to vector<8x8xf32>
    %136 = arith.mulf %131, %135 : vector<8x8xf32>
    %137 = vector.extract_strided_slice %62 {offsets = [0, 24], sizes = [8, 8], strides = [1, 1]} : vector<8x32xf32> to vector<8x8xf32>
    %cst_54 = arith.constant dense<0.000000e+00> : vector<8x8xf32>
    %138 = tpu.matmul %136, %137, %cst_54 {dimension_numbers = #tpu.dot_dimension_numbers<[1], [0], [0], [1], [0, 0, 1, 1], [], []>} : vector<8x8xf32>, vector<8x8xf32>, vector<8x8xf32> -> vector<8x8xf32>
    %139 = vector.extract_strided_slice %52 {offsets = [24, 96], sizes = [8, 32], strides = [1, 1]} : vector<32x128xf32> to vector<8x32xf32>
    %cst_55 = arith.constant dense<0.000000e+00> : vector<8x32xf32>
    %140 = tpu.matmul %138, %139, %cst_55 {dimension_numbers = #tpu.dot_dimension_numbers<[1], [0], [0], [1], [0, 0, 1, 1], [], []>} : vector<8x8xf32>, vector<8x32xf32>, vector<8x32xf32> -> vector<8x32xf32>
    %141 = arith.addf %121, %140 : vector<8x32xf32>
    %142 = vector.extract_strided_slice %54 {offsets = [0, 96], sizes = [1, 32], strides = [1, 1]} : vector<1x128xf32> to vector<1x32xf32>
    %143 = vector.broadcast %142 : vector<1x32xf32> to vector<8x32xf32>
    %144 = arith.addf %141, %143 : vector<8x32xf32>
    %145 = arith.addf %144, %48 : vector<8x32xf32>
    %146 = vector.extract_strided_slice %50 {offsets = [0, 0], sizes = [1, 32], strides = [1, 1]} : vector<6x32xf32> to vector<1x32xf32>
    %147 = vector.extract_strided_slice %50 {offsets = [1, 0], sizes = [1, 32], strides = [1, 1]} : vector<6x32xf32> to vector<1x32xf32>
    %cst_56 = arith.constant dense<0.000000e+00> : vector<8xf32>
    %148 = vector.multi_reduction <add>, %145, %cst_56 [1] : vector<8x32xf32> to vector<8xf32>
    %149 = vector.shape_cast %148 : vector<8xf32> to vector<8x1xf32>
    %cst_57 = arith.constant 3.200000e+01 : f32
    %150 = vector.broadcast %cst_57 : f32 to vector<8x1xf32>
    %151 = arith.divf %149, %150 : vector<8x1xf32>
    %152 = vector.broadcast %151 : vector<8x1xf32> to vector<8x32xf32>
    %153 = arith.subf %145, %152 : vector<8x32xf32>
    %154 = arith.mulf %153, %153 : vector<8x32xf32>
    %cst_58 = arith.constant dense<0.000000e+00> : vector<8xf32>
    %155 = vector.multi_reduction <add>, %154, %cst_58 [1] : vector<8x32xf32> to vector<8xf32>
    %156 = vector.shape_cast %155 : vector<8xf32> to vector<8x1xf32>
    %cst_59 = arith.constant 3.200000e+01 : f32
    %157 = vector.broadcast %cst_59 : f32 to vector<8x1xf32>
    %158 = arith.divf %156, %157 : vector<8x1xf32>
    %159 = vector.broadcast %151 : vector<8x1xf32> to vector<8x32xf32>
    %160 = arith.subf %145, %159 : vector<8x32xf32>
    %cst_60 = arith.constant 9.99999974E-6 : f32
    %161 = vector.broadcast %cst_60 : f32 to vector<8x1xf32>
    %162 = arith.addf %158, %161 : vector<8x1xf32>
    %163 = math.rsqrt %162 : vector<8x1xf32>
    %164 = vector.broadcast %163 : vector<8x1xf32> to vector<8x32xf32>
    %165 = arith.mulf %160, %164 : vector<8x32xf32>
    %166 = vector.broadcast %146 : vector<1x32xf32> to vector<8x32xf32>
    %167 = arith.mulf %165, %166 : vector<8x32xf32>
    %168 = vector.broadcast %147 : vector<1x32xf32> to vector<8x32xf32>
    %169 = arith.addf %167, %168 : vector<8x32xf32>
    %c1 = arith.constant 1 : index
    %c0_61 = arith.constant 0 : index
    %c0_62 = arith.constant 0 : index
    %170 = vector.load %arg7[%c1, %c0_61, %c0_62] : memref<4x32x128xf32, #tpu.memory_space<vmem>>, vector<1x32x128xf32>
    %171 = vector.shape_cast %170 : vector<1x32x128xf32> to vector<32x128xf32>
    %c1_63 = arith.constant 1 : index
    %c0_64 = arith.constant 0 : index
    %c0_65 = arith.constant 0 : index
    %172 = vector.load %arg8[%c1_63, %c0_64, %c0_65] : memref<4x1x128xf32, #tpu.memory_space<vmem>>, vector<1x1x128xf32>
    %173 = vector.shape_cast %172 : vector<1x1x128xf32> to vector<1x128xf32>
    %174 = vector.extract_strided_slice %171 {offsets = [0, 0], sizes = [32, 32], strides = [1, 1]} : vector<32x128xf32> to vector<32x32xf32>
    %cst_66 = arith.constant dense<0.000000e+00> : vector<8x32xf32>
    %175 = tpu.matmul %169, %174, %cst_66 {dimension_numbers = #tpu.dot_dimension_numbers<[1], [0], [0], [1], [0, 0, 1, 1], [], []>} : vector<8x32xf32>, vector<32x32xf32>, vector<8x32xf32> -> vector<8x32xf32>
    %176 = vector.extract_strided_slice %173 {offsets = [0, 0], sizes = [1, 32], strides = [1, 1]} : vector<1x128xf32> to vector<1x32xf32>
    %177 = vector.broadcast %176 : vector<1x32xf32> to vector<8x32xf32>
    %178 = arith.addf %175, %177 : vector<8x32xf32>
    %179 = vector.extract_strided_slice %171 {offsets = [0, 32], sizes = [32, 64], strides = [1, 1]} : vector<32x128xf32> to vector<32x64xf32>
    %cst_67 = arith.constant dense<0.000000e+00> : vector<16x64xf32>
    %180 = tpu.matmul %1, %179, %cst_67 {dimension_numbers = #tpu.dot_dimension_numbers<[1], [0], [0], [1], [0, 0, 1, 1], [], []>} : vector<16x32xf32>, vector<32x64xf32>, vector<16x64xf32> -> vector<16x64xf32>
    %181 = vector.extract_strided_slice %173 {offsets = [0, 32], sizes = [1, 64], strides = [1, 1]} : vector<1x128xf32> to vector<1x64xf32>
    %182 = vector.broadcast %181 : vector<1x64xf32> to vector<16x64xf32>
    %183 = arith.addf %180, %182 : vector<16x64xf32>
    %184 = vector.extract_strided_slice %183 {offsets = [0, 0], sizes = [16, 32], strides = [1, 1]} : vector<16x64xf32> to vector<16x32xf32>
    %185 = vector.extract_strided_slice %183 {offsets = [0, 32], sizes = [16, 32], strides = [1, 1]} : vector<16x64xf32> to vector<16x32xf32>
    %186 = vector.extract_strided_slice %178 {offsets = [0, 0], sizes = [8, 8], strides = [1, 1]} : vector<8x32xf32> to vector<8x8xf32>
    %187 = vector.extract_strided_slice %184 {offsets = [0, 0], sizes = [16, 8], strides = [1, 1]} : vector<16x32xf32> to vector<16x8xf32>
    %cst_68 = arith.constant dense<0.000000e+00> : vector<8x16xf32>
    %188 = tpu.matmul %186, %187, %cst_68 {dimension_numbers = #tpu.dot_dimension_numbers<[1], [1], [0], [0], [0, 0, 1, 0], [], []>} : vector<8x8xf32>, vector<16x8xf32>, vector<8x16xf32> -> vector<8x16xf32>
    %cst_69 = arith.constant 0.353553385 : f32
    %189 = vector.broadcast %cst_69 : f32 to vector<8x16xf32>
    %190 = arith.mulf %188, %189 : vector<8x16xf32>
    %cst_70 = arith.constant dense<0xFF800000> : vector<8xf32>
    %191 = vector.multi_reduction <maximumf>, %190, %cst_70 [1] : vector<8x16xf32> to vector<8xf32>
    %192 = vector.shape_cast %191 : vector<8xf32> to vector<8x1xf32>
    %193 = vector.broadcast %192 : vector<8x1xf32> to vector<8x16xf32>
    %194 = arith.subf %190, %193 : vector<8x16xf32>
    %195 = math.exp %194 : vector<8x16xf32>
    %cst_71 = arith.constant dense<0.000000e+00> : vector<8xf32>
    %196 = vector.multi_reduction <add>, %195, %cst_71 [1] : vector<8x16xf32> to vector<8xf32>
    %197 = vector.shape_cast %196 : vector<8xf32> to vector<8x1xf32>
    %198 = tpu.reciprocal %197 {approx = true} : vector<8x1xf32> -> vector<8x1xf32>
    %199 = vector.broadcast %198 : vector<8x1xf32> to vector<8x16xf32>
    %200 = arith.mulf %195, %199 : vector<8x16xf32>
    %201 = vector.extract_strided_slice %185 {offsets = [0, 0], sizes = [16, 8], strides = [1, 1]} : vector<16x32xf32> to vector<16x8xf32>
    %cst_72 = arith.constant dense<0.000000e+00> : vector<8x8xf32>
    %202 = tpu.matmul %200, %201, %cst_72 {dimension_numbers = #tpu.dot_dimension_numbers<[1], [0], [0], [1], [0, 0, 1, 1], [], []>} : vector<8x16xf32>, vector<16x8xf32>, vector<8x8xf32> -> vector<8x8xf32>
    %203 = vector.extract_strided_slice %171 {offsets = [0, 96], sizes = [8, 32], strides = [1, 1]} : vector<32x128xf32> to vector<8x32xf32>
    %cst_73 = arith.constant dense<0.000000e+00> : vector<8x32xf32>
    %204 = tpu.matmul %202, %203, %cst_73 {dimension_numbers = #tpu.dot_dimension_numbers<[1], [0], [0], [1], [0, 0, 1, 1], [], []>} : vector<8x8xf32>, vector<8x32xf32>, vector<8x32xf32> -> vector<8x32xf32>
    %205 = vector.extract_strided_slice %178 {offsets = [0, 8], sizes = [8, 8], strides = [1, 1]} : vector<8x32xf32> to vector<8x8xf32>
    %206 = vector.extract_strided_slice %184 {offsets = [0, 8], sizes = [16, 8], strides = [1, 1]} : vector<16x32xf32> to vector<16x8xf32>
    %cst_74 = arith.constant dense<0.000000e+00> : vector<8x16xf32>
    %207 = tpu.matmul %205, %206, %cst_74 {dimension_numbers = #tpu.dot_dimension_numbers<[1], [1], [0], [0], [0, 0, 1, 0], [], []>} : vector<8x8xf32>, vector<16x8xf32>, vector<8x16xf32> -> vector<8x16xf32>
    %cst_75 = arith.constant 0.353553385 : f32
    %208 = vector.broadcast %cst_75 : f32 to vector<8x16xf32>
    %209 = arith.mulf %207, %208 : vector<8x16xf32>
    %cst_76 = arith.constant dense<0xFF800000> : vector<8xf32>
    %210 = vector.multi_reduction <maximumf>, %209, %cst_76 [1] : vector<8x16xf32> to vector<8xf32>
    %211 = vector.shape_cast %210 : vector<8xf32> to vector<8x1xf32>
    %212 = vector.broadcast %211 : vector<8x1xf32> to vector<8x16xf32>
    %213 = arith.subf %209, %212 : vector<8x16xf32>
    %214 = math.exp %213 : vector<8x16xf32>
    %cst_77 = arith.constant dense<0.000000e+00> : vector<8xf32>
    %215 = vector.multi_reduction <add>, %214, %cst_77 [1] : vector<8x16xf32> to vector<8xf32>
    %216 = vector.shape_cast %215 : vector<8xf32> to vector<8x1xf32>
    %217 = tpu.reciprocal %216 {approx = true} : vector<8x1xf32> -> vector<8x1xf32>
    %218 = vector.broadcast %217 : vector<8x1xf32> to vector<8x16xf32>
    %219 = arith.mulf %214, %218 : vector<8x16xf32>
    %220 = vector.extract_strided_slice %185 {offsets = [0, 8], sizes = [16, 8], strides = [1, 1]} : vector<16x32xf32> to vector<16x8xf32>
    %cst_78 = arith.constant dense<0.000000e+00> : vector<8x8xf32>
    %221 = tpu.matmul %219, %220, %cst_78 {dimension_numbers = #tpu.dot_dimension_numbers<[1], [0], [0], [1], [0, 0, 1, 1], [], []>} : vector<8x16xf32>, vector<16x8xf32>, vector<8x8xf32> -> vector<8x8xf32>
    %222 = vector.extract_strided_slice %171 {offsets = [8, 96], sizes = [8, 32], strides = [1, 1]} : vector<32x128xf32> to vector<8x32xf32>
    %cst_79 = arith.constant dense<0.000000e+00> : vector<8x32xf32>
    %223 = tpu.matmul %221, %222, %cst_79 {dimension_numbers = #tpu.dot_dimension_numbers<[1], [0], [0], [1], [0, 0, 1, 1], [], []>} : vector<8x8xf32>, vector<8x32xf32>, vector<8x32xf32> -> vector<8x32xf32>
    %224 = arith.addf %204, %223 : vector<8x32xf32>
    %225 = vector.extract_strided_slice %178 {offsets = [0, 16], sizes = [8, 8], strides = [1, 1]} : vector<8x32xf32> to vector<8x8xf32>
    %226 = vector.extract_strided_slice %184 {offsets = [0, 16], sizes = [16, 8], strides = [1, 1]} : vector<16x32xf32> to vector<16x8xf32>
    %cst_80 = arith.constant dense<0.000000e+00> : vector<8x16xf32>
    %227 = tpu.matmul %225, %226, %cst_80 {dimension_numbers = #tpu.dot_dimension_numbers<[1], [1], [0], [0], [0, 0, 1, 0], [], []>} : vector<8x8xf32>, vector<16x8xf32>, vector<8x16xf32> -> vector<8x16xf32>
    %cst_81 = arith.constant 0.353553385 : f32
    %228 = vector.broadcast %cst_81 : f32 to vector<8x16xf32>
    %229 = arith.mulf %227, %228 : vector<8x16xf32>
    %cst_82 = arith.constant dense<0xFF800000> : vector<8xf32>
    %230 = vector.multi_reduction <maximumf>, %229, %cst_82 [1] : vector<8x16xf32> to vector<8xf32>
    %231 = vector.shape_cast %230 : vector<8xf32> to vector<8x1xf32>
    %232 = vector.broadcast %231 : vector<8x1xf32> to vector<8x16xf32>
    %233 = arith.subf %229, %232 : vector<8x16xf32>
    %234 = math.exp %233 : vector<8x16xf32>
    %cst_83 = arith.constant dense<0.000000e+00> : vector<8xf32>
    %235 = vector.multi_reduction <add>, %234, %cst_83 [1] : vector<8x16xf32> to vector<8xf32>
    %236 = vector.shape_cast %235 : vector<8xf32> to vector<8x1xf32>
    %237 = tpu.reciprocal %236 {approx = true} : vector<8x1xf32> -> vector<8x1xf32>
    %238 = vector.broadcast %237 : vector<8x1xf32> to vector<8x16xf32>
    %239 = arith.mulf %234, %238 : vector<8x16xf32>
    %240 = vector.extract_strided_slice %185 {offsets = [0, 16], sizes = [16, 8], strides = [1, 1]} : vector<16x32xf32> to vector<16x8xf32>
    %cst_84 = arith.constant dense<0.000000e+00> : vector<8x8xf32>
    %241 = tpu.matmul %239, %240, %cst_84 {dimension_numbers = #tpu.dot_dimension_numbers<[1], [0], [0], [1], [0, 0, 1, 1], [], []>} : vector<8x16xf32>, vector<16x8xf32>, vector<8x8xf32> -> vector<8x8xf32>
    %242 = vector.extract_strided_slice %171 {offsets = [16, 96], sizes = [8, 32], strides = [1, 1]} : vector<32x128xf32> to vector<8x32xf32>
    %cst_85 = arith.constant dense<0.000000e+00> : vector<8x32xf32>
    %243 = tpu.matmul %241, %242, %cst_85 {dimension_numbers = #tpu.dot_dimension_numbers<[1], [0], [0], [1], [0, 0, 1, 1], [], []>} : vector<8x8xf32>, vector<8x32xf32>, vector<8x32xf32> -> vector<8x32xf32>
    %244 = arith.addf %224, %243 : vector<8x32xf32>
    %245 = vector.extract_strided_slice %178 {offsets = [0, 24], sizes = [8, 8], strides = [1, 1]} : vector<8x32xf32> to vector<8x8xf32>
    %246 = vector.extract_strided_slice %184 {offsets = [0, 24], sizes = [16, 8], strides = [1, 1]} : vector<16x32xf32> to vector<16x8xf32>
    %cst_86 = arith.constant dense<0.000000e+00> : vector<8x16xf32>
    %247 = tpu.matmul %245, %246, %cst_86 {dimension_numbers = #tpu.dot_dimension_numbers<[1], [1], [0], [0], [0, 0, 1, 0], [], []>} : vector<8x8xf32>, vector<16x8xf32>, vector<8x16xf32> -> vector<8x16xf32>
    %cst_87 = arith.constant 0.353553385 : f32
    %248 = vector.broadcast %cst_87 : f32 to vector<8x16xf32>
    %249 = arith.mulf %247, %248 : vector<8x16xf32>
    %cst_88 = arith.constant dense<0xFF800000> : vector<8xf32>
    %250 = vector.multi_reduction <maximumf>, %249, %cst_88 [1] : vector<8x16xf32> to vector<8xf32>
    %251 = vector.shape_cast %250 : vector<8xf32> to vector<8x1xf32>
    %252 = vector.broadcast %251 : vector<8x1xf32> to vector<8x16xf32>
    %253 = arith.subf %249, %252 : vector<8x16xf32>
    %254 = math.exp %253 : vector<8x16xf32>
    %cst_89 = arith.constant dense<0.000000e+00> : vector<8xf32>
    %255 = vector.multi_reduction <add>, %254, %cst_89 [1] : vector<8x16xf32> to vector<8xf32>
    %256 = vector.shape_cast %255 : vector<8xf32> to vector<8x1xf32>
    %257 = tpu.reciprocal %256 {approx = true} : vector<8x1xf32> -> vector<8x1xf32>
    %258 = vector.broadcast %257 : vector<8x1xf32> to vector<8x16xf32>
    %259 = arith.mulf %254, %258 : vector<8x16xf32>
    %260 = vector.extract_strided_slice %185 {offsets = [0, 24], sizes = [16, 8], strides = [1, 1]} : vector<16x32xf32> to vector<16x8xf32>
    %cst_90 = arith.constant dense<0.000000e+00> : vector<8x8xf32>
    %261 = tpu.matmul %259, %260, %cst_90 {dimension_numbers = #tpu.dot_dimension_numbers<[1], [0], [0], [1], [0, 0, 1, 1], [], []>} : vector<8x16xf32>, vector<16x8xf32>, vector<8x8xf32> -> vector<8x8xf32>
    %262 = vector.extract_strided_slice %171 {offsets = [24, 96], sizes = [8, 32], strides = [1, 1]} : vector<32x128xf32> to vector<8x32xf32>
    %cst_91 = arith.constant dense<0.000000e+00> : vector<8x32xf32>
    %263 = tpu.matmul %261, %262, %cst_91 {dimension_numbers = #tpu.dot_dimension_numbers<[1], [0], [0], [1], [0, 0, 1, 1], [], []>} : vector<8x8xf32>, vector<8x32xf32>, vector<8x32xf32> -> vector<8x32xf32>
    %264 = arith.addf %244, %263 : vector<8x32xf32>
    %265 = vector.extract_strided_slice %173 {offsets = [0, 96], sizes = [1, 32], strides = [1, 1]} : vector<1x128xf32> to vector<1x32xf32>
    %266 = vector.broadcast %265 : vector<1x32xf32> to vector<8x32xf32>
    %267 = arith.addf %264, %266 : vector<8x32xf32>
    %268 = arith.addf %267, %169 : vector<8x32xf32>
    %269 = vector.extract_strided_slice %50 {offsets = [2, 0], sizes = [1, 32], strides = [1, 1]} : vector<6x32xf32> to vector<1x32xf32>
    %270 = vector.extract_strided_slice %50 {offsets = [3, 0], sizes = [1, 32], strides = [1, 1]} : vector<6x32xf32> to vector<1x32xf32>
    %cst_92 = arith.constant dense<0.000000e+00> : vector<8xf32>
    %271 = vector.multi_reduction <add>, %268, %cst_92 [1] : vector<8x32xf32> to vector<8xf32>
    %272 = vector.shape_cast %271 : vector<8xf32> to vector<8x1xf32>
    %cst_93 = arith.constant 3.200000e+01 : f32
    %273 = vector.broadcast %cst_93 : f32 to vector<8x1xf32>
    %274 = arith.divf %272, %273 : vector<8x1xf32>
    %275 = vector.broadcast %274 : vector<8x1xf32> to vector<8x32xf32>
    %276 = arith.subf %268, %275 : vector<8x32xf32>
    %277 = arith.mulf %276, %276 : vector<8x32xf32>
    %cst_94 = arith.constant dense<0.000000e+00> : vector<8xf32>
    %278 = vector.multi_reduction <add>, %277, %cst_94 [1] : vector<8x32xf32> to vector<8xf32>
    %279 = vector.shape_cast %278 : vector<8xf32> to vector<8x1xf32>
    %cst_95 = arith.constant 3.200000e+01 : f32
    %280 = vector.broadcast %cst_95 : f32 to vector<8x1xf32>
    %281 = arith.divf %279, %280 : vector<8x1xf32>
    %282 = vector.broadcast %274 : vector<8x1xf32> to vector<8x32xf32>
    %283 = arith.subf %268, %282 : vector<8x32xf32>
    %cst_96 = arith.constant 9.99999974E-6 : f32
    %284 = vector.broadcast %cst_96 : f32 to vector<8x1xf32>
    %285 = arith.addf %281, %284 : vector<8x1xf32>
    %286 = math.rsqrt %285 : vector<8x1xf32>
    %287 = vector.broadcast %286 : vector<8x1xf32> to vector<8x32xf32>
    %288 = arith.mulf %283, %287 : vector<8x32xf32>
    %289 = vector.broadcast %269 : vector<1x32xf32> to vector<8x32xf32>
    %290 = arith.mulf %288, %289 : vector<8x32xf32>
    %291 = vector.broadcast %270 : vector<1x32xf32> to vector<8x32xf32>
    %292 = arith.addf %290, %291 : vector<8x32xf32>
    %c0_97 = arith.constant 0 : index
    %c0_98 = arith.constant 0 : index
    %c0_99 = arith.constant 0 : index
    %293 = vector.load %arg9[%c0_97, %c0_98, %c0_99] : memref<2x32x128xf32, #tpu.memory_space<vmem>>, vector<1x32x128xf32>
    %294 = vector.shape_cast %293 : vector<1x32x128xf32> to vector<32x128xf32>
    %cst_100 = arith.constant dense<0.000000e+00> : vector<8x128xf32>
    %295 = tpu.matmul %292, %294, %cst_100 {dimension_numbers = #tpu.dot_dimension_numbers<[1], [0], [0], [1], [0, 0, 1, 1], [], []>} : vector<8x32xf32>, vector<32x128xf32>, vector<8x128xf32> -> vector<8x128xf32>
    %c0_101 = arith.constant 0 : index
    %c0_102 = arith.constant 0 : index
    %c0_103 = arith.constant 0 : index
    %296 = vector.load %arg10[%c0_101, %c0_102, %c0_103] : memref<2x1x128xf32, #tpu.memory_space<vmem>>, vector<1x1x128xf32>
    %297 = vector.shape_cast %296 : vector<1x1x128xf32> to vector<1x128xf32>
    %298 = vector.broadcast %297 : vector<1x128xf32> to vector<8x128xf32>
    %299 = arith.addf %295, %298 : vector<8x128xf32>
    %cst_104 = arith.constant 0.000000e+00 : f32
    %300 = vector.broadcast %cst_104 : f32 to vector<8x128xf32>
    %301 = arith.maximumf %299, %300 : vector<8x128xf32>
    %c0_105 = arith.constant 0 : index
    %c0_106 = arith.constant 0 : index
    %c0_107 = arith.constant 0 : index
    %302 = vector.load %arg11[%c0_105, %c0_106, %c0_107] : memref<2x128x32xf32, #tpu.memory_space<vmem>>, vector<1x128x32xf32>
    %303 = vector.shape_cast %302 : vector<1x128x32xf32> to vector<128x32xf32>
    %cst_108 = arith.constant dense<0.000000e+00> : vector<8x32xf32>
    %304 = tpu.matmul %301, %303, %cst_108 {dimension_numbers = #tpu.dot_dimension_numbers<[1], [0], [0], [1], [0, 0, 1, 1], [], []>} : vector<8x128xf32>, vector<128x32xf32>, vector<8x32xf32> -> vector<8x32xf32>
    %c0_109 = arith.constant 0 : index
    %c0_110 = arith.constant 0 : index
    %c0_111 = arith.constant 0 : index
    %305 = vector.load %arg12[%c0_109, %c0_110, %c0_111] : memref<2x1x32xf32, #tpu.memory_space<vmem>>, vector<1x1x32xf32>
    %306 = vector.shape_cast %305 : vector<1x1x32xf32> to vector<1x32xf32>
    %307 = vector.broadcast %306 : vector<1x32xf32> to vector<8x32xf32>
    %308 = arith.addf %304, %307 : vector<8x32xf32>
    %309 = arith.addf %308, %292 : vector<8x32xf32>
    %310 = vector.extract_strided_slice %50 {offsets = [4, 0], sizes = [1, 32], strides = [1, 1]} : vector<6x32xf32> to vector<1x32xf32>
    %311 = vector.extract_strided_slice %50 {offsets = [5, 0], sizes = [1, 32], strides = [1, 1]} : vector<6x32xf32> to vector<1x32xf32>
    %cst_112 = arith.constant dense<0.000000e+00> : vector<8xf32>
    %312 = vector.multi_reduction <add>, %309, %cst_112 [1] : vector<8x32xf32> to vector<8xf32>
    %313 = vector.shape_cast %312 : vector<8xf32> to vector<8x1xf32>
    %cst_113 = arith.constant 3.200000e+01 : f32
    %314 = vector.broadcast %cst_113 : f32 to vector<8x1xf32>
    %315 = arith.divf %313, %314 : vector<8x1xf32>
    %316 = vector.broadcast %315 : vector<8x1xf32> to vector<8x32xf32>
    %317 = arith.subf %309, %316 : vector<8x32xf32>
    %318 = arith.mulf %317, %317 : vector<8x32xf32>
    %cst_114 = arith.constant dense<0.000000e+00> : vector<8xf32>
    %319 = vector.multi_reduction <add>, %318, %cst_114 [1] : vector<8x32xf32> to vector<8xf32>
    %320 = vector.shape_cast %319 : vector<8xf32> to vector<8x1xf32>
    %cst_115 = arith.constant 3.200000e+01 : f32
    %321 = vector.broadcast %cst_115 : f32 to vector<8x1xf32>
    %322 = arith.divf %320, %321 : vector<8x1xf32>
    %323 = vector.broadcast %315 : vector<8x1xf32> to vector<8x32xf32>
    %324 = arith.subf %309, %323 : vector<8x32xf32>
    %cst_116 = arith.constant 9.99999974E-6 : f32
    %325 = vector.broadcast %cst_116 : f32 to vector<8x1xf32>
    %326 = arith.addf %322, %325 : vector<8x1xf32>
    %327 = math.rsqrt %326 : vector<8x1xf32>
    %328 = vector.broadcast %327 : vector<8x1xf32> to vector<8x32xf32>
    %329 = arith.mulf %324, %328 : vector<8x32xf32>
    %330 = vector.broadcast %310 : vector<1x32xf32> to vector<8x32xf32>
    %331 = arith.mulf %329, %330 : vector<8x32xf32>
    %332 = vector.broadcast %311 : vector<1x32xf32> to vector<8x32xf32>
    %333 = arith.addf %331, %332 : vector<8x32xf32>
    %c1_117 = arith.constant 1 : index
    %c0_118 = arith.constant 0 : index
    %c0_119 = arith.constant 0 : index
    %334 = vector.load %arg13[%c1_117, %c0_118, %c0_119] : memref<2x6x32xf32, #tpu.memory_space<vmem>>, vector<1x6x32xf32>
    %335 = vector.shape_cast %334 : vector<1x6x32xf32> to vector<6x32xf32>
    %c2 = arith.constant 2 : index
    %c0_120 = arith.constant 0 : index
    %c0_121 = arith.constant 0 : index
    %336 = vector.load %arg7[%c2, %c0_120, %c0_121] : memref<4x32x128xf32, #tpu.memory_space<vmem>>, vector<1x32x128xf32>
    %337 = vector.shape_cast %336 : vector<1x32x128xf32> to vector<32x128xf32>
    %c2_122 = arith.constant 2 : index
    %c0_123 = arith.constant 0 : index
    %c0_124 = arith.constant 0 : index
    %338 = vector.load %arg8[%c2_122, %c0_123, %c0_124] : memref<4x1x128xf32, #tpu.memory_space<vmem>>, vector<1x1x128xf32>
    %339 = vector.shape_cast %338 : vector<1x1x128xf32> to vector<1x128xf32>
    %340 = vector.extract_strided_slice %337 {offsets = [0, 0], sizes = [32, 96], strides = [1, 1]} : vector<32x128xf32> to vector<32x96xf32>
    %cst_125 = arith.constant dense<0.000000e+00> : vector<8x96xf32>
    %341 = tpu.matmul %333, %340, %cst_125 {dimension_numbers = #tpu.dot_dimension_numbers<[1], [0], [0], [1], [0, 0, 1, 1], [], []>} : vector<8x32xf32>, vector<32x96xf32>, vector<8x96xf32> -> vector<8x96xf32>
    %342 = vector.extract_strided_slice %339 {offsets = [0, 0], sizes = [1, 96], strides = [1, 1]} : vector<1x128xf32> to vector<1x96xf32>
    %343 = vector.broadcast %342 : vector<1x96xf32> to vector<8x96xf32>
    %344 = arith.addf %341, %343 : vector<8x96xf32>
    %345 = vector.extract_strided_slice %344 {offsets = [0, 0], sizes = [8, 32], strides = [1, 1]} : vector<8x96xf32> to vector<8x32xf32>
    %346 = vector.extract_strided_slice %344 {offsets = [0, 32], sizes = [8, 32], strides = [1, 1]} : vector<8x96xf32> to vector<8x32xf32>
    %347 = vector.extract_strided_slice %344 {offsets = [0, 64], sizes = [8, 32], strides = [1, 1]} : vector<8x96xf32> to vector<8x32xf32>
    %348 = vector.extract_strided_slice %345 {offsets = [0, 0], sizes = [8, 8], strides = [1, 1]} : vector<8x32xf32> to vector<8x8xf32>
    %349 = vector.extract_strided_slice %346 {offsets = [0, 0], sizes = [8, 8], strides = [1, 1]} : vector<8x32xf32> to vector<8x8xf32>
    %cst_126 = arith.constant dense<0.000000e+00> : vector<8x8xf32>
    %350 = tpu.matmul %348, %349, %cst_126 {dimension_numbers = #tpu.dot_dimension_numbers<[1], [1], [0], [0], [0, 0, 1, 0], [], []>} : vector<8x8xf32>, vector<8x8xf32>, vector<8x8xf32> -> vector<8x8xf32>
    %cst_127 = arith.constant 0.353553385 : f32
    %351 = vector.broadcast %cst_127 : f32 to vector<8x8xf32>
    %352 = arith.mulf %350, %351 : vector<8x8xf32>
    %cst_128 = arith.constant dense<0xFF800000> : vector<8xf32>
    %353 = vector.multi_reduction <maximumf>, %352, %cst_128 [1] : vector<8x8xf32> to vector<8xf32>
    %354 = vector.shape_cast %353 : vector<8xf32> to vector<8x1xf32>
    %355 = vector.broadcast %354 : vector<8x1xf32> to vector<8x8xf32>
    %356 = arith.subf %352, %355 : vector<8x8xf32>
    %357 = math.exp %356 : vector<8x8xf32>
    %cst_129 = arith.constant dense<0.000000e+00> : vector<8xf32>
    %358 = vector.multi_reduction <add>, %357, %cst_129 [1] : vector<8x8xf32> to vector<8xf32>
    %359 = vector.shape_cast %358 : vector<8xf32> to vector<8x1xf32>
    %360 = tpu.reciprocal %359 {approx = true} : vector<8x1xf32> -> vector<8x1xf32>
    %361 = vector.broadcast %360 : vector<8x1xf32> to vector<8x8xf32>
    %362 = arith.mulf %357, %361 : vector<8x8xf32>
    %363 = vector.extract_strided_slice %347 {offsets = [0, 0], sizes = [8, 8], strides = [1, 1]} : vector<8x32xf32> to vector<8x8xf32>
    %cst_130 = arith.constant dense<0.000000e+00> : vector<8x8xf32>
    %364 = tpu.matmul %362, %363, %cst_130 {dimension_numbers = #tpu.dot_dimension_numbers<[1], [0], [0], [1], [0, 0, 1, 1], [], []>} : vector<8x8xf32>, vector<8x8xf32>, vector<8x8xf32> -> vector<8x8xf32>
    %365 = vector.extract_strided_slice %337 {offsets = [0, 96], sizes = [8, 32], strides = [1, 1]} : vector<32x128xf32> to vector<8x32xf32>
    %cst_131 = arith.constant dense<0.000000e+00> : vector<8x32xf32>
    %366 = tpu.matmul %364, %365, %cst_131 {dimension_numbers = #tpu.dot_dimension_numbers<[1], [0], [0], [1], [0, 0, 1, 1], [], []>} : vector<8x8xf32>, vector<8x32xf32>, vector<8x32xf32> -> vector<8x32xf32>
    %367 = vector.extract_strided_slice %345 {offsets = [0, 8], sizes = [8, 8], strides = [1, 1]} : vector<8x32xf32> to vector<8x8xf32>
    %368 = vector.extract_strided_slice %346 {offsets = [0, 8], sizes = [8, 8], strides = [1, 1]} : vector<8x32xf32> to vector<8x8xf32>
    %cst_132 = arith.constant dense<0.000000e+00> : vector<8x8xf32>
    %369 = tpu.matmul %367, %368, %cst_132 {dimension_numbers = #tpu.dot_dimension_numbers<[1], [1], [0], [0], [0, 0, 1, 0], [], []>} : vector<8x8xf32>, vector<8x8xf32>, vector<8x8xf32> -> vector<8x8xf32>
    %cst_133 = arith.constant 0.353553385 : f32
    %370 = vector.broadcast %cst_133 : f32 to vector<8x8xf32>
    %371 = arith.mulf %369, %370 : vector<8x8xf32>
    %cst_134 = arith.constant dense<0xFF800000> : vector<8xf32>
    %372 = vector.multi_reduction <maximumf>, %371, %cst_134 [1] : vector<8x8xf32> to vector<8xf32>
    %373 = vector.shape_cast %372 : vector<8xf32> to vector<8x1xf32>
    %374 = vector.broadcast %373 : vector<8x1xf32> to vector<8x8xf32>
    %375 = arith.subf %371, %374 : vector<8x8xf32>
    %376 = math.exp %375 : vector<8x8xf32>
    %cst_135 = arith.constant dense<0.000000e+00> : vector<8xf32>
    %377 = vector.multi_reduction <add>, %376, %cst_135 [1] : vector<8x8xf32> to vector<8xf32>
    %378 = vector.shape_cast %377 : vector<8xf32> to vector<8x1xf32>
    %379 = tpu.reciprocal %378 {approx = true} : vector<8x1xf32> -> vector<8x1xf32>
    %380 = vector.broadcast %379 : vector<8x1xf32> to vector<8x8xf32>
    %381 = arith.mulf %376, %380 : vector<8x8xf32>
    %382 = vector.extract_strided_slice %347 {offsets = [0, 8], sizes = [8, 8], strides = [1, 1]} : vector<8x32xf32> to vector<8x8xf32>
    %cst_136 = arith.constant dense<0.000000e+00> : vector<8x8xf32>
    %383 = tpu.matmul %381, %382, %cst_136 {dimension_numbers = #tpu.dot_dimension_numbers<[1], [0], [0], [1], [0, 0, 1, 1], [], []>} : vector<8x8xf32>, vector<8x8xf32>, vector<8x8xf32> -> vector<8x8xf32>
    %384 = vector.extract_strided_slice %337 {offsets = [8, 96], sizes = [8, 32], strides = [1, 1]} : vector<32x128xf32> to vector<8x32xf32>
    %cst_137 = arith.constant dense<0.000000e+00> : vector<8x32xf32>
    %385 = tpu.matmul %383, %384, %cst_137 {dimension_numbers = #tpu.dot_dimension_numbers<[1], [0], [0], [1], [0, 0, 1, 1], [], []>} : vector<8x8xf32>, vector<8x32xf32>, vector<8x32xf32> -> vector<8x32xf32>
    %386 = arith.addf %366, %385 : vector<8x32xf32>
    %387 = vector.extract_strided_slice %345 {offsets = [0, 16], sizes = [8, 8], strides = [1, 1]} : vector<8x32xf32> to vector<8x8xf32>
    %388 = vector.extract_strided_slice %346 {offsets = [0, 16], sizes = [8, 8], strides = [1, 1]} : vector<8x32xf32> to vector<8x8xf32>
    %cst_138 = arith.constant dense<0.000000e+00> : vector<8x8xf32>
    %389 = tpu.matmul %387, %388, %cst_138 {dimension_numbers = #tpu.dot_dimension_numbers<[1], [1], [0], [0], [0, 0, 1, 0], [], []>} : vector<8x8xf32>, vector<8x8xf32>, vector<8x8xf32> -> vector<8x8xf32>
    %cst_139 = arith.constant 0.353553385 : f32
    %390 = vector.broadcast %cst_139 : f32 to vector<8x8xf32>
    %391 = arith.mulf %389, %390 : vector<8x8xf32>
    %cst_140 = arith.constant dense<0xFF800000> : vector<8xf32>
    %392 = vector.multi_reduction <maximumf>, %391, %cst_140 [1] : vector<8x8xf32> to vector<8xf32>
    %393 = vector.shape_cast %392 : vector<8xf32> to vector<8x1xf32>
    %394 = vector.broadcast %393 : vector<8x1xf32> to vector<8x8xf32>
    %395 = arith.subf %391, %394 : vector<8x8xf32>
    %396 = math.exp %395 : vector<8x8xf32>
    %cst_141 = arith.constant dense<0.000000e+00> : vector<8xf32>
    %397 = vector.multi_reduction <add>, %396, %cst_141 [1] : vector<8x8xf32> to vector<8xf32>
    %398 = vector.shape_cast %397 : vector<8xf32> to vector<8x1xf32>
    %399 = tpu.reciprocal %398 {approx = true} : vector<8x1xf32> -> vector<8x1xf32>
    %400 = vector.broadcast %399 : vector<8x1xf32> to vector<8x8xf32>
    %401 = arith.mulf %396, %400 : vector<8x8xf32>
    %402 = vector.extract_strided_slice %347 {offsets = [0, 16], sizes = [8, 8], strides = [1, 1]} : vector<8x32xf32> to vector<8x8xf32>
    %cst_142 = arith.constant dense<0.000000e+00> : vector<8x8xf32>
    %403 = tpu.matmul %401, %402, %cst_142 {dimension_numbers = #tpu.dot_dimension_numbers<[1], [0], [0], [1], [0, 0, 1, 1], [], []>} : vector<8x8xf32>, vector<8x8xf32>, vector<8x8xf32> -> vector<8x8xf32>
    %404 = vector.extract_strided_slice %337 {offsets = [16, 96], sizes = [8, 32], strides = [1, 1]} : vector<32x128xf32> to vector<8x32xf32>
    %cst_143 = arith.constant dense<0.000000e+00> : vector<8x32xf32>
    %405 = tpu.matmul %403, %404, %cst_143 {dimension_numbers = #tpu.dot_dimension_numbers<[1], [0], [0], [1], [0, 0, 1, 1], [], []>} : vector<8x8xf32>, vector<8x32xf32>, vector<8x32xf32> -> vector<8x32xf32>
    %406 = arith.addf %386, %405 : vector<8x32xf32>
    %407 = vector.extract_strided_slice %345 {offsets = [0, 24], sizes = [8, 8], strides = [1, 1]} : vector<8x32xf32> to vector<8x8xf32>
    %408 = vector.extract_strided_slice %346 {offsets = [0, 24], sizes = [8, 8], strides = [1, 1]} : vector<8x32xf32> to vector<8x8xf32>
    %cst_144 = arith.constant dense<0.000000e+00> : vector<8x8xf32>
    %409 = tpu.matmul %407, %408, %cst_144 {dimension_numbers = #tpu.dot_dimension_numbers<[1], [1], [0], [0], [0, 0, 1, 0], [], []>} : vector<8x8xf32>, vector<8x8xf32>, vector<8x8xf32> -> vector<8x8xf32>
    %cst_145 = arith.constant 0.353553385 : f32
    %410 = vector.broadcast %cst_145 : f32 to vector<8x8xf32>
    %411 = arith.mulf %409, %410 : vector<8x8xf32>
    %cst_146 = arith.constant dense<0xFF800000> : vector<8xf32>
    %412 = vector.multi_reduction <maximumf>, %411, %cst_146 [1] : vector<8x8xf32> to vector<8xf32>
    %413 = vector.shape_cast %412 : vector<8xf32> to vector<8x1xf32>
    %414 = vector.broadcast %413 : vector<8x1xf32> to vector<8x8xf32>
    %415 = arith.subf %411, %414 : vector<8x8xf32>
    %416 = math.exp %415 : vector<8x8xf32>
    %cst_147 = arith.constant dense<0.000000e+00> : vector<8xf32>
    %417 = vector.multi_reduction <add>, %416, %cst_147 [1] : vector<8x8xf32> to vector<8xf32>
    %418 = vector.shape_cast %417 : vector<8xf32> to vector<8x1xf32>
    %419 = tpu.reciprocal %418 {approx = true} : vector<8x1xf32> -> vector<8x1xf32>
    %420 = vector.broadcast %419 : vector<8x1xf32> to vector<8x8xf32>
    %421 = arith.mulf %416, %420 : vector<8x8xf32>
    %422 = vector.extract_strided_slice %347 {offsets = [0, 24], sizes = [8, 8], strides = [1, 1]} : vector<8x32xf32> to vector<8x8xf32>
    %cst_148 = arith.constant dense<0.000000e+00> : vector<8x8xf32>
    %423 = tpu.matmul %421, %422, %cst_148 {dimension_numbers = #tpu.dot_dimension_numbers<[1], [0], [0], [1], [0, 0, 1, 1], [], []>} : vector<8x8xf32>, vector<8x8xf32>, vector<8x8xf32> -> vector<8x8xf32>
    %424 = vector.extract_strided_slice %337 {offsets = [24, 96], sizes = [8, 32], strides = [1, 1]} : vector<32x128xf32> to vector<8x32xf32>
    %cst_149 = arith.constant dense<0.000000e+00> : vector<8x32xf32>
    %425 = tpu.matmul %423, %424, %cst_149 {dimension_numbers = #tpu.dot_dimension_numbers<[1], [0], [0], [1], [0, 0, 1, 1], [], []>} : vector<8x8xf32>, vector<8x32xf32>, vector<8x32xf32> -> vector<8x32xf32>
    %426 = arith.addf %406, %425 : vector<8x32xf32>
    %427 = vector.extract_strided_slice %339 {offsets = [0, 96], sizes = [1, 32], strides = [1, 1]} : vector<1x128xf32> to vector<1x32xf32>
    %428 = vector.broadcast %427 : vector<1x32xf32> to vector<8x32xf32>
    %429 = arith.addf %426, %428 : vector<8x32xf32>
    %430 = arith.addf %429, %333 : vector<8x32xf32>
    %431 = vector.extract_strided_slice %335 {offsets = [0, 0], sizes = [1, 32], strides = [1, 1]} : vector<6x32xf32> to vector<1x32xf32>
    %432 = vector.extract_strided_slice %335 {offsets = [1, 0], sizes = [1, 32], strides = [1, 1]} : vector<6x32xf32> to vector<1x32xf32>
    %cst_150 = arith.constant dense<0.000000e+00> : vector<8xf32>
    %433 = vector.multi_reduction <add>, %430, %cst_150 [1] : vector<8x32xf32> to vector<8xf32>
    %434 = vector.shape_cast %433 : vector<8xf32> to vector<8x1xf32>
    %cst_151 = arith.constant 3.200000e+01 : f32
    %435 = vector.broadcast %cst_151 : f32 to vector<8x1xf32>
    %436 = arith.divf %434, %435 : vector<8x1xf32>
    %437 = vector.broadcast %436 : vector<8x1xf32> to vector<8x32xf32>
    %438 = arith.subf %430, %437 : vector<8x32xf32>
    %439 = arith.mulf %438, %438 : vector<8x32xf32>
    %cst_152 = arith.constant dense<0.000000e+00> : vector<8xf32>
    %440 = vector.multi_reduction <add>, %439, %cst_152 [1] : vector<8x32xf32> to vector<8xf32>
    %441 = vector.shape_cast %440 : vector<8xf32> to vector<8x1xf32>
    %cst_153 = arith.constant 3.200000e+01 : f32
    %442 = vector.broadcast %cst_153 : f32 to vector<8x1xf32>
    %443 = arith.divf %441, %442 : vector<8x1xf32>
    %444 = vector.broadcast %436 : vector<8x1xf32> to vector<8x32xf32>
    %445 = arith.subf %430, %444 : vector<8x32xf32>
    %cst_154 = arith.constant 9.99999974E-6 : f32
    %446 = vector.broadcast %cst_154 : f32 to vector<8x1xf32>
    %447 = arith.addf %443, %446 : vector<8x1xf32>
    %448 = math.rsqrt %447 : vector<8x1xf32>
    %449 = vector.broadcast %448 : vector<8x1xf32> to vector<8x32xf32>
    %450 = arith.mulf %445, %449 : vector<8x32xf32>
    %451 = vector.broadcast %431 : vector<1x32xf32> to vector<8x32xf32>
    %452 = arith.mulf %450, %451 : vector<8x32xf32>
    %453 = vector.broadcast %432 : vector<1x32xf32> to vector<8x32xf32>
    %454 = arith.addf %452, %453 : vector<8x32xf32>
    %c3 = arith.constant 3 : index
    %c0_155 = arith.constant 0 : index
    %c0_156 = arith.constant 0 : index
    %455 = vector.load %arg7[%c3, %c0_155, %c0_156] : memref<4x32x128xf32, #tpu.memory_space<vmem>>, vector<1x32x128xf32>
    %456 = vector.shape_cast %455 : vector<1x32x128xf32> to vector<32x128xf32>
    %c3_157 = arith.constant 3 : index
    %c0_158 = arith.constant 0 : index
    %c0_159 = arith.constant 0 : index
    %457 = vector.load %arg8[%c3_157, %c0_158, %c0_159] : memref<4x1x128xf32, #tpu.memory_space<vmem>>, vector<1x1x128xf32>
    %458 = vector.shape_cast %457 : vector<1x1x128xf32> to vector<1x128xf32>
    %459 = vector.extract_strided_slice %456 {offsets = [0, 0], sizes = [32, 32], strides = [1, 1]} : vector<32x128xf32> to vector<32x32xf32>
    %cst_160 = arith.constant dense<0.000000e+00> : vector<8x32xf32>
    %460 = tpu.matmul %454, %459, %cst_160 {dimension_numbers = #tpu.dot_dimension_numbers<[1], [0], [0], [1], [0, 0, 1, 1], [], []>} : vector<8x32xf32>, vector<32x32xf32>, vector<8x32xf32> -> vector<8x32xf32>
    %461 = vector.extract_strided_slice %458 {offsets = [0, 0], sizes = [1, 32], strides = [1, 1]} : vector<1x128xf32> to vector<1x32xf32>
    %462 = vector.broadcast %461 : vector<1x32xf32> to vector<8x32xf32>
    %463 = arith.addf %460, %462 : vector<8x32xf32>
    %464 = vector.extract_strided_slice %456 {offsets = [0, 32], sizes = [32, 64], strides = [1, 1]} : vector<32x128xf32> to vector<32x64xf32>
    %cst_161 = arith.constant dense<0.000000e+00> : vector<16x64xf32>
    %465 = tpu.matmul %1, %464, %cst_161 {dimension_numbers = #tpu.dot_dimension_numbers<[1], [0], [0], [1], [0, 0, 1, 1], [], []>} : vector<16x32xf32>, vector<32x64xf32>, vector<16x64xf32> -> vector<16x64xf32>
    %466 = vector.extract_strided_slice %458 {offsets = [0, 32], sizes = [1, 64], strides = [1, 1]} : vector<1x128xf32> to vector<1x64xf32>
    %467 = vector.broadcast %466 : vector<1x64xf32> to vector<16x64xf32>
    %468 = arith.addf %465, %467 : vector<16x64xf32>
    %469 = vector.extract_strided_slice %468 {offsets = [0, 0], sizes = [16, 32], strides = [1, 1]} : vector<16x64xf32> to vector<16x32xf32>
    %470 = vector.extract_strided_slice %468 {offsets = [0, 32], sizes = [16, 32], strides = [1, 1]} : vector<16x64xf32> to vector<16x32xf32>
    %471 = vector.extract_strided_slice %463 {offsets = [0, 0], sizes = [8, 8], strides = [1, 1]} : vector<8x32xf32> to vector<8x8xf32>
    %472 = vector.extract_strided_slice %469 {offsets = [0, 0], sizes = [16, 8], strides = [1, 1]} : vector<16x32xf32> to vector<16x8xf32>
    %cst_162 = arith.constant dense<0.000000e+00> : vector<8x16xf32>
    %473 = tpu.matmul %471, %472, %cst_162 {dimension_numbers = #tpu.dot_dimension_numbers<[1], [1], [0], [0], [0, 0, 1, 0], [], []>} : vector<8x8xf32>, vector<16x8xf32>, vector<8x16xf32> -> vector<8x16xf32>
    %cst_163 = arith.constant 0.353553385 : f32
    %474 = vector.broadcast %cst_163 : f32 to vector<8x16xf32>
    %475 = arith.mulf %473, %474 : vector<8x16xf32>
    %cst_164 = arith.constant dense<0xFF800000> : vector<8xf32>
    %476 = vector.multi_reduction <maximumf>, %475, %cst_164 [1] : vector<8x16xf32> to vector<8xf32>
    %477 = vector.shape_cast %476 : vector<8xf32> to vector<8x1xf32>
    %478 = vector.broadcast %477 : vector<8x1xf32> to vector<8x16xf32>
    %479 = arith.subf %475, %478 : vector<8x16xf32>
    %480 = math.exp %479 : vector<8x16xf32>
    %cst_165 = arith.constant dense<0.000000e+00> : vector<8xf32>
    %481 = vector.multi_reduction <add>, %480, %cst_165 [1] : vector<8x16xf32> to vector<8xf32>
    %482 = vector.shape_cast %481 : vector<8xf32> to vector<8x1xf32>
    %483 = tpu.reciprocal %482 {approx = true} : vector<8x1xf32> -> vector<8x1xf32>
    %484 = vector.broadcast %483 : vector<8x1xf32> to vector<8x16xf32>
    %485 = arith.mulf %480, %484 : vector<8x16xf32>
    %486 = vector.extract_strided_slice %470 {offsets = [0, 0], sizes = [16, 8], strides = [1, 1]} : vector<16x32xf32> to vector<16x8xf32>
    %cst_166 = arith.constant dense<0.000000e+00> : vector<8x8xf32>
    %487 = tpu.matmul %485, %486, %cst_166 {dimension_numbers = #tpu.dot_dimension_numbers<[1], [0], [0], [1], [0, 0, 1, 1], [], []>} : vector<8x16xf32>, vector<16x8xf32>, vector<8x8xf32> -> vector<8x8xf32>
    %488 = vector.extract_strided_slice %456 {offsets = [0, 96], sizes = [8, 32], strides = [1, 1]} : vector<32x128xf32> to vector<8x32xf32>
    %cst_167 = arith.constant dense<0.000000e+00> : vector<8x32xf32>
    %489 = tpu.matmul %487, %488, %cst_167 {dimension_numbers = #tpu.dot_dimension_numbers<[1], [0], [0], [1], [0, 0, 1, 1], [], []>} : vector<8x8xf32>, vector<8x32xf32>, vector<8x32xf32> -> vector<8x32xf32>
    %490 = vector.extract_strided_slice %463 {offsets = [0, 8], sizes = [8, 8], strides = [1, 1]} : vector<8x32xf32> to vector<8x8xf32>
    %491 = vector.extract_strided_slice %469 {offsets = [0, 8], sizes = [16, 8], strides = [1, 1]} : vector<16x32xf32> to vector<16x8xf32>
    %cst_168 = arith.constant dense<0.000000e+00> : vector<8x16xf32>
    %492 = tpu.matmul %490, %491, %cst_168 {dimension_numbers = #tpu.dot_dimension_numbers<[1], [1], [0], [0], [0, 0, 1, 0], [], []>} : vector<8x8xf32>, vector<16x8xf32>, vector<8x16xf32> -> vector<8x16xf32>
    %cst_169 = arith.constant 0.353553385 : f32
    %493 = vector.broadcast %cst_169 : f32 to vector<8x16xf32>
    %494 = arith.mulf %492, %493 : vector<8x16xf32>
    %cst_170 = arith.constant dense<0xFF800000> : vector<8xf32>
    %495 = vector.multi_reduction <maximumf>, %494, %cst_170 [1] : vector<8x16xf32> to vector<8xf32>
    %496 = vector.shape_cast %495 : vector<8xf32> to vector<8x1xf32>
    %497 = vector.broadcast %496 : vector<8x1xf32> to vector<8x16xf32>
    %498 = arith.subf %494, %497 : vector<8x16xf32>
    %499 = math.exp %498 : vector<8x16xf32>
    %cst_171 = arith.constant dense<0.000000e+00> : vector<8xf32>
    %500 = vector.multi_reduction <add>, %499, %cst_171 [1] : vector<8x16xf32> to vector<8xf32>
    %501 = vector.shape_cast %500 : vector<8xf32> to vector<8x1xf32>
    %502 = tpu.reciprocal %501 {approx = true} : vector<8x1xf32> -> vector<8x1xf32>
    %503 = vector.broadcast %502 : vector<8x1xf32> to vector<8x16xf32>
    %504 = arith.mulf %499, %503 : vector<8x16xf32>
    %505 = vector.extract_strided_slice %470 {offsets = [0, 8], sizes = [16, 8], strides = [1, 1]} : vector<16x32xf32> to vector<16x8xf32>
    %cst_172 = arith.constant dense<0.000000e+00> : vector<8x8xf32>
    %506 = tpu.matmul %504, %505, %cst_172 {dimension_numbers = #tpu.dot_dimension_numbers<[1], [0], [0], [1], [0, 0, 1, 1], [], []>} : vector<8x16xf32>, vector<16x8xf32>, vector<8x8xf32> -> vector<8x8xf32>
    %507 = vector.extract_strided_slice %456 {offsets = [8, 96], sizes = [8, 32], strides = [1, 1]} : vector<32x128xf32> to vector<8x32xf32>
    %cst_173 = arith.constant dense<0.000000e+00> : vector<8x32xf32>
    %508 = tpu.matmul %506, %507, %cst_173 {dimension_numbers = #tpu.dot_dimension_numbers<[1], [0], [0], [1], [0, 0, 1, 1], [], []>} : vector<8x8xf32>, vector<8x32xf32>, vector<8x32xf32> -> vector<8x32xf32>
    %509 = arith.addf %489, %508 : vector<8x32xf32>
    %510 = vector.extract_strided_slice %463 {offsets = [0, 16], sizes = [8, 8], strides = [1, 1]} : vector<8x32xf32> to vector<8x8xf32>
    %511 = vector.extract_strided_slice %469 {offsets = [0, 16], sizes = [16, 8], strides = [1, 1]} : vector<16x32xf32> to vector<16x8xf32>
    %cst_174 = arith.constant dense<0.000000e+00> : vector<8x16xf32>
    %512 = tpu.matmul %510, %511, %cst_174 {dimension_numbers = #tpu.dot_dimension_numbers<[1], [1], [0], [0], [0, 0, 1, 0], [], []>} : vector<8x8xf32>, vector<16x8xf32>, vector<8x16xf32> -> vector<8x16xf32>
    %cst_175 = arith.constant 0.353553385 : f32
    %513 = vector.broadcast %cst_175 : f32 to vector<8x16xf32>
    %514 = arith.mulf %512, %513 : vector<8x16xf32>
    %cst_176 = arith.constant dense<0xFF800000> : vector<8xf32>
    %515 = vector.multi_reduction <maximumf>, %514, %cst_176 [1] : vector<8x16xf32> to vector<8xf32>
    %516 = vector.shape_cast %515 : vector<8xf32> to vector<8x1xf32>
    %517 = vector.broadcast %516 : vector<8x1xf32> to vector<8x16xf32>
    %518 = arith.subf %514, %517 : vector<8x16xf32>
    %519 = math.exp %518 : vector<8x16xf32>
    %cst_177 = arith.constant dense<0.000000e+00> : vector<8xf32>
    %520 = vector.multi_reduction <add>, %519, %cst_177 [1] : vector<8x16xf32> to vector<8xf32>
    %521 = vector.shape_cast %520 : vector<8xf32> to vector<8x1xf32>
    %522 = tpu.reciprocal %521 {approx = true} : vector<8x1xf32> -> vector<8x1xf32>
    %523 = vector.broadcast %522 : vector<8x1xf32> to vector<8x16xf32>
    %524 = arith.mulf %519, %523 : vector<8x16xf32>
    %525 = vector.extract_strided_slice %470 {offsets = [0, 16], sizes = [16, 8], strides = [1, 1]} : vector<16x32xf32> to vector<16x8xf32>
    %cst_178 = arith.constant dense<0.000000e+00> : vector<8x8xf32>
    %526 = tpu.matmul %524, %525, %cst_178 {dimension_numbers = #tpu.dot_dimension_numbers<[1], [0], [0], [1], [0, 0, 1, 1], [], []>} : vector<8x16xf32>, vector<16x8xf32>, vector<8x8xf32> -> vector<8x8xf32>
    %527 = vector.extract_strided_slice %456 {offsets = [16, 96], sizes = [8, 32], strides = [1, 1]} : vector<32x128xf32> to vector<8x32xf32>
    %cst_179 = arith.constant dense<0.000000e+00> : vector<8x32xf32>
    %528 = tpu.matmul %526, %527, %cst_179 {dimension_numbers = #tpu.dot_dimension_numbers<[1], [0], [0], [1], [0, 0, 1, 1], [], []>} : vector<8x8xf32>, vector<8x32xf32>, vector<8x32xf32> -> vector<8x32xf32>
    %529 = arith.addf %509, %528 : vector<8x32xf32>
    %530 = vector.extract_strided_slice %463 {offsets = [0, 24], sizes = [8, 8], strides = [1, 1]} : vector<8x32xf32> to vector<8x8xf32>
    %531 = vector.extract_strided_slice %469 {offsets = [0, 24], sizes = [16, 8], strides = [1, 1]} : vector<16x32xf32> to vector<16x8xf32>
    %cst_180 = arith.constant dense<0.000000e+00> : vector<8x16xf32>
    %532 = tpu.matmul %530, %531, %cst_180 {dimension_numbers = #tpu.dot_dimension_numbers<[1], [1], [0], [0], [0, 0, 1, 0], [], []>} : vector<8x8xf32>, vector<16x8xf32>, vector<8x16xf32> -> vector<8x16xf32>
    %cst_181 = arith.constant 0.353553385 : f32
    %533 = vector.broadcast %cst_181 : f32 to vector<8x16xf32>
    %534 = arith.mulf %532, %533 : vector<8x16xf32>
    %cst_182 = arith.constant dense<0xFF800000> : vector<8xf32>
    %535 = vector.multi_reduction <maximumf>, %534, %cst_182 [1] : vector<8x16xf32> to vector<8xf32>
    %536 = vector.shape_cast %535 : vector<8xf32> to vector<8x1xf32>
    %537 = vector.broadcast %536 : vector<8x1xf32> to vector<8x16xf32>
    %538 = arith.subf %534, %537 : vector<8x16xf32>
    %539 = math.exp %538 : vector<8x16xf32>
    %cst_183 = arith.constant dense<0.000000e+00> : vector<8xf32>
    %540 = vector.multi_reduction <add>, %539, %cst_183 [1] : vector<8x16xf32> to vector<8xf32>
    %541 = vector.shape_cast %540 : vector<8xf32> to vector<8x1xf32>
    %542 = tpu.reciprocal %541 {approx = true} : vector<8x1xf32> -> vector<8x1xf32>
    %543 = vector.broadcast %542 : vector<8x1xf32> to vector<8x16xf32>
    %544 = arith.mulf %539, %543 : vector<8x16xf32>
    %545 = vector.extract_strided_slice %470 {offsets = [0, 24], sizes = [16, 8], strides = [1, 1]} : vector<16x32xf32> to vector<16x8xf32>
    %cst_184 = arith.constant dense<0.000000e+00> : vector<8x8xf32>
    %546 = tpu.matmul %544, %545, %cst_184 {dimension_numbers = #tpu.dot_dimension_numbers<[1], [0], [0], [1], [0, 0, 1, 1], [], []>} : vector<8x16xf32>, vector<16x8xf32>, vector<8x8xf32> -> vector<8x8xf32>
    %547 = vector.extract_strided_slice %456 {offsets = [24, 96], sizes = [8, 32], strides = [1, 1]} : vector<32x128xf32> to vector<8x32xf32>
    %cst_185 = arith.constant dense<0.000000e+00> : vector<8x32xf32>
    %548 = tpu.matmul %546, %547, %cst_185 {dimension_numbers = #tpu.dot_dimension_numbers<[1], [0], [0], [1], [0, 0, 1, 1], [], []>} : vector<8x8xf32>, vector<8x32xf32>, vector<8x32xf32> -> vector<8x32xf32>
    %549 = arith.addf %529, %548 : vector<8x32xf32>
    %550 = vector.extract_strided_slice %458 {offsets = [0, 96], sizes = [1, 32], strides = [1, 1]} : vector<1x128xf32> to vector<1x32xf32>
    %551 = vector.broadcast %550 : vector<1x32xf32> to vector<8x32xf32>
    %552 = arith.addf %549, %551 : vector<8x32xf32>
    %553 = arith.addf %552, %454 : vector<8x32xf32>
    %554 = vector.extract_strided_slice %335 {offsets = [2, 0], sizes = [1, 32], strides = [1, 1]} : vector<6x32xf32> to vector<1x32xf32>
    %555 = vector.extract_strided_slice %335 {offsets = [3, 0], sizes = [1, 32], strides = [1, 1]} : vector<6x32xf32> to vector<1x32xf32>
    %cst_186 = arith.constant dense<0.000000e+00> : vector<8xf32>
    %556 = vector.multi_reduction <add>, %553, %cst_186 [1] : vector<8x32xf32> to vector<8xf32>
    %557 = vector.shape_cast %556 : vector<8xf32> to vector<8x1xf32>
    %cst_187 = arith.constant 3.200000e+01 : f32
    %558 = vector.broadcast %cst_187 : f32 to vector<8x1xf32>
    %559 = arith.divf %557, %558 : vector<8x1xf32>
    %560 = vector.broadcast %559 : vector<8x1xf32> to vector<8x32xf32>
    %561 = arith.subf %553, %560 : vector<8x32xf32>
    %562 = arith.mulf %561, %561 : vector<8x32xf32>
    %cst_188 = arith.constant dense<0.000000e+00> : vector<8xf32>
    %563 = vector.multi_reduction <add>, %562, %cst_188 [1] : vector<8x32xf32> to vector<8xf32>
    %564 = vector.shape_cast %563 : vector<8xf32> to vector<8x1xf32>
    %cst_189 = arith.constant 3.200000e+01 : f32
    %565 = vector.broadcast %cst_189 : f32 to vector<8x1xf32>
    %566 = arith.divf %564, %565 : vector<8x1xf32>
    %567 = vector.broadcast %559 : vector<8x1xf32> to vector<8x32xf32>
    %568 = arith.subf %553, %567 : vector<8x32xf32>
    %cst_190 = arith.constant 9.99999974E-6 : f32
    %569 = vector.broadcast %cst_190 : f32 to vector<8x1xf32>
    %570 = arith.addf %566, %569 : vector<8x1xf32>
    %571 = math.rsqrt %570 : vector<8x1xf32>
    %572 = vector.broadcast %571 : vector<8x1xf32> to vector<8x32xf32>
    %573 = arith.mulf %568, %572 : vector<8x32xf32>
    %574 = vector.broadcast %554 : vector<1x32xf32> to vector<8x32xf32>
    %575 = arith.mulf %573, %574 : vector<8x32xf32>
    %576 = vector.broadcast %555 : vector<1x32xf32> to vector<8x32xf32>
    %577 = arith.addf %575, %576 : vector<8x32xf32>
    %c1_191 = arith.constant 1 : index
    %c0_192 = arith.constant 0 : index
    %c0_193 = arith.constant 0 : index
    %578 = vector.load %arg9[%c1_191, %c0_192, %c0_193] : memref<2x32x128xf32, #tpu.memory_space<vmem>>, vector<1x32x128xf32>
    %579 = vector.shape_cast %578 : vector<1x32x128xf32> to vector<32x128xf32>
    %cst_194 = arith.constant dense<0.000000e+00> : vector<8x128xf32>
    %580 = tpu.matmul %577, %579, %cst_194 {dimension_numbers = #tpu.dot_dimension_numbers<[1], [0], [0], [1], [0, 0, 1, 1], [], []>} : vector<8x32xf32>, vector<32x128xf32>, vector<8x128xf32> -> vector<8x128xf32>
    %c1_195 = arith.constant 1 : index
    %c0_196 = arith.constant 0 : index
    %c0_197 = arith.constant 0 : index
    %581 = vector.load %arg10[%c1_195, %c0_196, %c0_197] : memref<2x1x128xf32, #tpu.memory_space<vmem>>, vector<1x1x128xf32>
    %582 = vector.shape_cast %581 : vector<1x1x128xf32> to vector<1x128xf32>
    %583 = vector.broadcast %582 : vector<1x128xf32> to vector<8x128xf32>
    %584 = arith.addf %580, %583 : vector<8x128xf32>
    %cst_198 = arith.constant 0.000000e+00 : f32
    %585 = vector.broadcast %cst_198 : f32 to vector<8x128xf32>
    %586 = arith.maximumf %584, %585 : vector<8x128xf32>
    %c1_199 = arith.constant 1 : index
    %c0_200 = arith.constant 0 : index
    %c0_201 = arith.constant 0 : index
    %587 = vector.load %arg11[%c1_199, %c0_200, %c0_201] : memref<2x128x32xf32, #tpu.memory_space<vmem>>, vector<1x128x32xf32>
    %588 = vector.shape_cast %587 : vector<1x128x32xf32> to vector<128x32xf32>
    %cst_202 = arith.constant dense<0.000000e+00> : vector<8x32xf32>
    %589 = tpu.matmul %586, %588, %cst_202 {dimension_numbers = #tpu.dot_dimension_numbers<[1], [0], [0], [1], [0, 0, 1, 1], [], []>} : vector<8x128xf32>, vector<128x32xf32>, vector<8x32xf32> -> vector<8x32xf32>
    %c1_203 = arith.constant 1 : index
    %c0_204 = arith.constant 0 : index
    %c0_205 = arith.constant 0 : index
    %590 = vector.load %arg12[%c1_203, %c0_204, %c0_205] : memref<2x1x32xf32, #tpu.memory_space<vmem>>, vector<1x1x32xf32>
    %591 = vector.shape_cast %590 : vector<1x1x32xf32> to vector<1x32xf32>
    %592 = vector.broadcast %591 : vector<1x32xf32> to vector<8x32xf32>
    %593 = arith.addf %589, %592 : vector<8x32xf32>
    %594 = arith.addf %593, %577 : vector<8x32xf32>
    %595 = vector.extract_strided_slice %335 {offsets = [4, 0], sizes = [1, 32], strides = [1, 1]} : vector<6x32xf32> to vector<1x32xf32>
    %596 = vector.extract_strided_slice %335 {offsets = [5, 0], sizes = [1, 32], strides = [1, 1]} : vector<6x32xf32> to vector<1x32xf32>
    %cst_206 = arith.constant dense<0.000000e+00> : vector<8xf32>
    %597 = vector.multi_reduction <add>, %594, %cst_206 [1] : vector<8x32xf32> to vector<8xf32>
    %598 = vector.shape_cast %597 : vector<8xf32> to vector<8x1xf32>
    %cst_207 = arith.constant 3.200000e+01 : f32
    %599 = vector.broadcast %cst_207 : f32 to vector<8x1xf32>
    %600 = arith.divf %598, %599 : vector<8x1xf32>
    %601 = vector.broadcast %600 : vector<8x1xf32> to vector<8x32xf32>
    %602 = arith.subf %594, %601 : vector<8x32xf32>
    %603 = arith.mulf %602, %602 : vector<8x32xf32>
    %cst_208 = arith.constant dense<0.000000e+00> : vector<8xf32>
    %604 = vector.multi_reduction <add>, %603, %cst_208 [1] : vector<8x32xf32> to vector<8xf32>
    %605 = vector.shape_cast %604 : vector<8xf32> to vector<8x1xf32>
    %cst_209 = arith.constant 3.200000e+01 : f32
    %606 = vector.broadcast %cst_209 : f32 to vector<8x1xf32>
    %607 = arith.divf %605, %606 : vector<8x1xf32>
    %608 = vector.broadcast %600 : vector<8x1xf32> to vector<8x32xf32>
    %609 = arith.subf %594, %608 : vector<8x32xf32>
    %cst_210 = arith.constant 9.99999974E-6 : f32
    %610 = vector.broadcast %cst_210 : f32 to vector<8x1xf32>
    %611 = arith.addf %607, %610 : vector<8x1xf32>
    %612 = math.rsqrt %611 : vector<8x1xf32>
    %613 = vector.broadcast %612 : vector<8x1xf32> to vector<8x32xf32>
    %614 = arith.mulf %609, %613 : vector<8x32xf32>
    %615 = vector.broadcast %595 : vector<1x32xf32> to vector<8x32xf32>
    %616 = arith.mulf %614, %615 : vector<8x32xf32>
    %617 = vector.broadcast %596 : vector<1x32xf32> to vector<8x32xf32>
    %618 = arith.addf %616, %617 : vector<8x32xf32>
    %c0_211 = arith.constant 0 : index
    %c0_212 = arith.constant 0 : index
    %619 = vector.load %arg14[%c0_211, %c0_212] : memref<64x32xf32, #tpu.memory_space<vmem>>, vector<64x32xf32>
    %c0_213 = arith.constant 0 : index
    %c0_214 = arith.constant 0 : index
    %620 = vector.load %arg15[%c0_213, %c0_214] : memref<3x32xf32, #tpu.memory_space<vmem>>, vector<3x32xf32>
    %621 = vector.extract_strided_slice %619 {offsets = [0, 0], sizes = [32, 32], strides = [1, 1]} : vector<64x32xf32> to vector<32x32xf32>
    %cst_215 = arith.constant dense<0.000000e+00> : vector<8x32xf32>
    %622 = tpu.matmul %618, %621, %cst_215 {dimension_numbers = #tpu.dot_dimension_numbers<[1], [0], [0], [1], [0, 0, 1, 1], [], []>} : vector<8x32xf32>, vector<32x32xf32>, vector<8x32xf32> -> vector<8x32xf32>
    %623 = vector.extract_strided_slice %619 {offsets = [32, 0], sizes = [32, 32], strides = [1, 1]} : vector<64x32xf32> to vector<32x32xf32>
    %cst_216 = arith.constant dense<0.000000e+00> : vector<8x32xf32>
    %624 = tpu.matmul %429, %623, %cst_216 {dimension_numbers = #tpu.dot_dimension_numbers<[1], [0], [0], [1], [0, 0, 1, 1], [], []>} : vector<8x32xf32>, vector<32x32xf32>, vector<8x32xf32> -> vector<8x32xf32>
    %625 = arith.addf %622, %624 : vector<8x32xf32>
    %626 = vector.extract_strided_slice %620 {offsets = [0, 0], sizes = [1, 32], strides = [1, 1]} : vector<3x32xf32> to vector<1x32xf32>
    %627 = vector.broadcast %626 : vector<1x32xf32> to vector<8x32xf32>
    %628 = arith.addf %625, %627 : vector<8x32xf32>
    %629 = arith.negf %628 : vector<8x32xf32>
    %630 = math.exp %629 : vector<8x32xf32>
    %cst_217 = arith.constant 1.000000e+00 : f32
    %631 = vector.broadcast %cst_217 : f32 to vector<8x32xf32>
    %632 = arith.addf %631, %630 : vector<8x32xf32>
    %633 = arith.divf %631, %632 : vector<8x32xf32>
    %634 = arith.mulf %618, %633 : vector<8x32xf32>
    %cst_218 = arith.constant 1.000000e+00 : f32
    %635 = vector.broadcast %cst_218 : f32 to vector<8x32xf32>
    %636 = arith.subf %635, %633 : vector<8x32xf32>
    %637 = arith.mulf %429, %636 : vector<8x32xf32>
    %638 = arith.addf %634, %637 : vector<8x32xf32>
    %639 = vector.extract_strided_slice %620 {offsets = [1, 0], sizes = [1, 32], strides = [1, 1]} : vector<3x32xf32> to vector<1x32xf32>
    %640 = vector.extract_strided_slice %620 {offsets = [2, 0], sizes = [1, 32], strides = [1, 1]} : vector<3x32xf32> to vector<1x32xf32>
    %cst_219 = arith.constant dense<0.000000e+00> : vector<8xf32>
    %641 = vector.multi_reduction <add>, %638, %cst_219 [1] : vector<8x32xf32> to vector<8xf32>
    %642 = vector.shape_cast %641 : vector<8xf32> to vector<8x1xf32>
    %cst_220 = arith.constant 3.200000e+01 : f32
    %643 = vector.broadcast %cst_220 : f32 to vector<8x1xf32>
    %644 = arith.divf %642, %643 : vector<8x1xf32>
    %645 = vector.broadcast %644 : vector<8x1xf32> to vector<8x32xf32>
    %646 = arith.subf %638, %645 : vector<8x32xf32>
    %647 = arith.mulf %646, %646 : vector<8x32xf32>
    %cst_221 = arith.constant dense<0.000000e+00> : vector<8xf32>
    %648 = vector.multi_reduction <add>, %647, %cst_221 [1] : vector<8x32xf32> to vector<8xf32>
    %649 = vector.shape_cast %648 : vector<8xf32> to vector<8x1xf32>
    %cst_222 = arith.constant 3.200000e+01 : f32
    %650 = vector.broadcast %cst_222 : f32 to vector<8x1xf32>
    %651 = arith.divf %649, %650 : vector<8x1xf32>
    %652 = vector.broadcast %644 : vector<8x1xf32> to vector<8x32xf32>
    %653 = arith.subf %638, %652 : vector<8x32xf32>
    %cst_223 = arith.constant 9.99999974E-6 : f32
    %654 = vector.broadcast %cst_223 : f32 to vector<8x1xf32>
    %655 = arith.addf %651, %654 : vector<8x1xf32>
    %656 = math.rsqrt %655 : vector<8x1xf32>
    %657 = vector.broadcast %656 : vector<8x1xf32> to vector<8x32xf32>
    %658 = arith.mulf %653, %657 : vector<8x32xf32>
    %659 = vector.broadcast %639 : vector<1x32xf32> to vector<8x32xf32>
    %660 = arith.mulf %658, %659 : vector<8x32xf32>
    %661 = vector.broadcast %640 : vector<1x32xf32> to vector<8x32xf32>
    %662 = arith.addf %660, %661 : vector<8x32xf32>
    %c0_224 = arith.constant 0 : index
    %c0_225 = arith.constant 0 : index
    %663 = vector.load %arg16[%c0_224, %c0_225] : memref<32x64xf32, #tpu.memory_space<vmem>>, vector<32x64xf32>
    %cst_226 = arith.constant dense<0.000000e+00> : vector<8x64xf32>
    %664 = tpu.matmul %662, %663, %cst_226 {dimension_numbers = #tpu.dot_dimension_numbers<[1], [0], [0], [1], [0, 0, 1, 1], [], []>} : vector<8x32xf32>, vector<32x64xf32>, vector<8x64xf32> -> vector<8x64xf32>
    %c0_227 = arith.constant 0 : index
    %c0_228 = arith.constant 0 : index
    %665 = vector.load %arg17[%c0_227, %c0_228] : memref<1x64xf32, #tpu.memory_space<vmem>>, vector<1x64xf32>
    %666 = vector.broadcast %665 : vector<1x64xf32> to vector<8x64xf32>
    %667 = arith.addf %664, %666 : vector<8x64xf32>
    %c0_229 = arith.constant 0 : index
    %c0_230 = arith.constant 0 : index
    %c0_231 = arith.constant 0 : index
    %668 = vector.load %arg18[%c0_229, %c0_230, %c0_231] : memref<1x8x64xf32, #tpu.memory_space<vmem>>, vector<1x8x64xf32>
    %669 = vector.shape_cast %668 : vector<1x8x64xf32> to vector<8x64xf32>
    %670 = vector.shape_cast %667 : vector<8x64xf32> to vector<1x8x64xf32>
    tpu.vector_store %arg18[%c0_229, %c0_230, %c0_231], %670 {strides = array<i32>} : memref<1x8x64xf32, #tpu.memory_space<vmem>>, vector<1x8x64xf32>,
    return
  }
  func.func @transform_0(%arg0: i32) -> (i32, i32, i32) {
    %c0_i32 = arith.constant 0 : i32
    %c0_i32_0 = arith.constant 0 : i32
    %c0_i32_1 = arith.constant 0 : i32
    return %arg0, %c0_i32, %c0_i32_0 : i32, i32, i32
  }
  func.func @transform_1(%arg0: i32) -> (i32, i32) {
    %c0_i32 = arith.constant 0 : i32
    %c0_i32_0 = arith.constant 0 : i32
    %c0_i32_1 = arith.constant 0 : i32
    return %c0_i32, %c0_i32_0 : i32, i32
  }
  func.func @transform_2(%arg0: i32) -> (i32, i32) {
    %c0_i32 = arith.constant 0 : i32
    %c0_i32_0 = arith.constant 0 : i32
    %c0_i32_1 = arith.constant 0 : i32
    return %c0_i32, %c0_i32_0 : i32, i32
  }
  func.func @transform_3(%arg0: i32) -> (i32, i32) {
    %c0_i32 = arith.constant 0 : i32
    %c0_i32_0 = arith.constant 0 : i32
    %c0_i32_1 = arith.constant 0 : i32
    return %c0_i32, %c0_i32_0 : i32, i32
  }
  func.func @transform_4(%arg0: i32) -> (i32, i32) {
    %c0_i32 = arith.constant 0 : i32
    %c0_i32_0 = arith.constant 0 : i32
    %c0_i32_1 = arith.constant 0 : i32
    return %c0_i32, %c0_i32_0 : i32, i32
  }
  func.func @transform_5(%arg0: i32) -> (i32, i32) {
    %c0_i32 = arith.constant 0 : i32
    %c0_i32_0 = arith.constant 0 : i32
    %c0_i32_1 = arith.constant 0 : i32
    return %c0_i32, %c0_i32_0 : i32, i32
  }
  func.func @transform_6(%arg0: i32) -> (i32, i32, i32) {
    %c0_i32 = arith.constant 0 : i32
    %c0_i32_0 = arith.constant 0 : i32
    %c0_i32_1 = arith.constant 0 : i32
    %c0_i32_2 = arith.constant 0 : i32
    return %c0_i32, %c0_i32_0, %c0_i32_1 : i32, i32, i32
  }
  func.func @transform_7(%arg0: i32) -> (i32, i32, i32) {
    %c0_i32 = arith.constant 0 : i32
    %c0_i32_0 = arith.constant 0 : i32
    %c0_i32_1 = arith.constant 0 : i32
    %c0_i32_2 = arith.constant 0 : i32
    return %c0_i32, %c0_i32_0, %c0_i32_1 : i32, i32, i32
  }
  func.func @transform_8(%arg0: i32) -> (i32, i32, i32) {
    %c0_i32 = arith.constant 0 : i32
    %c0_i32_0 = arith.constant 0 : i32
    %c0_i32_1 = arith.constant 0 : i32
    %c0_i32_2 = arith.constant 0 : i32
    return %c0_i32, %c0_i32_0, %c0_i32_1 : i32, i32, i32
  }
  func.func @transform_9(%arg0: i32) -> (i32, i32, i32) {
    %c0_i32 = arith.constant 0 : i32
    %c0_i32_0 = arith.constant 0 : i32
    %c0_i32_1 = arith.constant 0 : i32
    %c0_i32_2 = arith.constant 0 : i32
    return %c0_i32, %c0_i32_0, %c0_i32_1 : i32, i32, i32
  }
  func.func @transform_10(%arg0: i32) -> (i32, i32, i32) {
    %c0_i32 = arith.constant 0 : i32
    %c0_i32_0 = arith.constant 0 : i32
    %c0_i32_1 = arith.constant 0 : i32
    %c0_i32_2 = arith.constant 0 : i32
    return %c0_i32, %c0_i32_0, %c0_i32_1 : i32, i32, i32
  }
  func.func @transform_11(%arg0: i32) -> (i32, i32, i32) {
    %c0_i32 = arith.constant 0 : i32
    %c0_i32_0 = arith.constant 0 : i32
    %c0_i32_1 = arith.constant 0 : i32
    %c0_i32_2 = arith.constant 0 : i32
    return %c0_i32, %c0_i32_0, %c0_i32_1 : i32, i32, i32
  }
  func.func @transform_12(%arg0: i32) -> (i32, i32, i32) {
    %c0_i32 = arith.constant 0 : i32
    %c0_i32_0 = arith.constant 0 : i32
    %c0_i32_1 = arith.constant 0 : i32
    %c0_i32_2 = arith.constant 0 : i32
    return %c0_i32, %c0_i32_0, %c0_i32_1 : i32, i32, i32
  }
  func.func @transform_13(%arg0: i32) -> (i32, i32) {
    %c0_i32 = arith.constant 0 : i32
    %c0_i32_0 = arith.constant 0 : i32
    %c0_i32_1 = arith.constant 0 : i32
    return %c0_i32, %c0_i32_0 : i32, i32
  }
  func.func @transform_14(%arg0: i32) -> (i32, i32) {
    %c0_i32 = arith.constant 0 : i32
    %c0_i32_0 = arith.constant 0 : i32
    %c0_i32_1 = arith.constant 0 : i32
    return %c0_i32, %c0_i32_0 : i32, i32
  }
  func.func @transform_15(%arg0: i32) -> (i32, i32) {
    %c0_i32 = arith.constant 0 : i32
    %c0_i32_0 = arith.constant 0 : i32
    %c0_i32_1 = arith.constant 0 : i32
    return %c0_i32, %c0_i32_0 : i32, i32
  }
  func.func @transform_16(%arg0: i32) -> (i32, i32) {
    %c0_i32 = arith.constant 0 : i32
    %c0_i32_0 = arith.constant 0 : i32
    %c0_i32_1 = arith.constant 0 : i32
    return %c0_i32, %c0_i32_0 : i32, i32
  }
  func.func @transform_17(%arg0: i32) -> (i32, i32, i32) {
    %c0_i32 = arith.constant 0 : i32
    %c0_i32_0 = arith.constant 0 : i32
    %c0_i32_1 = arith.constant 0 : i32
    return %arg0, %c0_i32, %c0_i32_0 : i32, i32, i32
  }
}

</mosaic_0001>

<bundles_post_ra>
// kernel: decoder_na_forward.1
= control target key start
LH: loop header
LB: loop body
LE: loop exit
PB: predicated region body
PF: predicated region fallthrough
CT: control target
= control target key end

     0   :  { %s8653_s0 = inlined_call_operand.vmem [shape: f32[2,16,32], index: 0, kind: input, shape index: {}]   ;;  %s8654_s1 = inlined_call_operand.vmem [shape: f32[32,32], index: 1, kind: input, shape index: {}]   ;;  %s8655_s2 = inlined_call_operand.vmem [shape: f32[3,32], index: 2, kind: input, shape index: {}]   ;;  %s8656_s3 = inlined_call_operand.vmem [shape: f32[64,32], index: 3, kind: input, shape index: {}]   ;;  %s8657_s4 = inlined_call_operand.vmem [shape: f32[32,64], index: 4, kind: input, shape index: {}]   ;;  %s8658_s5 = inlined_call_operand.vmem [shape: f32[8,16], index: 5, kind: input, shape index: {}]   ;;  %s8659_s6 = inlined_call_operand.vmem [shape: f32[4,32,128], index: 6, kind: input, shape index: {}]   ;;  %s8660_s7 = inlined_call_operand.vmem [shape: f32[4,1,128], index: 7, kind: input, shape index: {}]   ;;  %s8661_s8 = inlined_call_operand.vmem [shape: f32[2,32,128], index: 8, kind: input, shape index: {}]   ;;  %s8662_s9 = inlined_call_operand.vmem [shape: f32[2,1,128], index: 9, kind: input, shape index: {}]   ;;  %s8663_s10 = inlined_call_operand.vmem [shape: f32[2,128,32], index: 10, kind: input, shape index: {}]   ;;  %s8664_s11 = inlined_call_operand.vmem [shape: f32[2,1,32], index: 11, kind: input, shape index: {}]   ;;  %s8665_s12 = inlined_call_operand.vmem [shape: f32[2,6,32], index: 12, kind: input, shape index: {}]   ;;  %s8666_s13 = inlined_call_operand.vmem [shape: f32[64,32], index: 13, kind: input, shape index: {}]   ;;  %s8667_s14 = inlined_call_operand.vmem [shape: f32[3,32], index: 14, kind: input, shape index: {}]   ;;  %s8668_s15 = inlined_call_operand.vmem [shape: f32[32,64], index: 15, kind: input, shape index: {}]   ;;  %s8669_s16 = inlined_call_operand.vmem [shape: f32[1,64], index: 16, kind: input, shape index: {}]   ;;  %s8670_s17 = inlined_call_operand.hbm [shape: f32[2,8,64], index: 17, kind: output, shape index: {}]  }
   0x1   :  { %8698 = sst [smem:[#allocation10_spill]] %s8653_s0 }
   0x2   :  { %8699 = sst [smem:[#allocation11_spill]] %s8654_s1 }
   0x3   :  { %8700 = sst [smem:[#allocation12_spill]] %s8655_s2 }
   0x4   :  { %8701 = sst [smem:[#allocation13_spill]] %s8656_s3 }
   0x5   :  { %8702 = sst [smem:[#allocation14_spill]] %s8657_s4 }
   0x6   :  { %8703 = sst [smem:[#allocation15_spill]] %s8658_s5 }
   0x7   :  { %22 = vsyncpa [#allocation3], 0 }
   0x8   :  { %24 = vsyncpa [#allocation3 + $0x1], 0  ;;  %s7501_s24 = smov 0   ;;  %s7503_s25 = smov 0  }
   0x9   :  { %s7505_s26 = smov 0   ;;  %s7507_s27 = smov 0  }
   0xa LB: > { %8704 = sst [smem:[#allocation5_spill]] %s7382_s24  ;;  %s7522_s28 = sadd.s32 4294967295, %s7394_s27   ;;  %s7394_s27 = sphi %s7507_s27, %s8731_s27   ;;  %s7390_s26 = sphi %s7505_s26, %s8733_s26   ;;  %s7386_s25 = sphi %s7503_s25, %s8735_s25   ;;  %s7382_s24 = sphi %s7501_s24, %s8734_s24  }
   0xb   : > { %8705 = sst [smem:[#allocation6_spill]] %s7390_s26  ;;  %s6294_s29 = sadd.s32 4294967294, %s7394_s27  }
   0xc   : > { %s7526_s0 = sadd.s32 1, %s7394_s27   ;;  %s399_s30 = sadd.s32 1, %s7390_s26 }
   0xd   : > { %8706 = sst [smem:[#allocation7_spill]] %s7526_s0  ;;  %s396_s18 = ssub.s32 %s7394_s27, %s7526_s0 }
   0xe   : > { %p409_p0 = scmp.ne.s32.totalorder %s7390_s26, %s7386_s25  ;;  %p397_p1 = scmp.eq.s32.totalorder %s396_s18, 0 }
   0xf   : > { %p410_p2 = scmp.eq.s32.totalorder %s7522_s28, 1  ;;  %p415_p3 = scmp.ne.s32.totalorder %s7386_s25, %s7382_s24 }
  0x10   : > { %p416_p4 = scmp.eq.s32.totalorder %s6294_s29, 1  ;;  %p6297_p7 = scmp.ge.s32.totalorder %s7394_s27, 1 }
  0x11   : > { %s7537_s19 = scalar_select %p397_p1, %s7390_s26, %s399_s30  }
  0x12   : > { %p7539_p5 = por %p410_p2, %p409_p0  ;;  %p7543_p6 = por %p416_p4, %p415_p3 }
  0x13   : > { %8707 = sst [smem:[#allocation8_spill]] %s7537_s19  ;;  %p490_p8 = scmp.lt.s32.totalorder %s7394_s27, 3 }
  0x14   : > { %s8709_s20 = scalar_select %p7543_p6, 1, 0 }
  0x15   : > { %p491_p9 = pnand %p6297_p7, %p490_p8 }
  0x16   : > { %8710 = sst [smem:[#allocation9_spill]] %s8709_s20  ;;  %p542_p10 = scmp.lt.s32.totalorder (!%p491_p9), %s7522_s28, 1 }
  0x17   : > { %494 = sbr.rel (%p491_p9) target bundleno = 15256 (0x3b98), region = 88  ;;  %s8711_s23 = sld [smem:[#allocation11_spill]] (!%p491_p9) }
  0x18   : > { %s8712_s30 = sld [smem:[#allocation10_spill]] (!%p491_p9)  ;;  %s8693_s19 = smov (!%p491_p9), 88  }
  0x19   : > { %s8713_s2 = sld [smem:[#allocation12_spill]] (!%p491_p9)  ;;  %s8695_s20 = smov (!%p491_p9), 96  }
  0x1a   : > { %s8714_s4 = sld [smem:[#allocation14_spill]] (!%p491_p9)  ;;  %s8691_s18 = smov (!%p491_p9), 120  }
  0x1b   : > { %s8715_s3 = sld [smem:[#allocation13_spill]] (!%p491_p9)  ;;  %s8687_s22 = smov (!%p491_p9), 32  }
  0x1c   : > { %s543_s26 = scalar_select %p542_p10, %s7522_s28, 1  ;;  %vm558_vm0 = vcmask 261120   ;;  %v554_v6 = vlaneseq  ;;  %vm772_vm1 = vcmask 523264   ;;  %vm7397_vm2 = vmmov 0  }
  0x1d   : > { %v553_v0 = vld [vmem:[%s8711_s23 + $0x18] sm:$0xff]  ;;  %v552_v1 = vld [vmem:[%s8711_s23 + $0x10] sm:$0xff]  ;;  %v551_v2 = vld [vmem:[%s8711_s23 + $0x8] sm:$0xff]  ;;  %s8716_s5 = sld [smem:[#allocation15_spill]]  ;;  %vm879_vm3 = vcmask 130048   ;;  %vm1041_vm4 = vcmask 64512  }
  0x1e   : > { %6674 = vmatprep.subr.mxu0 %v553_v0  ;;  %v550_v3 = vld [vmem:[%s8711_s23] sm:$0xff]  ;;  %s6445_s21 = sshll.u32 %s543_s26, 4  ;;  %v7578_v7 = vshrl.u32 %v554_v6, 7  ;;  %s8683_s29 = smov 80  }
  0x1f   : > { %6675 = vmatpush3.msra.mxu0 %v553_v0  ;;  %s7566_s24 = scalar_lea.vmem %s8712_s30, %s6445_s21  ;;  %v549_v9 = vld [vmem:[%s8713_s2] sm:$0x7]  ;;  %s8679_s21 = smov 64  }
  0x20   : > { %6676 = vmatprep.subr.mxu0 %v552_v1  ;;  %v7569_v4 = vld [vmem:[%s7566_s24] sm:$0xff]  ;;  %v7572_v5 = vld [vmem:[%s7566_s24 + $0x8] sm:$0xff]  ;;  %v7581_v8 = vsub.s32 0, %v7578_v7  ;;  %v690_v27 = vld [vmem:[%s8714_s4 + $0x18] sm:$0xff]  ;;  %v7604_v37 = vsub.s32 1, %v7578_v7  ;;  %v7607_v38 = vsub.s32 2, %v7578_v7 }
  0x21   : > { %6677 = vmatpush3.msra.mxu0 %v552_v1  ;;  %6682 = vmatprep.mubr.msk.f32.mxu0 %vm558_vm0, %v7569_v4  ;;  %v689_v28 = vld [vmem:[%s8714_s4 + $0x10] sm:$0xff]  ;;  %v688_v29 = vld [vmem:[%s8714_s4 + $0x8] sm:$0xff]  ;;  %v687_v30 = vld [vmem:[%s8714_s4] sm:$0xff]  ;;  %s8689_s30 = smov 112   ;;  %s8677_s26 = smov 48  }
  0x22   : > { %6678 = vmatprep.subr.mxu0 %v551_v2  ;;  %v557_v11 = vrot.slane %v549_v9, %v7581_v8  ;;  %6685 = vmatprep.subr.mxu1 %v690_v27  ;;  %v670_v39 = vrot.slane %v549_v9, %v7604_v37  ;;  %v676_v42 = vrot.slane %v549_v9, %v7607_v38  ;;  %v686_v63 = vld [vmem:[%s8715_s3 + $0x38] sm:$0xff]  ;;  %v685_v0 = vld [vmem:[%s8715_s3 + $0x30] sm:$0xff]  ;;  %v684_v1 = vld [vmem:[%s8715_s3 + $0x28] sm:$0xff]  ;;  %s8678_s0 = smov 56   ;;  %s8727_s2 = smov 48  }
  0x23   : > { %6679 = vmatpush3.msra.mxu0 %v551_v2  ;;  %6686 = vmatpush3.msra.mxu1 %v690_v27  ;;  %v683_v2 = vld [vmem:[%s8715_s3 + $0x20] sm:$0xff]  ;;  %v681_v6 = vld [vmem:[%s8715_s3 + $0x10] sm:$0xff]  ;;  %v680_v9 = vld [vmem:[%s8715_s3 + $0x8] sm:$0xff] }
  0x24   : > { %6680 = vmatprep.subr.mxu0 %v550_v3  ;;  %6687 = vmatprep.subr.mxu1 %v689_v28 }
  0x25   : > { %6681 = vmatpush3.msra.mxu0 %v550_v3  ;;  %6688 = vmatpush3.msra.mxu1 %v689_v28  ;;  %v682_v3 = vld [vmem:[%s8715_s3 + $0x18] sm:$0xff] }
  0x26   : > { %6683 = vmatmul.mubr.msk.f32.vlgmr.msra.gmra.mxu0 %vm558_vm0, %v7572_v5  ;;  %6689 = vmatprep.subr.mxu1 %v688_v29 }
  0x27   : > { %6690 = vmatpush3.msra.mxu1 %v688_v29  ;;  %6696 = vmatprep.subr.mxu0 %v686_v63  ;;  %v7699_v29 = vld [vmem:[%s8660_s7] ss:$0 sm:$0xff] }
  0x28   : > { %6691 = vmatprep.subr.mxu1 %v687_v30  ;;  %6697 = vmatpush3.msra.mxu0 %v686_v63 }
  0x29   : > { %6692 = vmatpush3.msra.mxu1 %v687_v30  ;;  %6698 = vmatprep.subr.mxu0 %v685_v0 }
  0x2a   : > { %6699 = vmatpush3.msra.mxu0 %v685_v0 }
  0x2b   : > { %6700 = vmatprep.subr.mxu0 %v684_v1 }
  0x2c   : > { %6701 = vmatpush3.msra.mxu0 %v684_v1 }
  0x2d   : > { %6702 = vmatprep.subr.mxu0 %v683_v2 }
  0x2e   : > { %6703 = vmatpush3.msra.mxu0 %v683_v2 }
  0x2f   : > { %6704 = vmatprep.subr.mxu0 %v682_v3 }
  0x30   : > { %6705 = vmatpush3.msra.mxu0 %v682_v3 }
  0x31   : > { %6706 = vmatprep.subr.mxu0 %v681_v6 }
  0x32   : > { %6707 = vmatpush3.msra.mxu0 %v681_v6 }
  0x33   : > { %6708 = vmatprep.subr.mxu0 %v680_v9 }
  0x34   : > { %6709 = vmatpush3.msra.mxu0 %v680_v9 }
  0xe6   : > { %v6684_v10 = vpop.f32.mrf.mxu0 }
  0xe7   : > { %v637_v14 = vadd.f32 %v6684_v10, %v557_v11  ;;  %v679_v10 = vld [vmem:[%s8715_s3] sm:$0xff]  ;;  %s8720_s3 = smov 96  }
  0xe8   : > { %v631_v12 = vpop.f32.mrf.mxu0  ;;  %6710 = vmatprep.subr.mxu0 %v679_v10 }
  0xe9   : > { %v632_v13 = vadd.f32 %v631_v12, %v557_v11  ;;  %v643_v16 = vsel %vm558_vm0, %v637_v14, 0.0  ;;  %6711 = vmatpush3.msra.mxu0 %v679_v10 }
  0xeb   : > { %v640_v15 = vsel %vm558_vm0, %v632_v13, 0.0 }
  0xec   : > { %641 = vadd.xlane.f32.xlu0 %v640_v15 }
  0xf0   : > { %644 = vadd.xlane.f32.xlu0 %v643_v16 }
 0x175   : > { %v642_v17 = vpop.xlane.xlu0 %641 }
 0x176   : > { %v647_v18 = vmul.f32 0.03125, %v642_v17  ;;  %v7396_v17 = vmov 0.0  }
 0x177   : > { %6715 = vmatprep.subr.mxu1 %v7396_v17  ;;  %6738 = vmatprep.subr.mxu0 %v7396_v17 }
 0x178   : > { %v649_v19 = vsub.f32 %v632_v13, %v647_v18 }
 0x179   : > { %v645_v20 = vpop.xlane.xlu0 %644 }
 0x17a   : > { %v648_v21 = vmul.f32 0.03125, %v645_v20  ;;  %v651_v22 = vmul.f32 %v649_v19, %v649_v19 }
 0x17c   : > { %v650_v23 = vsub.f32 %v637_v14, %v648_v21  ;;  %v653_v24 = vsel %vm558_vm0, %v651_v22, 0.0  ;;  %v878_v22 = vld [vmem:[%s8716_s5] sm:$0xff] }
 0x17d   : > { %654 = vadd.xlane.f32.xlu1 %v653_v24  ;;  %v7671_v24 = vld [vmem:[%s8659_s6 + $0x10] sm:$0xff] }
 0x17e   : > { %v652_v25 = vmul.f32 %v650_v23, %v650_v23 }
 0x180   : > { %v656_v26 = vsel %vm558_vm0, %v652_v25, 0.0  ;;  %v955_v25 = vld [vmem:[%s8659_s6 + $0x8] sm:$0xff] }
 0x181   : > { %657 = vadd.xlane.f32.xlu1 %v656_v26  ;;  %v7686_v26 = vld [vmem:[%s8659_s6] sm:$0xff] }
 0x206   : > { %v655_v31 = vpop.xlane.xlu1 %654 }
 0x207   : > { %v659_v32 = vmul.f32 0.03125, %v655_v31 }
 0x209   : > { %v661_v33 = vadd.f32 1e-05, %v659_v32 }
 0x20a   : > { %v658_v34 = vpop.xlane.xlu1 %657 }
 0x20b   : > { %7238 = vrsqrt.f32 %v661_v33  ;;  %v660_v35 = vmul.f32 0.03125, %v658_v34 }
 0x20d   : > { %v662_v36 = vadd.f32 1e-05, %v660_v35 }
 0x20f   : > { %7240 = vrsqrt.f32 %v662_v36 }
 0x218   : > { %v7239_v40 = vpop.eup %7238 }
 0x219   : > { %v665_v41 = vmul.f32 %v7239_v40, %v649_v19 }
 0x21b   : > { %v671_v43 = vmul.f32 %v670_v39, %v665_v41 }
 0x21c   : > { %v7241_v44 = vpop.eup %7240 }
 0x21d   : > { %v666_v45 = vmul.f32 %v7241_v44, %v650_v23  ;;  %v7611_v46 = vadd.f32 %v676_v42, %v671_v43  ;;  %v7664_v23 = vld [vmem:[%s8659_s6 + $0x18] sm:$0xff] }
 0x21f   : > { %v672_v47 = vmul.f32 %v670_v39, %v666_v45  ;;  %6693 = vmatprep.mubr.msk.f32.mxu1 %vm558_vm0, %v7611_v46 }
 0x221   : > { %v7615_v48 = vadd.f32 %v676_v42, %v672_v47 }
 0x223   : > { %6694 = vmatmul.mubr.msk.f32.vlgmr.msra.gmra.mxu1 %vm558_vm0, %v7615_v48 }
 0x224   : > { %6719 = vmatprep.mubr.msk.f32.mxu1 %vm7397_vm2, %v7396_v17 }
 0x2e3   : > { %v6695_v49 = vpop.f32.mrf.mxu1 }
 0x2e4   : > { %v776_v50 = vsel %vm772_vm1, %v6695_v49, -inf }
 0x2e5   : > { %777 = vmax.xlane.f32.xlu1 %v776_v50  ;;  %v763_v51 = vpop.f32.mrf.mxu1 }
 0x2e6   : > { %v773_v52 = vsel %vm772_vm1, %v763_v51, -inf }
 0x2e7   : > { %774 = vmax.xlane.f32.xlu0 %v773_v52 }
 0x36e   : > { %v778_v53 = vpop.xlane.xlu1 %777 }
 0x36f   : > { %v780_v54 = vsub.f32 %v6695_v49, %v778_v53 }
 0x370   : > { %v775_v55 = vpop.xlane.xlu0 %774 }
 0x371   : > { %v783_v56 = vmul.f32 1.442695, %v780_v54  ;;  %v779_v57 = vsub.f32 %v763_v51, %v775_v55 }
 0x373   : > { %7242 = vpow2.f32 %v783_v56  ;;  %v781_v58 = vmul.f32 1.442695, %v779_v57 }
 0x375   : > { %7244 = vpow2.f32 %v781_v58 }
 0x380   : > { %v7243_v59 = vpop.eup %7242 }
 0x381   : > { %v788_v60 = vsel %vm772_vm1, %v7243_v59, 0.0 }
 0x382   : > { %v7245_v61 = vpop.eup %7244  ;;  %789 = vadd.xlane.f32.xlu1 %v788_v60 }
 0x383   : > { %v785_v62 = vsel %vm772_vm1, %v7245_v61, 0.0 }
 0x384   : > { %786 = vadd.xlane.f32.xlu0 %v785_v62 }
 0x40b   : > { %v790_v11 = vpop.xlane.xlu1 %789 }
 0x40c   : > { %7246 = vrcp.f32 %v790_v11 }
 0x40d   : > { %v787_v12 = vpop.xlane.xlu0 %786 }
 0x40e   : > { %7248 = vrcp.f32 %v787_v12 }
 0x419   : > { %v7247_v13 = vpop.eup %7246 }
 0x41a   : > { %v794_v16 = vmul.f32 %v7247_v13, %v7243_v59 }
 0x41b   : > { %v7249_v14 = vpop.eup %7248 }
 0x41c   : > { %v793_v15 = vmul.f32 %v7249_v14, %v7245_v61 }
 0x41e   : > { %6712 = vmatprep.mubr.msk.f32.mxu0 %vm772_vm1, %v793_v15 }
 0x41f   : > { %6713 = vmatmul.mubr.msk.f32.vlgmr.msra.gmra.mxu0 %vm772_vm1, %v794_v16 }
 0x420   : > { %6740 = vmatprep.mubr.msk.f32.mxu0 %vm7397_vm2, %v7396_v17 }
 0x4df   : > { %v6714_v18 = vpop.f32.mrf.mxu0 }
 0x4e0   : > { %v877_v19 = vadd.f32 %v6714_v18, %v7615_v48 }
 0x4e1   : > { %v867_v20 = vpop.f32.mrf.mxu0 }
 0x4e2   : > { %v876_v21 = vadd.f32 %v867_v20, %v7611_v46  ;;  %6716 = vmatpush3.msra.mxu1 %v877_v19 }
 0x4e3   : > { %6717 = vmatprep.subr.mxu1 %v7396_v17 }
 0x4e4   : > { %6718 = vmatpush3.msra.mxu1 %v876_v21 }
 0x4e5   : > { %6720 = vmatmul.mubr.msk.f32.vlgmr.msra.gmra.mxu1 %vm879_vm3, %v878_v22  ;;  %6722 = vmatprep.subr.mxu1 %v7396_v17 }
 0x4e6   : > { %6723 = vmatpush3.msra.mxu1 %v7664_v23  ;;  %6730 = vmatprep.mubr.msk.f32.mxu1 %vm7397_vm2, %v7396_v17 }
 0x4e7   : > { %6724 = vmatprep.subr.mxu1 %v7396_v17 }
 0x4e8   : > { %6725 = vmatpush3.msra.mxu1 %v7671_v24 }
 0x4e9   : > { %6726 = vmatprep.subr.mxu1 %v7396_v17 }
 0x4ea   : > { %6727 = vmatpush3.msra.mxu1 %v955_v25 }
 0x4eb   : > { %6728 = vmatprep.subr.mxu1 %v7396_v17 }
 0x4ec   : > { %6729 = vmatpush3.msra.mxu1 %v7686_v26 }
 0x4ed   : > { %6733 = vmatprep.subr.mxu1 %v7396_v17 }
 0x5a5   : > { %v7690_v27 = vpop.f32.mrf.mxu1 }
 0x5a6   : > { %6731 = vmatmul.mubr.msk.f32.vlgmr.msra.gmra.mxu1 %vm558_vm0, %v7690_v27 }
 0x5a7   : > { %v6721_v28 = vpop.f32.mrf.mxu1  ;;  %6735 = vmatprep.mubr.msk.f32.mxu1 %vm7397_vm2, %v7396_v17 }
 0x666   : > { %v1034_v30 = vpop.f32.mrf.mxu1 }
 0x667   : > { %v7702_v31 = vadd.f32 %v7699_v29, %v1034_v30 }
 0x668   : > { %v6732_v32 = vpop.f32.mrf.mxu1 }
 0x669   : > { %1206 = vrot.lane.b32.xlu1 %v7702_v31, %s8693_s19  ;;  %1039 = vrot.lane.b32.xlu0 %v7702_v31, %s8695_s20 }
 0x66d   : > { %1204 = vrot.lane.b32.xlu1 %v7702_v31, %s8691_s18 }
 0x6db   : > { %v1040_v33 = vpop.permute.xlu0 %1039  ;;  %v1207_v34 = vpop.permute.xlu1 %1206 }
 0x6dc   : > { %6734 = vmatpush3.xpose.msk.msra.mxu1 %vm1041_vm4, %v1040_v33 }
 0x6dd   : > { %6743 = vmatprep.subr.mxu1 %v7396_v17 }
 0x6df   : > { %6736 = vmatmul.mubr.msk.f32.vlgmr.msra.gmra.mxu1 %vm1041_vm4, %v7702_v31  ;;  %v1205_v35 = vpop.permute.xlu1 %1204 }
 0x6e0   : > { %6744 = vmatpush3.xpose.msk.msra.mxu1 %vm1041_vm4, %v1207_v34  ;;  %6745 = vmatprep.mubr.msk.f32.mxu1 %vm7397_vm2, %v7396_v17 }
 0x6e1   : > { %6753 = vmatprep.subr.mxu1 %v7396_v17 }
 0x6e3   : > { %6746 = vmatmul.mubr.msk.f32.vlgmr.msra.gmra.mxu1 %vm1041_vm4, %v1205_v35 }
 0x6e4   : > { %6755 = vmatprep.mubr.msk.f32.mxu1 %vm7397_vm2, %v7396_v17 }
 0x79f   : > { %v1112_v36 = vpop.f32.mrf.mxu1 }
 0x7a0   : > { %v1116_v39 = vmul.f32 0.35355338, %v1112_v36 }
 0x7a1   : > { %v6737_v40 = vpop.f32.mrf.mxu1 }
 0x7a2   : > { %v1117_v41 = vsel %vm1041_vm4, %v1116_v39, -inf }
 0x7a3   : > { %1118 = vmax.xlane.f32.xlu1 %v1117_v41  ;;  %v1278_v42 = vpop.f32.mrf.mxu1 }
 0x7a4   : > { %v1282_v43 = vmul.f32 0.35355338, %v1278_v42 }
 0x7a5   : > { %v6747_v44 = vpop.f32.mrf.mxu1 }
 0x7a6   : > { %v1283_v45 = vsel %vm1041_vm4, %v1282_v43, -inf }
 0x7a7   : > { %1284 = vmax.xlane.f32.xlu0 %v1283_v45 }
 0x7b4   : > { %1128 = vrot.lane.b32.xlu1 %v7702_v31, %s8679_s21  ;;  %s8680_s21 = smov 40  }
 0x7b8   : > { %1371 = vrot.lane.b32.xlu1 %v955_v25, %s8687_s22 }
 0x7bc   : > { %1526 = vrot.lane.b32.xlu1 %v7702_v31, %s8683_s29  ;;  %s8718_s29 = smov 80  }
 0x7c0   : > { %1524 = vrot.lane.b32.xlu1 %v7702_v31, %s8689_s30 }
 0x7c4   : > { %1614 = vrot.lane.b32.xlu1 %v7702_v31, %s8677_s26  ;;  %s8681_s26 = smov 72  }
 0x82c   : > { %v1119_v46 = vpop.xlane.xlu1 %1118 }
 0x82d   : > { %v1120_v47 = vsub.f32 %v1116_v39, %v1119_v46 }
 0x82f   : > { %v1121_v48 = vmul.f32 1.442695, %v1120_v47 }
 0x830   : > { %v1129_v49 = vpop.permute.xlu1 %1128  ;;  %v1285_v50 = vpop.xlane.xlu0 %1284 }
 0x831   : > { %7250 = vpow2.f32 %v1121_v48  ;;  %v1286_v51 = vsub.f32 %v1282_v43, %v1285_v50  ;;  %6739 = vmatpush3.msra.mxu0 %v1129_v49 }
 0x832   : > { %6748 = vmatprep.subr.mxu0 %v7396_v17 }
 0x833   : > { %v1287_v52 = vmul.f32 1.442695, %v1286_v51 }
 0x834   : > { %v1372_v53 = vpop.permute.xlu1 %1371 }
 0x835   : > { %7252 = vpow2.f32 %v1287_v52  ;;  %6754 = vmatpush3.msra.mxu1 %v1372_v53 }
 0x836   : > { %6763 = vmatprep.subr.mxu1 %v7396_v17 }
 0x838   : > { %v1527_v2 = vpop.permute.xlu1 %1526 }
 0x83c   : > { %v1525_v10 = vpop.permute.xlu1 %1524 }
 0x83e   : > { %v7251_v54 = vpop.eup %7250 }
 0x83f   : > { %v1123_v55 = vsel %vm1041_vm4, %v7251_v54, 0.0 }
 0x840   : > { %1124 = vadd.xlane.f32.xlu0 %v1123_v55  ;;  %v1615_v22 = vpop.permute.xlu1 %1614 }
 0x842   : > { %v7253_v56 = vpop.eup %7252 }
 0x843   : > { %v1289_v57 = vsel %vm1041_vm4, %v7253_v56, 0.0 }
 0x844   : > { %1290 = vadd.xlane.f32.xlu0 %v1289_v57 }
 0x85a   : > { %1294 = vrot.lane.b32.xlu0 %v7702_v31, %s8678_s0  ;;  %s8685_s0 = smov 104  }
 0x8c9   : > { %v1125_v58 = vpop.xlane.xlu0 %1124 }
 0x8ca   : > { %7254 = vrcp.f32 %v1125_v58  ;;  %v7801_v58 = vld [vmem:[%s8659_s6 + $0x38] sm:$0xff] }
 0x8cd   : > { %v1291_v59 = vpop.xlane.xlu0 %1290 }
 0x8ce   : > { %7256 = vrcp.f32 %v1291_v59  ;;  %v7808_v59 = vld [vmem:[%s8659_s6 + $0x30] sm:$0xff] }
 0x8d1   : > { %v1295_v62 = vpop.permute.xlu0 %1294 }
 0x8d7   : > { %v7255_v60 = vpop.eup %7254 }
 0x8d8   : > { %v1127_v61 = vmul.f32 %v7255_v60, %v7251_v54 }
 0x8da   : > { %6741 = vmatmul.mubr.msk.f32.vlgmr.msra.gmra.mxu0 %vm1041_vm4, %v1127_v61 }
 0x8db   : > { %v7257_v63 = vpop.eup %7256  ;;  %6749 = vmatpush3.msra.mxu0 %v1295_v62  ;;  %6750 = vmatprep.mubr.msk.f32.mxu0 %vm7397_vm2, %v7396_v17 }
 0x8dc   : > { %v1293_v0 = vmul.f32 %v7257_v63, %v7253_v56  ;;  %6758 = vmatprep.subr.mxu0 %v7396_v17 }
 0x8de   : > { %6751 = vmatmul.mubr.msk.f32.vlgmr.msra.gmra.mxu0 %vm1041_vm4, %v1293_v0 }
 0x8df   : > { %6760 = vmatprep.mubr.msk.f32.mxu0 %vm7397_vm2, %v7396_v17 }
 0x99a   : > { %v1200_v1 = vpop.f32.mrf.mxu0 }
 0x99c   : > { %v6742_v3 = vpop.f32.mrf.mxu0 }
 0x99d   : > { %v7825_v3 = vld [vmem:[%s8659_s6 + $0x20] sm:$0xff] }
 0x99e   : > { %v1366_v6 = vpop.f32.mrf.mxu0 }
 0x99f   : > { %6756 = vmatmul.mubr.msk.f32.vlgmr.msra.gmra.mxu1 %vm1041_vm4, %v1366_v6 }
 0x9a0   : > { %6764 = vmatpush3.xpose.msk.msra.mxu1 %vm1041_vm4, %v1527_v2  ;;  %v6752_v9 = vpop.f32.mrf.mxu0  ;;  %6765 = vmatprep.mubr.msk.f32.mxu1 %vm7397_vm2, %v7396_v17  ;;  %v7819_v2 = vld [vmem:[%s8659_s6 + $0x28] sm:$0xff] }
 0x9a1   : > { %6773 = vmatprep.subr.mxu1 %v7396_v17 }
 0x9a3   : > { %6766 = vmatmul.mubr.msk.f32.vlgmr.msra.gmra.mxu1 %vm1041_vm4, %v1525_v10 }
 0x9a4   : > { %6775 = vmatprep.mubr.msk.f32.mxu1 %vm7397_vm2, %v7396_v17 }
 0xa5f   : > { %v7753_v11 = vpop.f32.mrf.mxu1 }
 0xa61   : > { %v6757_v12 = vpop.f32.mrf.mxu1 }
 0xa63   : > { %v1598_v13 = vpop.f32.mrf.mxu1 }
 0xa64   : > { %v1602_v14 = vmul.f32 0.35355338, %v1598_v13 }
 0xa65   : > { %v6767_v15 = vpop.f32.mrf.mxu1 }
 0xa66   : > { %v1603_v16 = vsel %vm1041_vm4, %v1602_v14, -inf  ;;  %v7840_v15 = vld [vmem:[%s8660_s7 + $0x1] ss:$0 sm:$0xff] }
 0xa67   : > { %1604 = vmax.xlane.f32.xlu0 %v1603_v16 }
 0xa7d   : > { %1448 = vrot.lane.b32.xlu0 %v7686_v26, %s8687_s22 }
 0xa81   : > { %1770 = vrot.lane.b32.xlu0 %v7702_v31, %s8681_s26  ;;  %s8719_s26 = smov 72  }
 0xaf0   : > { %v1605_v18 = vpop.xlane.xlu0 %1604 }
 0xaf1   : > { %v1606_v19 = vsub.f32 %v1602_v14, %v1605_v18 }
 0xaf3   : > { %v1607_v20 = vmul.f32 1.442695, %v1606_v19 }
 0xaf4   : > { %v1449_v21 = vpop.permute.xlu0 %1448 }
 0xaf5   : > { %7258 = vpow2.f32 %v1607_v20  ;;  %6759 = vmatpush3.msra.mxu0 %v1449_v21  ;;  %v7852_v21 = vld [vmem:[%s8665_s12] sm:$0x3f] }
 0xaf6   : > { %6761 = vmatmul.mubr.msk.f32.vlgmr.msra.gmra.mxu0 %vm1041_vm4, %v1200_v1  ;;  %6768 = vmatprep.subr.mxu0 %v7396_v17 }
 0xaf7   : > { %6769 = vmatpush3.msra.mxu0 %v1615_v22  ;;  %6770 = vmatprep.mubr.msk.f32.mxu0 %vm7397_vm2, %v7396_v17  ;;  %v2033_v22 = vrot.slane %v7852_v21, %v7581_v8 }
 0xaf8   : > { %6778 = vmatprep.subr.mxu0 %v7396_v17  ;;  %v1771_v33 = vpop.permute.xlu0 %1770 }
 0xb02   : > { %v7259_v25 = vpop.eup %7258 }
 0xb03   : > { %v1609_v26 = vsel %vm1041_vm4, %v7259_v25, 0.0 }
 0xb04   : > { %1610 = vadd.xlane.f32.xlu1 %v1609_v26 }
 0xb15   : > { %1768 = vrot.lane.b32.xlu1 %v7702_v31, %s8685_s0  ;;  %s8723_s0 = smov 64  }
 0xb8d   : > { %v1611_v28 = vpop.xlane.xlu1 %1610 }
 0xb8e   : > { %7260 = vrcp.f32 %v1611_v28  ;;  %v2038_v28 = vrot.slane %v7852_v21, %v7604_v37 }
 0xb91   : > { %v1769_v34 = vpop.permute.xlu1 %1768 }
 0xb9b   : > { %v7261_v30 = vpop.eup %7260 }
 0xb9c   : > { %v1613_v32 = vmul.f32 %v7261_v30, %v7259_v25 }
 0xb9e   : > { %6771 = vmatmul.mubr.msk.f32.vlgmr.msra.gmra.mxu0 %vm1041_vm4, %v1613_v32 }
 0xb9f   : > { %6779 = vmatpush3.xpose.msk.msra.mxu0 %vm1041_vm4, %v1771_v33  ;;  %6780 = vmatprep.mubr.msk.f32.mxu0 %vm7397_vm2, %v7396_v17 }
 0xba0   : > { %6788 = vmatprep.subr.mxu0 %v7396_v17 }
 0xba2   : > { %6781 = vmatmul.mubr.msk.f32.vlgmr.msra.gmra.mxu0 %vm1041_vm4, %v1769_v34 }
 0xba3   : > { %6790 = vmatprep.mubr.msk.f32.mxu0 %vm7397_vm2, %v7396_v17 }
 0xbb6   : > { %v1520_v35 = vpop.f32.mrf.mxu0 }
 0xbb8   : > { %v6762_v36 = vpop.f32.mrf.mxu0 }
 0xc5e   : > { %v1686_v39 = vpop.f32.mrf.mxu0 }
 0xc60   : > { %v6772_v40 = vpop.f32.mrf.mxu0 }
 0xc62   : > { %v1842_v41 = vpop.f32.mrf.mxu0 }
 0xc63   : > { %v1846_v42 = vmul.f32 0.35355338, %v1842_v41 }
 0xc64   : > { %v6782_v43 = vpop.f32.mrf.mxu0 }
 0xc65   : > { %v1847_v44 = vsel %vm1041_vm4, %v1846_v42, -inf }
 0xc66   : > { %1848 = vmax.xlane.f32.xlu0 %v1847_v44 }
 0xc7c   : > { %1691 = vrot.lane.b32.xlu0 %v7671_v24, %s8687_s22 }
 0xc80   : > { %1935 = vrot.lane.b32.xlu0 %v7664_v23, %s8687_s22 }
 0xcef   : > { %v1849_v45 = vpop.xlane.xlu0 %1848 }
 0xcf0   : > { %v1850_v46 = vsub.f32 %v1846_v42, %v1849_v45 }
 0xcf2   : > { %v1851_v47 = vmul.f32 1.442695, %v1850_v46 }
 0xcf3   : > { %v1692_v48 = vpop.permute.xlu0 %1691 }
 0xcf4   : > { %7262 = vpow2.f32 %v1851_v47  ;;  %6774 = vmatpush3.msra.mxu1 %v1692_v48 }
 0xcf5   : > { %6776 = vmatmul.mubr.msk.f32.vlgmr.msra.gmra.mxu1 %vm1041_vm4, %v1686_v39  ;;  %6783 = vmatprep.subr.mxu1 %v7396_v17 }
 0xcf6   : > { %6785 = vmatprep.mubr.msk.f32.mxu1 %vm7397_vm2, %v7396_v17 }
 0xcf7   : > { %v1936_v23 = vpop.permute.xlu0 %1935 }
 0xcf8   : > { %6789 = vmatpush3.msra.mxu0 %v1936_v23 }
 0xd01   : > { %v7263_v49 = vpop.eup %7262 }
 0xd02   : > { %v1853_v50 = vsel %vm1041_vm4, %v7263_v49, 0.0 }
 0xd03   : > { %1854 = vadd.xlane.f32.xlu1 %v1853_v50 }
 0xd14   : > { %1858 = vrot.lane.b32.xlu1 %v7702_v31, %s8680_s21  ;;  %v1521_v31 = vadd.f32 %v1520_v35, %v7753_v11  ;;  %s8717_s21 = smov 104  }
 0xd18   : > { %2012 = vrot.lane.b32.xlu1 %v7699_v29, %s8687_s22 }
 0xd1c   : > { %2134 = vrot.lane.b32.xlu1 %v7808_v59, %s8695_s20 }
 0xd8c   : > { %v1855_v24 = vpop.xlane.xlu1 %1854 }
 0xd8d   : > { %7264 = vrcp.f32 %v1855_v24 }
 0xd90   : > { %v1859_v51 = vpop.permute.xlu1 %1858 }
 0xd91   : > { %6784 = vmatpush3.msra.mxu1 %v1859_v51 }
 0xd92   : > { %6793 = vmatprep.subr.mxu1 %v7396_v17 }
 0xd94   : > { %v2013_v60 = vpop.permute.xlu1 %2012 }
 0xd98   : > { %v2135_v11 = vpop.permute.xlu1 %2134 }
 0xd9a   : > { %v7265_v52 = vpop.eup %7264 }
 0xd9b   : > { %v1857_v53 = vmul.f32 %v7265_v52, %v7263_v49 }
 0xd9d   : > { %6786 = vmatmul.mubr.msk.f32.vlgmr.msra.gmra.mxu1 %vm1041_vm4, %v1857_v53 }
 0xd9e   : > { %6801 = vmatprep.mubr.msk.f32.mxu1 %vm7397_vm2, %v7396_v17  ;;  %6794 = vmatpush3.msra.mxu1 %v7801_v58 }
 0xd9f   : > { %6795 = vmatprep.subr.mxu1 %v7396_v17 }
 0xda0   : > { %6796 = vmatpush3.msra.mxu1 %v7808_v59 }
 0xda1   : > { %6797 = vmatprep.subr.mxu1 %v7396_v17 }
 0xda2   : > { %6798 = vmatpush3.msra.mxu1 %v7819_v2 }
 0xda3   : > { %6799 = vmatprep.subr.mxu1 %v7396_v17 }
 0xda4   : > { %6800 = vmatpush3.msra.mxu1 %v7825_v3 }
 0xda5   : > { %6815 = vmatprep.subr.mxu1 %v7396_v17 }
 0xdb5   : > { %v1763_v54 = vpop.f32.mrf.mxu1 }
 0xdb6   : > { %v1767_v55 = vadd.f32 %v1763_v54, %v1521_v31 }
 0xdb7   : > { %v6777_v29 = vpop.f32.mrf.mxu1 }
 0xe5d   : > { %v1930_v56 = vpop.f32.mrf.mxu1 }
 0xe5e   : > { %6791 = vmatmul.mubr.msk.f32.vlgmr.msra.gmra.mxu0 %vm1041_vm4, %v1930_v56 }
 0xe5f   : > { %v6787_v57 = vpop.f32.mrf.mxu1  ;;  %6812 = vmatprep.mubr.msk.f32.mxu0 %vm558_vm0, %v7569_v4 }
 0xf1e   : > { %v2007_v4 = vpop.f32.mrf.mxu0 }
 0xf1f   : > { %v2011_v61 = vadd.f32 %v2007_v4, %v1767_v55 }
 0xf20   : > { %v6792_v62 = vpop.f32.mrf.mxu0 }
 0xf21   : > { %v2015_v63 = vadd.f32 %v2013_v60, %v2011_v61 }
 0xf23   : > { %v2016_v0 = vadd.f32 %v2015_v63, %v7690_v27 }
 0xf25   : > { %v2017_v1 = vsel %vm558_vm0, %v2016_v0, 0.0 }
 0xf26   : > { %2018 = vadd.xlane.f32.xlu0 %v2017_v1 }
 0xf3c   : > { %2136 = vrot.lane.b32.xlu0 %v7801_v58, %s8695_s20 }
 0xf40   : > { %2132 = vrot.lane.b32.xlu0 %v7819_v2, %s8695_s20 }
 0xf44   : > { %2142 = vrot.lane.b32.xlu0 %v7840_v15, %s8695_s20 }
 0xfaf   : > { %v2019_v27 = vpop.xlane.xlu0 %2018 }
 0xfb0   : > { %v2020_v6 = vmul.f32 0.03125, %v2019_v27 }
 0xfb2   : > { %v2021_v9 = vsub.f32 %v2016_v0, %v2020_v6 }
 0xfb3   : > { %v2137_v10 = vpop.permute.xlu0 %2136 }
 0xfb4   : > { %v2022_v12 = vmul.f32 %v2021_v9, %v2021_v9  ;;  %6804 = vmatprep.subr.mxu0 %v2137_v10 }
 0xfb5   : > { %6805 = vmatpush3.msra.mxu0 %v2137_v10 }
 0xfb6   : > { %v2023_v13 = vsel %vm558_vm0, %v2022_v12, 0.0  ;;  %6806 = vmatprep.subr.mxu0 %v2135_v11 }
 0xfb7   : > { %2024 = vadd.xlane.f32.xlu1 %v2023_v13  ;;  %6807 = vmatpush3.msra.mxu0 %v2135_v11  ;;  %v2133_v14 = vpop.permute.xlu0 %2132 }
 0xfb8   : > { %6808 = vmatprep.subr.mxu0 %v2133_v14 }
 0xfb9   : > { %6809 = vmatpush3.msra.mxu0 %v2133_v14 }
 0xfbb   : > { %v2143_v32 = vpop.permute.xlu0 %2142 }
 0xfc8   : > { %2130 = vrot.lane.b32.xlu1 %v7825_v3, %s8695_s20 }
0x1040   : > { %v2025_v16 = vpop.xlane.xlu1 %2024 }
0x1041   : > { %v2026_v18 = vmul.f32 0.03125, %v2025_v16 }
0x1043   : > { %v2027_v19 = vadd.f32 1e-05, %v2026_v18 }
0x1044   : > { %v2131_v20 = vpop.permute.xlu1 %2130 }
0x1045   : > { %7266 = vrsqrt.f32 %v2027_v19  ;;  %6810 = vmatprep.subr.mxu0 %v2131_v20 }
0x1046   : > { %6811 = vmatpush3.msra.mxu0 %v2131_v20 }
0x1047   : > { %6813 = vmatmul.mubr.msk.f32.vlgmr.msra.gmra.mxu0 %vm558_vm0, %v7572_v5  ;;  %6822 = vmatprep.subr.mxu0 %v7396_v17 }
0x1048   : > { %6826 = vmatprep.mubr.msk.f32.mxu0 %vm7397_vm2, %v7396_v17 }
0x1052   : > { %v7267_v25 = vpop.eup %7266 }
0x1053   : > { %v2029_v26 = vmul.f32 %v7267_v25, %v2021_v9 }
0x1055   : > { %v2034_v30 = vmul.f32 %v2033_v22, %v2029_v26 }
0x1057   : > { %v7858_v5 = vadd.f32 %v2038_v28, %v2034_v30 }
0x1059   : > { %6802 = vmatmul.mubr.msk.f32.vlgmr.msra.gmra.mxu1 %vm558_vm0, %v7858_v5 }
0x105a   : > { %6819 = vmatprep.mubr.msk.f32.mxu1 %vm7397_vm2, %v7396_v17 }
0x1107   : > { %v6814_v33 = vpop.f32.mrf.mxu0 }
0x1108   : > { %v7864_v34 = vadd.f32 %v6814_v33, %v2143_v32 }
0x1109   : > { %v2211_v35 = vpop.f32.mrf.mxu0 }
0x110a   : > { %6816 = vmatpush3.xpose.msk.msra.mxu1 %vm1041_vm4, %v7864_v34  ;;  %v7868_v36 = vadd.f32 %v2211_v35, %v2143_v32 }
0x110b   : > { %6817 = vmatprep.subr.mxu1 %v7396_v17 }
0x110e   : > { %6818 = vmatpush3.xpose.msk.msra.mxu1 %vm1041_vm4, %v7868_v36 }
0x110f   : > { %6836 = vmatprep.subr.mxu1 %v7396_v17 }
0x1119   : > { %v2122_v39 = vpop.f32.mrf.mxu1 }
0x111a   : > { %v7875_v40 = vadd.f32 %v7840_v15, %v2122_v39 }
0x111b   : > { %v6803_v41 = vpop.f32.mrf.mxu1 }
0x111c   : > { %6820 = vmatmul.mubr.msk.f32.vlgmr.msra.gmra.mxu1 %vm1041_vm4, %v7875_v40 }
0x111d   : > { %6840 = vmatprep.mubr.msk.f32.mxu1 %vm7397_vm2, %v7396_v17 }
0x11dc   : > { %v2295_v42 = vpop.f32.mrf.mxu1 }
0x11dd   : > { %v2299_v43 = vmul.f32 0.35355338, %v2295_v42 }
0x11de   : > { %v6821_v44 = vpop.f32.mrf.mxu1 }
0x11df   : > { %v2300_v45 = vsel %vm879_vm3, %v2299_v43, -inf }
0x11e0   : > { %2301 = vmax.xlane.f32.xlu1 %v2300_v45 }
0x11f1   : > { %2311 = vrot.lane.b32.xlu1 %v7868_v36, %s8695_s20 }
0x11f5   : > { %2394 = vrot.lane.b32.xlu1 %v7864_v34, %s8691_s18 }
0x11f9   : > { %2390 = vrot.lane.b32.xlu1 %v7875_v40, %s8691_s18 }
0x1269   : > { %v2302_v46 = vpop.xlane.xlu1 %2301 }
0x126a   : > { %v2303_v47 = vsub.f32 %v2299_v43, %v2302_v46 }
0x126c   : > { %v2304_v48 = vmul.f32 1.442695, %v2303_v47 }
0x126d   : > { %v2312_v51 = vpop.permute.xlu1 %2311 }
0x126e   : > { %7268 = vpow2.f32 %v2304_v48 }
0x1271   : > { %v2395_v31 = vpop.permute.xlu1 %2394 }
0x1275   : > { %v2391_v55 = vpop.permute.xlu1 %2390 }
0x127b   : > { %v7269_v49 = vpop.eup %7268 }
0x127c   : > { %v2306_v50 = vsel %vm879_vm3, %v7269_v49, 0.0 }
0x127d   : > { %2307 = vadd.xlane.f32.xlu0 %v2306_v50 }
0x1293   : > { %2313 = vrot.lane.b32.xlu0 %v7864_v34, %s8695_s20  ;;  %s8721_s20 = smov 88  }
0x1297   : > { %2392 = vrot.lane.b32.xlu0 %v7868_v36, %s8691_s18  ;;  %s8724_s18 = smov 56  }
0x1306   : > { %v2308_v23 = vpop.xlane.xlu0 %2307 }
0x1307   : > { %7270 = vrcp.f32 %v2308_v23 }
0x130a   : > { %v2314_v24 = vpop.permute.xlu0 %2313 }
0x130b   : > { %6823 = vmatpush3.msra.mxu0 %v2314_v24 }
0x130c   : > { %6824 = vmatprep.subr.mxu0 %v7396_v17 }
0x130d   : > { %6825 = vmatpush3.msra.mxu0 %v2312_v51 }
0x130e   : > { %6829 = vmatprep.subr.mxu0 %v7396_v17  ;;  %v2393_v54 = vpop.permute.xlu0 %2392 }
0x1314   : > { %v7271_v52 = vpop.eup %7270 }
0x1315   : > { %v2310_v53 = vmul.f32 %v7271_v52, %v7269_v49 }
0x1317   : > { %6827 = vmatmul.mubr.msk.f32.vlgmr.msra.gmra.mxu0 %vm879_vm3, %v2310_v53 }
0x1318   : > { %6830 = vmatpush3.xpose.msk.msra.mxu0 %vm1041_vm4, %v2395_v31  ;;  %6833 = vmatprep.mubr.msk.f32.mxu0 %vm7397_vm2, %v7396_v17 }
0x1319   : > { %6831 = vmatprep.subr.mxu0 %v7396_v17 }
0x131c   : > { %6832 = vmatpush3.xpose.msk.msra.mxu0 %vm1041_vm4, %v2393_v54 }
0x131d   : > { %6848 = vmatprep.subr.mxu0 %v7396_v17 }
0x131f   : > { %6834 = vmatmul.mubr.msk.f32.vlgmr.msra.gmra.mxu0 %vm1041_vm4, %v2391_v55 }
0x1320   : > { %6850 = vmatprep.mubr.msk.f32.mxu0 %vm7397_vm2, %v7396_v17 }
0x13d7   : > { %v7905_v29 = vpop.f32.mrf.mxu0 }
0x13d9   : > { %v6828_v56 = vpop.f32.mrf.mxu0 }
0x13df   : > { %v2468_v57 = vpop.f32.mrf.mxu0 }
0x13e0   : > { %v2472_v4 = vmul.f32 0.35355338, %v2468_v57 }
0x13e1   : > { %v6835_v60 = vpop.f32.mrf.mxu0 }
0x13e2   : > { %v2473_v61 = vsel %vm879_vm3, %v2472_v4, -inf }
0x13e3   : > { %2474 = vmax.xlane.f32.xlu0 %v2473_v61 }
0x13f9   : > { %2486 = vrot.lane.b32.xlu0 %v7864_v34, %s8693_s19 }
0x13fd   : > { %2563 = vrot.lane.b32.xlu0 %v7819_v2, %s8687_s22 }
0x1401   : > { %2717 = vrot.lane.b32.xlu0 %v7868_v36, %s8689_s30 }
0x1405   : > { %2969 = vrot.lane.b32.xlu0 %v7864_v34, %s8717_s21 }
0x1409   : > { %2965 = vrot.lane.b32.xlu0 %v7875_v40, %s8717_s21 }
0x146c   : > { %v2475_v62 = vpop.xlane.xlu0 %2474 }
0x146d   : > { %v2476_v63 = vsub.f32 %v2472_v4, %v2475_v62 }
0x146f   : > { %v2477_v0 = vmul.f32 1.442695, %v2476_v63 }
0x1470   : > { %v2487_v1 = vpop.permute.xlu0 %2486 }
0x1471   : > { %7272 = vpow2.f32 %v2477_v0  ;;  %6837 = vmatpush3.msra.mxu1 %v2487_v1 }
0x1472   : > { %6838 = vmatprep.subr.mxu1 %v7396_v17 }
0x1474   : > { %v2564_v12 = vpop.permute.xlu0 %2563 }
0x1478   : > { %v2718_v18 = vpop.permute.xlu0 %2717 }
0x147c   : > { %v2970_v20 = vpop.permute.xlu0 %2969 }
0x147e   : > { %v7273_v27 = vpop.eup %7272 }
0x147f   : > { %v2479_v2 = vsel %vm879_vm3, %v7273_v27, 0.0 }
0x1480   : > { %2480 = vadd.xlane.f32.xlu1 %v2479_v2  ;;  %v2966_v25 = vpop.permute.xlu0 %2965 }
0x1491   : > { %2484 = vrot.lane.b32.xlu1 %v7868_v36, %s8693_s19  ;;  %s8726_s19 = smov 32  }
0x1495   : > { %2719 = vrot.lane.b32.xlu1 %v7864_v34, %s8689_s30 }
0x1499   : > { %2715 = vrot.lane.b32.xlu1 %v7875_v40, %s8689_s30  ;;  %s8725_s30 = smov 112  }
0x149d   : > { %2967 = vrot.lane.b32.xlu1 %v7868_v36, %s8717_s21 }
0x1509   : > { %v2481_v6 = vpop.xlane.xlu1 %2480 }
0x150a   : > { %7274 = vrcp.f32 %v2481_v6 }
0x150d   : > { %v2485_v9 = vpop.permute.xlu1 %2484 }
0x150e   : > { %6839 = vmatpush3.msra.mxu1 %v2485_v9 }
0x150f   : > { %6843 = vmatprep.subr.mxu1 %v7396_v17 }
0x1511   : > { %v2720_v14 = vpop.permute.xlu1 %2719 }
0x1515   : > { %v2716_v19 = vpop.permute.xlu1 %2715 }
0x1517   : > { %v7275_v10 = vpop.eup %7274 }
0x1518   : > { %v2483_v11 = vmul.f32 %v7275_v10, %v7273_v27 }
0x1519   : > { %v2968_v22 = vpop.permute.xlu1 %2967 }
0x151a   : > { %6841 = vmatmul.mubr.msk.f32.vlgmr.msra.gmra.mxu1 %vm879_vm3, %v2483_v11 }
0x151b   : > { %6844 = vmatpush3.msra.mxu1 %v2564_v12  ;;  %6845 = vmatprep.mubr.msk.f32.mxu1 %vm7397_vm2, %v7396_v17 }
0x151c   : > { %6853 = vmatprep.subr.mxu1 %v7396_v17 }
0x15da   : > { %v2559_v13 = vpop.f32.mrf.mxu1 }
0x15db   : > { %6846 = vmatmul.mubr.msk.f32.vlgmr.msra.gmra.mxu1 %vm1041_vm4, %v2559_v13 }
0x15dc   : > { %6854 = vmatpush3.xpose.msk.msra.mxu1 %vm1041_vm4, %v2720_v14  ;;  %v6842_v16 = vpop.f32.mrf.mxu1  ;;  %6857 = vmatprep.mubr.msk.f32.mxu1 %vm7397_vm2, %v7396_v17 }
0x15dd   : > { %6855 = vmatprep.subr.mxu1 %v7396_v17 }
0x15e0   : > { %6856 = vmatpush3.xpose.msk.msra.mxu1 %vm1041_vm4, %v2718_v18 }
0x15e1   : > { %6872 = vmatprep.subr.mxu1 %v7396_v17 }
0x15e3   : > { %6858 = vmatmul.mubr.msk.f32.vlgmr.msra.gmra.mxu1 %vm1041_vm4, %v2716_v19 }
0x15e4   : > { %6873 = vmatpush3.xpose.msk.msra.mxu1 %vm1041_vm4, %v2970_v20  ;;  %6876 = vmatprep.mubr.msk.f32.mxu1 %vm7397_vm2, %v7396_v17 }
0x15e5   : > { %6874 = vmatprep.subr.mxu1 %v7396_v17 }
0x15e8   : > { %6875 = vmatpush3.xpose.msk.msra.mxu1 %vm1041_vm4, %v2968_v22  ;;  %v3246_v22 = vld [vmem:[%s8661_s8 + $0x18] sm:$0xff] }
0x15e9   : > { %6891 = vmatprep.subr.mxu1 %v7396_v17 }
0x15eb   : > { %6877 = vmatmul.mubr.msk.f32.vlgmr.msra.gmra.mxu1 %vm1041_vm4, %v2966_v25  ;;  %v3244_v25 = vld [vmem:[%s8661_s8 + $0x8] sm:$0xff] }
0x15ec   : > { %6899 = vmatprep.mubr.msk.f32.mxu1 %vm7397_vm2, %v7396_v17  ;;  %6892 = vmatpush3.msra.mxu1 %v3246_v22 }
0x15ed   : > { %6893 = vmatprep.subr.mxu1 %v7396_v17 }
0x169b   : > { %v7950_v26 = vpop.f32.mrf.mxu1 }
0x169d   : > { %v6847_v28 = vpop.f32.mrf.mxu1 }
0x169e   : > { %v3343_v28 = vld [vmem:[%s8663_s10 + $0x78] sm:$0xff] }
0x16a3   : > { %v2793_v30 = vpop.f32.mrf.mxu1 }
0x16a4   : > { %v2797_v32 = vmul.f32 0.35355338, %v2793_v30  ;;  %v3342_v30 = vld [vmem:[%s8663_s10 + $0x70] sm:$0xff] }
0x16a5   : > { %v6859_v33 = vpop.f32.mrf.mxu1 }
0x16a6   : > { %v2798_v35 = vsel %vm879_vm3, %v2797_v32, -inf  ;;  %v3340_v33 = vld [vmem:[%s8663_s10 + $0x60] sm:$0xff] }
0x16a7   : > { %2799 = vmax.xlane.f32.xlu1 %v2798_v35  ;;  %v3339_v35 = vld [vmem:[%s8663_s10 + $0x58] sm:$0xff] }
0x16ab   : > { %v3043_v39 = vpop.f32.mrf.mxu1 }
0x16ac   : > { %v3047_v46 = vmul.f32 0.35355338, %v3043_v39  ;;  %v3338_v39 = vld [vmem:[%s8663_s10 + $0x50] sm:$0xff] }
0x16ad   : > { %v6878_v40 = vpop.f32.mrf.mxu1 }
0x16ae   : > { %v3048_v47 = vsel %vm879_vm3, %v3047_v46, -inf  ;;  %v3337_v40 = vld [vmem:[%s8663_s10 + $0x48] sm:$0xff] }
0x16b8   : > { %2811 = vrot.lane.b32.xlu1 %v7864_v34, %s8718_s29 }
0x16bc   : > { %2809 = vrot.lane.b32.xlu1 %v7868_v36, %s8718_s29 }
0x1730   : > { %v2800_v41 = vpop.xlane.xlu1 %2799 }
0x1731   : > { %v2801_v42 = vsub.f32 %v2797_v32, %v2800_v41  ;;  %v3341_v32 = vld [vmem:[%s8663_s10 + $0x68] sm:$0xff]  ;;  %v3336_v41 = vld [vmem:[%s8663_s10 + $0x40] sm:$0xff] }
0x1733   : > { %v2802_v43 = vmul.f32 1.442695, %v2801_v42  ;;  %v3335_v42 = vld [vmem:[%s8663_s10 + $0x38] sm:$0xff] }
0x1734   : > { %v2812_v49 = vpop.permute.xlu1 %2811 }
0x1735   : > { %7276 = vpow2.f32 %v2802_v43  ;;  %v3334_v43 = vld [vmem:[%s8663_s10 + $0x30] sm:$0xff] }
0x1742   : > { %v7277_v44 = vpop.eup %7276 }
0x1743   : > { %v2804_v45 = vsel %vm879_vm3, %v7277_v44, 0.0 }
0x1744   : > { %2805 = vadd.xlane.f32.xlu0 %v2804_v45  ;;  %v3332_v45 = vld [vmem:[%s8663_s10 + $0x20] sm:$0xff] }
0x175a   : > { %2639 = vrot.lane.b32.xlu0 %v7825_v3, %s8687_s22 }
0x1779   : > { %3049 = vmax.xlane.f32.xlu0 %v3048_v47 }
0x178f   : > { %2888 = vrot.lane.b32.xlu0 %v7808_v59, %s8687_s22  ;;  %v2810_v59 = vpop.permute.xlu1 %2809 }
0x1793   : > { %3059 = vrot.lane.b32.xlu0 %v7868_v36, %s8719_s26 }
0x1797   : > { %3215 = vrot.lane.b32.xlu0 %v7840_v15, %s8687_s22 }
0x17cd   : > { %v2806_v48 = vpop.xlane.xlu0 %2805 }
0x17ce   : > { %7278 = vrcp.f32 %v2806_v48 }
0x17d1   : > { %v2640_v50 = vpop.permute.xlu0 %2639 }
0x17d2   : > { %6849 = vmatpush3.msra.mxu0 %v2640_v50  ;;  %v3240_v50 = vsub.s32 3, %v7578_v7 }
0x17d3   : > { %6851 = vmatmul.mubr.msk.f32.vlgmr.msra.gmra.mxu0 %vm1041_vm4, %v7905_v29  ;;  %6860 = vmatprep.subr.mxu0 %v7396_v17 }
0x17d4   : > { %6861 = vmatpush3.msra.mxu0 %v2812_v49  ;;  %6864 = vmatprep.mubr.msk.f32.mxu0 %vm7397_vm2, %v7396_v17 }
0x17d5   : > { %6862 = vmatprep.subr.mxu0 %v7396_v17 }
0x17d6   : > { %6863 = vmatpush3.msra.mxu0 %v2810_v59  ;;  %v3236_v59 = vrot.slane %v7852_v21, %v7607_v38 }
0x17d7   : > { %6867 = vmatprep.subr.mxu0 %v7396_v17 }
0x17db   : > { %v7279_v3 = vpop.eup %7278 }
0x17dc   : > { %v2808_v15 = vmul.f32 %v7279_v3, %v7277_v44  ;;  %v3333_v44 = vld [vmem:[%s8663_s10 + $0x28] sm:$0xff] }
0x17de   : > { %6865 = vmatmul.mubr.msk.f32.vlgmr.msra.gmra.mxu0 %vm879_vm3, %v2808_v15 }
0x17df   : > { %6869 = vmatprep.mubr.msk.f32.mxu0 %vm7397_vm2, %v7396_v17 }
0x1802   : > { %v3050_v36 = vpop.xlane.xlu0 %3049 }
0x1803   : > { %v3051_v23 = vsub.f32 %v3047_v46, %v3050_v36  ;;  %v3331_v46 = vld [vmem:[%s8663_s10 + $0x18] sm:$0xff]  ;;  %v3241_v36 = vrot.slane %v7852_v21, %v3240_v50 }
0x1805   : > { %v3052_v24 = vmul.f32 1.442695, %v3051_v23 }
0x1806   : > { %v2889_v51 = vpop.permute.xlu0 %2888 }
0x1807   : > { %7280 = vpow2.f32 %v3052_v24  ;;  %6868 = vmatpush3.msra.mxu0 %v2889_v51  ;;  %v3330_v51 = vld [vmem:[%s8663_s10 + $0x10] sm:$0xff] }
0x1808   : > { %6879 = vmatprep.subr.mxu0 %v7396_v17 }
0x180a   : > { %v3060_v4 = vpop.permute.xlu0 %3059 }
0x180e   : > { %v3216_v6 = vpop.permute.xlu0 %3215 }
0x1814   : > { %v7281_v52 = vpop.eup %7280 }
0x1815   : > { %v3054_v53 = vsel %vm879_vm3, %v7281_v52, 0.0 }
0x1816   : > { %3055 = vadd.xlane.f32.xlu1 %v3054_v53  ;;  %v3328_v53 = vld [vmem:[%s8663_s10] sm:$0xff] }
0x1827   : > { %3061 = vrot.lane.b32.xlu1 %v7864_v34, %s8719_s26 }
0x182b   : > { %3138 = vrot.lane.b32.xlu1 %v7801_v58, %s8687_s22  ;;  %s8722_s22 = smov 120  }
0x1893   : > { %v2711_v31 = vpop.f32.mrf.mxu0 }
0x1894   : > { %v2712_v61 = vadd.f32 %v2711_v31, %v7950_v26  ;;  %v3243_v26 = vld [vmem:[%s8661_s8] sm:$0xff] }
0x1895   : > { %v6852_v54 = vpop.f32.mrf.mxu0  ;;  %v6355_v31 = vld [vmem:[%s8662_s9] ss:$0 sm:$0xff] }
0x189e   : > { %v2884_v55 = vpop.f32.mrf.mxu0 }
0x189f   : > { %v3056_v29 = vpop.xlane.xlu1 %3055  ;;  %6870 = vmatmul.mubr.msk.f32.vlgmr.msra.gmra.mxu0 %vm1041_vm4, %v2884_v55 }
0x18a0   : > { %7282 = vrcp.f32 %v3056_v29  ;;  %v6866_v56 = vpop.f32.mrf.mxu0  ;;  %6883 = vmatprep.mubr.msk.f32.mxu0 %vm7397_vm2, %v7396_v17 }
0x18a3   : > { %v3062_v57 = vpop.permute.xlu1 %3061 }
0x18a4   : > { %6880 = vmatpush3.msra.mxu0 %v3062_v57  ;;  %v6357_v57 = vld [vmem:[%s8664_s11] ss:$0 sm:$0xff] }
0x18a5   : > { %6881 = vmatprep.subr.mxu0 %v7396_v17 }
0x18a6   : > { %6882 = vmatpush3.msra.mxu0 %v3060_v4 }
0x18a7   : > { %6886 = vmatprep.subr.mxu0 %v7396_v17  ;;  %v3139_v60 = vpop.permute.xlu1 %3138 }
0x18ad   : > { %v7283_v58 = vpop.eup %7282 }
0x18ae   : > { %v3058_v34 = vmul.f32 %v7283_v58, %v7281_v52  ;;  %v3329_v52 = vld [vmem:[%s8663_s10 + $0x8] sm:$0xff] }
0x18b0   : > { %6884 = vmatmul.mubr.msk.f32.vlgmr.msra.gmra.mxu0 %vm879_vm3, %v3058_v34 }
0x18b1   : > { %6888 = vmatprep.mubr.msk.f32.mxu0 %vm7397_vm2, %v7396_v17  ;;  %6887 = vmatpush3.msra.mxu0 %v3139_v60 }
0x18b2   : > { %6902 = vmatprep.subr.mxu0 %v7396_v17 }
0x195f   : > { %v2960_v62 = vpop.f32.mrf.mxu0 }
0x1960   : > { %v2964_v63 = vadd.f32 %v2960_v62, %v2712_v61 }
0x1961   : > { %v6871_v0 = vpop.f32.mrf.mxu0 }
0x1970   : > { %v3134_v1 = vpop.f32.mrf.mxu0 }
0x1971   : > { %6889 = vmatmul.mubr.msk.f32.vlgmr.msra.gmra.mxu0 %vm1041_vm4, %v3134_v1 }
0x1972   : > { %v6885_v27 = vpop.f32.mrf.mxu0  ;;  %6934 = vmatprep.mubr.msk.f32.mxu0 %vm7397_vm2, %v7396_v17  ;;  %6903 = vmatpush3.msra.mxu0 %v3343_v28 }
0x1973   : > { %6904 = vmatprep.subr.mxu0 %v7396_v17 }
0x1974   : > { %6905 = vmatpush3.msra.mxu0 %v3342_v30 }
0x1975   : > { %6906 = vmatprep.subr.mxu0 %v7396_v17 }
0x1976   : > { %6907 = vmatpush3.msra.mxu0 %v3341_v32 }
0x1977   : > { %6908 = vmatprep.subr.mxu0 %v7396_v17 }
0x1978   : > { %6909 = vmatpush3.msra.mxu0 %v3340_v33 }
0x1979   : > { %6910 = vmatprep.subr.mxu0 %v7396_v17 }
0x197a   : > { %6911 = vmatpush3.msra.mxu0 %v3339_v35 }
0x197b   : > { %6912 = vmatprep.subr.mxu0 %v7396_v17 }
0x197c   : > { %6913 = vmatpush3.msra.mxu0 %v3338_v39 }
0x197d   : > { %6914 = vmatprep.subr.mxu0 %v7396_v17 }
0x197e   : > { %6915 = vmatpush3.msra.mxu0 %v3337_v40 }
0x197f   : > { %6916 = vmatprep.subr.mxu0 %v7396_v17 }
0x1980   : > { %6917 = vmatpush3.msra.mxu0 %v3336_v41 }
0x1981   : > { %6918 = vmatprep.subr.mxu0 %v7396_v17 }
0x1982   : > { %6919 = vmatpush3.msra.mxu0 %v3335_v42 }
0x1983   : > { %6920 = vmatprep.subr.mxu0 %v7396_v17 }
0x1984   : > { %6921 = vmatpush3.msra.mxu0 %v3334_v43 }
0x1985   : > { %6922 = vmatprep.subr.mxu0 %v7396_v17 }
0x1986   : > { %6923 = vmatpush3.msra.mxu0 %v3333_v44 }
0x1987   : > { %6924 = vmatprep.subr.mxu0 %v7396_v17 }
0x1988   : > { %6925 = vmatpush3.msra.mxu0 %v3332_v45 }
0x1989   : > { %6926 = vmatprep.subr.mxu0 %v7396_v17 }
0x198a   : > { %6927 = vmatpush3.msra.mxu0 %v3331_v46 }
0x198b   : > { %6928 = vmatprep.subr.mxu0 %v7396_v17 }
0x198c   : > { %6929 = vmatpush3.msra.mxu0 %v3330_v51 }
0x198d   : > { %6930 = vmatprep.subr.mxu0 %v7396_v17 }
0x198e   : > { %6931 = vmatpush3.msra.mxu0 %v3329_v52 }
0x198f   : > { %6932 = vmatprep.subr.mxu0 %v7396_v17 }
0x1990   : > { %6933 = vmatpush3.msra.mxu0 %v3328_v53 }
0x1991   : > { %6973 = vmatprep.subr.mxu0 %v7396_v17 }
0x1a31   : > { %v3210_v2 = vpop.f32.mrf.mxu0 }
0x1a32   : > { %v3214_v9 = vadd.f32 %v3210_v2, %v2964_v63  ;;  %v8101_v2 = vld [vmem:[%s8659_s6 + $0x58] sm:$0xff] }
0x1a33   : > { %v6890_v10 = vpop.f32.mrf.mxu0 }
0x1a34   : > { %v3218_v11 = vadd.f32 %v3216_v6, %v3214_v9  ;;  %v8108_v6 = vld [vmem:[%s8659_s6 + $0x50] sm:$0xff]  ;;  %v8113_v9 = vld [vmem:[%s8659_s6 + $0x48] sm:$0xff]  ;;  %v8120_v10 = vld [vmem:[%s8659_s6 + $0x40] sm:$0xff] }
0x1a36   : > { %v3219_v12 = vadd.f32 %v3218_v11, %v7858_v5  ;;  %v3245_v5 = vld [vmem:[%s8661_s8 + $0x10] sm:$0xff] }
0x1a37   : > { %6894 = vmatpush3.msra.mxu1 %v3245_v5 }
0x1a38   : > { %v3220_v13 = vsel %vm558_vm0, %v3219_v12, 0.0  ;;  %6895 = vmatprep.subr.mxu1 %v7396_v17 }
0x1a39   : > { %3221 = vadd.xlane.f32.xlu1 %v3220_v13  ;;  %6896 = vmatpush3.msra.mxu1 %v3244_v25 }
0x1a3a   : > { %6897 = vmatprep.subr.mxu1 %v7396_v17 }
0x1a3b   : > { %6898 = vmatpush3.msra.mxu1 %v3243_v26  ;;  %v8143_v26 = vld [vmem:[%s8660_s7 + $0x2] ss:$0 sm:$0xff] }
0x1a3c   : > { %6937 = vmatprep.subr.mxu1 %v7396_v17 }
0x1ac2   : > { %v3222_v14 = vpop.xlane.xlu1 %3221 }
0x1ac3   : > { %v3223_v16 = vmul.f32 0.03125, %v3222_v14  ;;  %v3437_v14 = vsub.s32 4, %v7578_v7 }
0x1ac5   : > { %v3224_v18 = vsub.f32 %v3219_v12, %v3223_v16  ;;  %v3442_v16 = vsub.s32 5, %v7578_v7 }
0x1ac7   : > { %v3225_v19 = vmul.f32 %v3224_v18, %v3224_v18  ;;  %v3443_v22 = vrot.slane %v7852_v21, %v3442_v16 }
0x1ac9   : > { %v3226_v20 = vsel %vm558_vm0, %v3225_v19, 0.0 }
0x1aca   : > { %3227 = vadd.xlane.f32.xlu0 %v3226_v20 }
0x1b53   : > { %v3228_v47 = vpop.xlane.xlu0 %3227 }
0x1b54   : > { %v3229_v48 = vmul.f32 0.03125, %v3228_v47 }
0x1b56   : > { %v3230_v49 = vadd.f32 1e-05, %v3229_v48 }
0x1b58   : > { %7284 = vrsqrt.f32 %v3230_v49 }
0x1b65   : > { %v7285_v3 = vpop.eup %7284 }
0x1b66   : > { %v3232_v15 = vmul.f32 %v7285_v3, %v3224_v18  ;;  %v3438_v18 = vrot.slane %v7852_v21, %v3437_v14 }
0x1b68   : > { %v3237_v23 = vmul.f32 %v3236_v59, %v3232_v15 }
0x1b6a   : > { %v3242_v24 = vadd.f32 %v3241_v36, %v3237_v23 }
0x1b6c   : > { %6900 = vmatmul.mubr.msk.f32.vlgmr.msra.gmra.mxu1 %vm558_vm0, %v3242_v24 }
0x1b6d   : > { %6945 = vmatprep.mubr.msk.f32.mxu1 %vm7397_vm2, %v7396_v17  ;;  %6938 = vmatpush3.msra.mxu1 %v8101_v2 }
0x1b6e   : > { %6939 = vmatprep.subr.mxu1 %v7396_v17 }
0x1b6f   : > { %6940 = vmatpush3.msra.mxu1 %v8108_v6 }
0x1b70   : > { %6941 = vmatprep.subr.mxu1 %v7396_v17 }
0x1b71   : > { %6942 = vmatpush3.msra.mxu1 %v8113_v9 }
0x1b72   : > { %6943 = vmatprep.subr.mxu1 %v7396_v17 }
0x1b73   : > { %6944 = vmatpush3.msra.mxu1 %v8120_v10 }
0x1b74   : > { %6948 = vmatprep.subr.mxu1 %v7396_v17 }
0x1c2c   : > { %v3323_v54 = vpop.f32.mrf.mxu1 }
0x1c2d   : > { %v3324_v55 = vadd.f32 %v6355_v31, %v3323_v54 }
0x1c2e   : > { %v6901_v29 = vpop.f32.mrf.mxu1 }
0x1c2f   : > { %v3327_v56 = vmax.f32 %v3324_v55, 0.0 }
0x1c31   : > { %6935 = vmatmul.mubr.f32.vlgmr.msra.gmra.mxu0 %v3327_v56 }
0x1c32   : > { %6975 = vmatprep.mubr.msk.f32.mxu0 %vm7397_vm2, %v7396_v17 }
0x1cf1   : > { %v3417_v4 = vpop.f32.mrf.mxu0 }
0x1cf2   : > { %v3418_v58 = vadd.f32 %v6357_v57, %v3417_v4 }
0x1cf3   : > { %v6936_v34 = vpop.f32.mrf.mxu0 }
0x1cf4   : > { %v3421_v60 = vadd.f32 %v3418_v58, %v3242_v24 }
0x1cf6   : > { %v3422_v61 = vsel %vm558_vm0, %v3421_v60, 0.0 }
0x1cf7   : > { %3423 = vadd.xlane.f32.xlu0 %v3422_v61 }
0x1d80   : > { %v3424_v62 = vpop.xlane.xlu0 %3423 }
0x1d81   : > { %v3425_v63 = vmul.f32 0.03125, %v3424_v62 }
0x1d83   : > { %v3426_v0 = vsub.f32 %v3421_v60, %v3425_v63 }
0x1d85   : > { %v3427_v1 = vmul.f32 %v3426_v0, %v3426_v0 }
0x1d87   : > { %v3428_v27 = vsel %vm558_vm0, %v3427_v1, 0.0 }
0x1d88   : > { %3429 = vadd.xlane.f32.xlu0 %v3428_v27 }
0x1e11   : > { %v3430_v11 = vpop.xlane.xlu0 %3429 }
0x1e12   : > { %v3431_v12 = vmul.f32 0.03125, %v3430_v11 }
0x1e14   : > { %v3432_v13 = vadd.f32 1e-05, %v3431_v12 }
0x1e16   : > { %7286 = vrsqrt.f32 %v3432_v13 }
0x1e23   : > { %v7287_v19 = vpop.eup %7286 }
0x1e24   : > { %v3434_v20 = vmul.f32 %v7287_v19, %v3426_v0 }
0x1e26   : > { %v3439_v5 = vmul.f32 %v3438_v18, %v3434_v20 }
0x1e28   : > { %v8134_v25 = vadd.f32 %v3443_v22, %v3439_v5 }
0x1e2a   : > { %6946 = vmatmul.mubr.msk.f32.vlgmr.msra.gmra.mxu1 %vm558_vm0, %v8134_v25 }
0x1e2b   : > { %6950 = vmatprep.mubr.msk.f32.mxu1 %vm7397_vm2, %v7396_v17 }
0x1eea   : > { %v3529_v28 = vpop.f32.mrf.mxu1 }
0x1eeb   : > { %v8146_v30 = vadd.f32 %v8143_v26, %v3529_v28 }
0x1eec   : > { %v6947_v32 = vpop.f32.mrf.mxu1 }
0x1eed   : > { %3534 = vrot.lane.b32.xlu1 %v8146_v30, %s8720_s3 }
0x1ef1   : > { %3700 = vrot.lane.b32.xlu1 %v8146_v30, %s8721_s20 }
0x1ef5   : > { %3698 = vrot.lane.b32.xlu1 %v8146_v30, %s8722_s22 }
0x1f5f   : > { %v3535_v21 = vpop.permute.xlu1 %3534 }
0x1f60   : > { %6949 = vmatpush3.xpose.msk.msra.mxu1 %vm1041_vm4, %v3535_v21 }
0x1f61   : > { %6953 = vmatprep.subr.mxu1 %v7396_v17 }
0x1f63   : > { %6951 = vmatmul.mubr.msk.f32.vlgmr.msra.gmra.mxu1 %vm1041_vm4, %v8146_v30  ;;  %v3701_v49 = vpop.permute.xlu1 %3700 }
0x1f64   : > { %6955 = vmatprep.mubr.msk.f32.mxu1 %vm7397_vm2, %v7396_v17 }
0x1f67   : > { %v3699_v3 = vpop.permute.xlu1 %3698 }
0x2023   : > { %v3606_v33 = vpop.f32.mrf.mxu1 }
0x2024   : > { %v3610_v35 = vmul.f32 0.35355338, %v3606_v33 }
0x2025   : > { %v6952_v39 = vpop.f32.mrf.mxu1 }
0x2026   : > { %v3611_v40 = vsel %vm1041_vm4, %v3610_v35, -inf }
0x2027   : > { %3612 = vmax.xlane.f32.xlu0 %v3611_v40 }
0x20b0   : > { %v3613_v41 = vpop.xlane.xlu0 %3612 }
0x20b1   : > { %v3614_v42 = vsub.f32 %v3610_v35, %v3613_v41 }
0x20b3   : > { %v3615_v43 = vmul.f32 1.442695, %v3614_v42 }
0x20b5   : > { %7288 = vpow2.f32 %v3615_v43 }
0x20c2   : > { %v7289_v44 = vpop.eup %7288 }
0x20c3   : > { %v3617_v45 = vsel %vm1041_vm4, %v7289_v44, 0.0 }
0x20c4   : > { %3618 = vadd.xlane.f32.xlu0 %v3617_v45 }
0x20da   : > { %3622 = vrot.lane.b32.xlu0 %v8146_v30, %s8723_s0  ;;  %s8728_s0 = smov 40  }
0x214d   : > { %v3619_v46 = vpop.xlane.xlu0 %3618 }
0x214e   : > { %7290 = vrcp.f32 %v3619_v46 }
0x2151   : > { %v3623_v47 = vpop.permute.xlu0 %3622 }
0x2152   : > { %6954 = vmatpush3.msra.mxu1 %v3623_v47 }
0x2153   : > { %6958 = vmatprep.subr.mxu1 %v7396_v17 }
0x215b   : > { %v7291_v48 = vpop.eup %7290 }
0x215c   : > { %v3621_v59 = vmul.f32 %v7291_v48, %v7289_v44 }
0x215e   : > { %6956 = vmatmul.mubr.msk.f32.vlgmr.msra.gmra.mxu1 %vm1041_vm4, %v3621_v59 }
0x215f   : > { %6959 = vmatpush3.xpose.msk.msra.mxu1 %vm1041_vm4, %v3701_v49  ;;  %6960 = vmatprep.mubr.msk.f32.mxu1 %vm7397_vm2, %v7396_v17 }
0x2160   : > { %6963 = vmatprep.subr.mxu1 %v7396_v17 }
0x2162   : > { %6961 = vmatmul.mubr.msk.f32.vlgmr.msra.gmra.mxu1 %vm1041_vm4, %v3699_v3 }
0x2163   : > { %6965 = vmatprep.mubr.msk.f32.mxu1 %vm7397_vm2, %v7396_v17 }
0x221e   : > { %v8173_v15 = vpop.f32.mrf.mxu1 }
0x2220   : > { %v6957_v36 = vpop.f32.mrf.mxu1 }
0x2222   : > { %v3772_v23 = vpop.f32.mrf.mxu1 }
0x2223   : > { %v3776_v24 = vmul.f32 0.35355338, %v3772_v23 }
0x2224   : > { %v6962_v51 = vpop.f32.mrf.mxu1 }
0x2225   : > { %v3777_v52 = vsel %vm1041_vm4, %v3776_v24, -inf }
0x2226   : > { %3778 = vmax.xlane.f32.xlu1 %v3777_v52 }
0x2237   : > { %3788 = vrot.lane.b32.xlu1 %v8146_v30, %s8724_s18 }
0x223b   : > { %4020 = vrot.lane.b32.xlu1 %v8146_v30, %s8718_s29 }
0x223f   : > { %4018 = vrot.lane.b32.xlu1 %v8146_v30, %s8725_s30 }
0x22af   : > { %v3779_v53 = vpop.xlane.xlu1 %3778 }
0x22b0   : > { %v3780_v31 = vsub.f32 %v3776_v24, %v3779_v53 }
0x22b2   : > { %v3781_v54 = vmul.f32 1.442695, %v3780_v31 }
0x22b3   : > { %v3789_v55 = vpop.permute.xlu1 %3788 }
0x22b4   : > { %7292 = vpow2.f32 %v3781_v54  ;;  %6964 = vmatpush3.msra.mxu1 %v3789_v55  ;;  %v7332_v54 = vld [vmem:[%s7566_s24] sm:$0xff]  ;;  %v8249_v55 = vld [vmem:[%s8659_s6 + $0x78] sm:$0xff] }
0x22b5   : > { %6968 = vmatprep.subr.mxu1 %v7396_v17 }
0x22b7   : > { %v4021_v60 = vpop.permute.xlu1 %4020 }
0x22bb   : > { %v4019_v63 = vpop.permute.xlu1 %4018 }
0x22c1   : > { %v7293_v29 = vpop.eup %7292 }
0x22c2   : > { %v3783_v56 = vsel %vm1041_vm4, %v7293_v29, 0.0 }
0x22c3   : > { %3784 = vadd.xlane.f32.xlu0 %v3783_v56 }
0x22d9   : > { %3865 = vrot.lane.b32.xlu0 %v8113_v9, %s8726_s19 }
0x234c   : > { %v3785_v57 = vpop.xlane.xlu0 %3784 }
0x234d   : > { %7294 = vrcp.f32 %v3785_v57 }
0x2350   : > { %v3866_v34 = vpop.permute.xlu0 %3865 }
0x235a   : > { %v7295_v4 = vpop.eup %7294 }
0x235b   : > { %v3787_v58 = vmul.f32 %v7295_v4, %v7293_v29 }
0x235d   : > { %6966 = vmatmul.mubr.msk.f32.vlgmr.msra.gmra.mxu1 %vm1041_vm4, %v3787_v58 }
0x235e   : > { %6969 = vmatpush3.msra.mxu1 %v3866_v34  ;;  %6970 = vmatprep.mubr.msk.f32.mxu1 %vm7397_vm2, %v7396_v17 }
0x235f   : > { %6978 = vmatprep.subr.mxu1 %v7396_v17 }
0x241d   : > { %v3860_v61 = vpop.f32.mrf.mxu1 }
0x241e   : > { %6971 = vmatmul.mubr.msk.f32.vlgmr.msra.gmra.mxu1 %vm1041_vm4, %v3860_v61  ;;  %v8263_v61 = vld [vmem:[%s8659_s6 + $0x70] sm:$0xff] }
0x241f   : > { %6979 = vmatpush3.xpose.msk.msra.mxu1 %vm1041_vm4, %v4021_v60  ;;  %v6967_v62 = vpop.f32.mrf.mxu1  ;;  %6980 = vmatprep.mubr.msk.f32.mxu1 %vm7397_vm2, %v7396_v17 }
0x2420   : > { %6988 = vmatprep.subr.mxu1 %v7396_v17  ;;  %v8271_v62 = vld [vmem:[%s8659_s6 + $0x68] sm:$0xff] }
0x2422   : > { %6981 = vmatmul.mubr.msk.f32.vlgmr.msra.gmra.mxu1 %vm1041_vm4, %v4019_v63 }
0x2423   : > { %6990 = vmatprep.mubr.msk.f32.mxu1 %vm7397_vm2, %v7396_v17 }
0x24de   : > { %v8198_v0 = vpop.f32.mrf.mxu1 }
0x24e0   : > { %v6972_v1 = vpop.f32.mrf.mxu1 }
0x24e2   : > { %v4092_v27 = vpop.f32.mrf.mxu1 }
0x24e3   : > { %v4096_v9 = vmul.f32 0.35355338, %v4092_v27 }
0x24e4   : > { %v6982_v11 = vpop.f32.mrf.mxu1 }
0x24e5   : > { %v4097_v12 = vsel %vm1041_vm4, %v4096_v9, -inf }
0x24e6   : > { %4098 = vmax.xlane.f32.xlu1 %v4097_v12 }
0x24f7   : > { %4108 = vrot.lane.b32.xlu1 %v8146_v30, %s8727_s2  ;;  %s539_s2 = sand.u32 1, %s7386_s25  }
0x24f8   : > { %s6298_s4 = sshll.u32 %s539_s2, 3 }
0x24fb   : > { %4264 = vrot.lane.b32.xlu1 %v8146_v30, %s8719_s26 }
0x256f   : > { %v4099_v13 = vpop.xlane.xlu1 %4098 }
0x2570   : > { %v4100_v18 = vsub.f32 %v4096_v9, %v4099_v13 }
0x2572   : > { %v4101_v19 = vmul.f32 1.442695, %v4100_v18  ;;  %v8291_v18 = vld [vmem:[%s8660_s7 + $0x3] ss:$0 sm:$0xff] }
0x2573   : > { %v4109_v32 = vpop.permute.xlu1 %4108 }
0x2574   : > { %7296 = vpow2.f32 %v4101_v19 }
0x2577   : > { %v4265_v33 = vpop.permute.xlu1 %4264 }
0x2581   : > { %v7297_v20 = vpop.eup %7296 }
0x2582   : > { %v4103_v22 = vsel %vm1041_vm4, %v7297_v20, 0.0 }
0x2583   : > { %4104 = vadd.xlane.f32.xlu0 %v4103_v22 }
0x2599   : > { %3942 = vrot.lane.b32.xlu0 %v8120_v10, %s8726_s19 }
0x259d   : > { %4262 = vrot.lane.b32.xlu0 %v8146_v30, %s8717_s21 }
0x260c   : > { %v4105_v5 = vpop.xlane.xlu0 %4104 }
0x260d   : > { %7298 = vrcp.f32 %v4105_v5 }
0x2610   : > { %v3943_v28 = vpop.permute.xlu0 %3942 }
0x2611   : > { %6974 = vmatpush3.msra.mxu0 %v3943_v28  ;;  %v7333_v28 = vld [vmem:[%s7566_s24 + $0x8] sm:$0xff]  ;;  %s541_s24 = scalar_lea.vmem [#allocation2], %s6298_s4 }
0x2612   : > { %6976 = vmatmul.mubr.msk.f32.vlgmr.msra.gmra.mxu0 %vm1041_vm4, %v8173_v15  ;;  %6983 = vmatprep.subr.mxu0 %v7396_v17 }
0x2613   : > { %6984 = vmatpush3.msra.mxu0 %v4109_v32  ;;  %6985 = vmatprep.mubr.msk.f32.mxu0 %vm7397_vm2, %v7396_v17  ;;  %v8303_v32 = vld [vmem:[%s8665_s12 + $0x8] sm:$0x3f] }
0x2614   : > { %6993 = vmatprep.subr.mxu0 %v7396_v17  ;;  %v4263_v35 = vpop.permute.xlu0 %4262 }
0x261a   : > { %v7299_v10 = vpop.eup %7298 }
0x261b   : > { %v4107_v21 = vmul.f32 %v7299_v10, %v7297_v20  ;;  %v4527_v10 = vrot.slane %v8303_v32, %v7581_v8 }
0x261d   : > { %6986 = vmatmul.mubr.msk.f32.vlgmr.msra.gmra.mxu0 %vm1041_vm4, %v4107_v21 }
0x261e   : > { %6994 = vmatpush3.xpose.msk.msra.mxu0 %vm1041_vm4, %v4265_v33  ;;  %6995 = vmatprep.mubr.msk.f32.mxu0 %vm7397_vm2, %v7396_v17 }
0x261f   : > { %7003 = vmatprep.subr.mxu0 %v7396_v17 }
0x2621   : > { %6996 = vmatmul.mubr.msk.f32.vlgmr.msra.gmra.mxu0 %vm1041_vm4, %v4263_v35  ;;  %v4532_v35 = vrot.slane %v8303_v32, %v7604_v37 }
0x2622   : > { %7005 = vmatprep.mubr.msk.f32.mxu0 %vm7397_vm2, %v7396_v17 }
0x26d2   : > { %v4014_v39 = vpop.f32.mrf.mxu0 }
0x26d3   : > { %v4015_v23 = vadd.f32 %v4014_v39, %v8198_v0 }
0x26d4   : > { %v6977_v40 = vpop.f32.mrf.mxu0 }
0x26dd   : > { %v4180_v41 = vpop.f32.mrf.mxu0 }
0x26df   : > { %v6987_v42 = vpop.f32.mrf.mxu0 }
0x26e1   : > { %v4336_v43 = vpop.f32.mrf.mxu0 }
0x26e2   : > { %v4340_v44 = vmul.f32 0.35355338, %v4336_v43 }
0x26e3   : > { %v6997_v45 = vpop.f32.mrf.mxu0 }
0x26e4   : > { %v4341_v46 = vsel %vm1041_vm4, %v4340_v44, -inf }
0x26e5   : > { %4342 = vmax.xlane.f32.xlu1 %v4341_v46 }
0x26f6   : > { %4352 = vrot.lane.b32.xlu1 %v8146_v30, %s8728_s0  ;;  %s6442_s0 = sshll.u32 %s7522_s28, 7  ;;  %s7410_s28 = smov [#allocation2]  }
0x26fa   : > { %4429 = vrot.lane.b32.xlu1 %v8101_v2, %s8726_s19 }
0x276e   : > { %v4343_v47 = vpop.xlane.xlu1 %4342 }
0x276f   : > { %v4344_v48 = vsub.f32 %v4340_v44, %v4343_v47 }
0x2771   : > { %v4345_v49 = vmul.f32 1.442695, %v4344_v48 }
0x2772   : > { %v4353_v36 = vpop.permute.xlu1 %4352 }
0x2773   : > { %7300 = vpow2.f32 %v4345_v49 }
0x2780   : > { %v7301_v59 = vpop.eup %7300 }
0x2781   : > { %v4347_v3 = vsel %vm1041_vm4, %v7301_v59, 0.0 }
0x2782   : > { %4348 = vadd.xlane.f32.xlu0 %v4347_v3 }
0x2798   : > { %4185 = vrot.lane.b32.xlu0 %v8108_v6, %s8726_s19 }
0x279c   : > { %4506 = vrot.lane.b32.xlu0 %v8143_v26, %s8726_s19  ;;  %v4430_v26 = vpop.permute.xlu1 %4429 }
0x279d   : > { %7004 = vmatpush3.msra.mxu0 %v4430_v26 }
0x27a0   : > { %4630 = vrot.lane.b32.xlu0 %v8249_v55, %s8720_s3 }
0x280b   : > { %v4349_v15 = vpop.xlane.xlu0 %4348 }
0x280c   : > { %7302 = vrcp.f32 %v4349_v15 }
0x280f   : > { %v4186_v30 = vpop.permute.xlu0 %4185 }
0x2810   : > { %6989 = vmatpush3.msra.mxu1 %v4186_v30 }
0x2811   : > { %6991 = vmatmul.mubr.msk.f32.vlgmr.msra.gmra.mxu1 %vm1041_vm4, %v4180_v41  ;;  %6998 = vmatprep.subr.mxu1 %v7396_v17 }
0x2812   : > { %6999 = vmatpush3.msra.mxu1 %v4353_v36  ;;  %7000 = vmatprep.mubr.msk.f32.mxu1 %vm7397_vm2, %v7396_v17 }
0x2813   : > { %7008 = vmatprep.subr.mxu1 %v7396_v17  ;;  %v4507_v56 = vpop.permute.xlu0 %4506 }
0x2817   : > { %v4631_v63 = vpop.permute.xlu0 %4630 }
0x2818   : > { %7019 = vmatprep.subr.mxu0 %v4631_v63 }
0x2819   : > { %v7303_v2 = vpop.eup %7302 }
0x281a   : > { %v4351_v6 = vmul.f32 %v7303_v2, %v7301_v59 }
0x281c   : > { %7001 = vmatmul.mubr.msk.f32.vlgmr.msra.gmra.mxu1 %vm1041_vm4, %v4351_v6 }
0x281d   : > { %7016 = vmatprep.mubr.msk.f32.mxu1 %vm7397_vm2, %v7396_v17  ;;  %7009 = vmatpush3.msra.mxu1 %v8249_v55 }
0x281e   : > { %7010 = vmatprep.subr.mxu1 %v7396_v17 }
0x281f   : > { %7011 = vmatpush3.msra.mxu1 %v8263_v61 }
0x2820   : > { %7012 = vmatprep.subr.mxu1 %v7396_v17 }
0x2821   : > { %7013 = vmatpush3.msra.mxu1 %v8271_v62 }
0x2822   : > { %7014 = vmatprep.subr.mxu1 %v7396_v17 }
0x28d1   : > { %v4257_v24 = vpop.f32.mrf.mxu1 }
0x28d2   : > { %v4261_v51 = vadd.f32 %v4257_v24, %v4015_v23 }
0x28d3   : > { %v6992_v52 = vpop.f32.mrf.mxu1 }
0x28dc   : > { %v4424_v53 = vpop.f32.mrf.mxu1 }
0x28dd   : > { %7006 = vmatmul.mubr.msk.f32.vlgmr.msra.gmra.mxu0 %vm1041_vm4, %v4424_v53 }
0x28de   : > { %v7002_v31 = vpop.f32.mrf.mxu1  ;;  %7027 = vmatprep.mubr.msk.f32.mxu0 %vm558_vm0, %v7332_v54  ;;  %7020 = vmatpush3.msra.mxu0 %v4631_v63 }
0x299d   : > { %v4501_v29 = vpop.f32.mrf.mxu0 }
0x299e   : > { %v4505_v57 = vadd.f32 %v4501_v29, %v4261_v51 }
0x299f   : > { %v7007_v4 = vpop.f32.mrf.mxu0 }
0x29a0   : > { %v8255_v58 = vadd.f32 %v4507_v56, %v4505_v57 }
0x29a2   : > { %v4510_v34 = vadd.f32 %v8255_v58, %v8134_v25  ;;  %v8278_v25 = vld [vmem:[%s8659_s6 + $0x60] sm:$0xff] }
0x29a3   : > { %7015 = vmatpush3.msra.mxu1 %v8278_v25 }
0x29a4   : > { %v4511_v60 = vsel %vm558_vm0, %v4510_v34, 0.0  ;;  %7030 = vmatprep.subr.mxu1 %v7396_v17 }
0x29a5   : > { %4512 = vadd.xlane.f32.xlu1 %v4511_v60 }
0x29b6   : > { %4628 = vrot.lane.b32.xlu1 %v8263_v61, %s8720_s3 }
0x29ba   : > { %4626 = vrot.lane.b32.xlu1 %v8271_v62, %s8720_s3 }
0x29be   : > { %4636 = vrot.lane.b32.xlu1 %v8291_v18, %s8720_s3 }
0x2a2e   : > { %v4513_v0 = vpop.xlane.xlu1 %4512 }
0x2a2f   : > { %v4514_v1 = vmul.f32 0.03125, %v4513_v0 }
0x2a31   : > { %v4515_v27 = vsub.f32 %v4510_v34, %v4514_v1 }
0x2a32   : > { %v4629_v12 = vpop.permute.xlu1 %4628 }
0x2a33   : > { %v4516_v9 = vmul.f32 %v4515_v27, %v4515_v27  ;;  %7021 = vmatprep.subr.mxu0 %v4629_v12 }
0x2a34   : > { %7022 = vmatpush3.msra.mxu0 %v4629_v12 }
0x2a35   : > { %v4517_v11 = vsel %vm558_vm0, %v4516_v9, 0.0 }
0x2a36   : > { %4518 = vadd.xlane.f32.xlu0 %v4517_v11  ;;  %v4627_v13 = vpop.permute.xlu1 %4626 }
0x2a37   : > { %7023 = vmatprep.subr.mxu0 %v4627_v13 }
0x2a38   : > { %7024 = vmatpush3.msra.mxu0 %v4627_v13 }
0x2a3a   : > { %v4637_v41 = vpop.permute.xlu1 %4636 }
0x2a4c   : > { %4624 = vrot.lane.b32.xlu0 %v8278_v25, %s8720_s3 }
0x2abf   : > { %v4519_v19 = vpop.xlane.xlu0 %4518 }
0x2ac0   : > { %v4520_v20 = vmul.f32 0.03125, %v4519_v19 }
0x2ac2   : > { %v4521_v22 = vadd.f32 1e-05, %v4520_v20 }
0x2ac3   : > { %v4625_v5 = vpop.permute.xlu0 %4624 }
0x2ac4   : > { %7304 = vrsqrt.f32 %v4521_v22  ;;  %7025 = vmatprep.subr.mxu0 %v4625_v5 }
0x2ac5   : > { %7026 = vmatpush3.msra.mxu0 %v4625_v5 }
0x2ac6   : > { %7028 = vmatmul.mubr.msk.f32.vlgmr.msra.gmra.mxu0 %vm558_vm0, %v7333_v28  ;;  %7037 = vmatprep.subr.mxu0 %v7396_v17 }
0x2ac7   : > { %7041 = vmatprep.mubr.msk.f32.mxu0 %vm7397_vm2, %v7396_v17 }
0x2ad1   : > { %v7305_v21 = vpop.eup %7304 }
0x2ad2   : > { %v4523_v33 = vmul.f32 %v7305_v21, %v4515_v27 }
0x2ad4   : > { %v4528_v39 = vmul.f32 %v4527_v10, %v4523_v33 }
0x2ad6   : > { %v8309_v40 = vadd.f32 %v4532_v35, %v4528_v39 }
0x2ad8   : > { %7017 = vmatmul.mubr.msk.f32.vlgmr.msra.gmra.mxu1 %vm558_vm0, %v8309_v40 }
0x2ad9   : > { %7034 = vmatprep.mubr.msk.f32.mxu1 %vm7397_vm2, %v7396_v17 }
0x2b86   : > { %v7029_v42 = vpop.f32.mrf.mxu0 }
0x2b87   : > { %v8315_v43 = vadd.f32 %v7029_v42, %v4637_v41 }
0x2b88   : > { %v4705_v44 = vpop.f32.mrf.mxu0 }
0x2b89   : > { %7031 = vmatpush3.xpose.msk.msra.mxu1 %vm1041_vm4, %v8315_v43  ;;  %v8319_v45 = vadd.f32 %v4705_v44, %v4637_v41 }
0x2b8a   : > { %7032 = vmatprep.subr.mxu1 %v7396_v17 }
0x2b8b   : > { %4805 = vrot.lane.b32.xlu1 %v8319_v45, %s8720_s3 }
0x2b8d   : > { %7033 = vmatpush3.xpose.msk.msra.mxu1 %vm1041_vm4, %v8319_v45 }
0x2b8e   : > { %7051 = vmatprep.subr.mxu1 %v7396_v17 }
0x2b98   : > { %v4616_v46 = vpop.f32.mrf.mxu1 }
0x2b99   : > { %v4617_v47 = vadd.f32 %v8291_v18, %v4616_v46 }
0x2b9a   : > { %v7018_v48 = vpop.f32.mrf.mxu1 }
0x2b9b   : > { %7035 = vmatmul.mubr.msk.f32.vlgmr.msra.gmra.mxu1 %vm1041_vm4, %v4617_v47 }
0x2b9c   : > { %7055 = vmatprep.mubr.msk.f32.mxu1 %vm7397_vm2, %v7396_v17 }
0x2bfd   : > { %v4806_v26 = vpop.permute.xlu1 %4805 }
0x2c5b   : > { %v4789_v49 = vpop.f32.mrf.mxu1 }
0x2c5c   : > { %v4793_v59 = vmul.f32 0.35355338, %v4789_v49 }
0x2c5d   : > { %v7036_v3 = vpop.f32.mrf.mxu1 }
0x2c5e   : > { %v4794_v15 = vsel %vm879_vm3, %v4793_v59, -inf }
0x2c5f   : > { %4795 = vmax.xlane.f32.xlu0 %v4794_v15 }
0x2c75   : > { %4807 = vrot.lane.b32.xlu0 %v8315_v43, %s8720_s3  ;;  %s8617_s3 = scalar_lea.hbm %s8670_s17, %s6442_s0 }
0x2c79   : > { %4888 = vrot.lane.b32.xlu0 %v8315_v43, %s8722_s22 }
0x2c7d   : > { %4884 = vrot.lane.b32.xlu0 %v4617_v47, %s8722_s22 }
0x2ce8   : > { %v4796_v30 = vpop.xlane.xlu0 %4795 }
0x2ce9   : > { %v4797_v36 = vsub.f32 %v4793_v59, %v4796_v30 }
0x2ceb   : > { %v4798_v2 = vmul.f32 1.442695, %v4797_v36 }
0x2cec   : > { %v4808_v6 = vpop.permute.xlu0 %4807 }
0x2ced   : > { %7306 = vpow2.f32 %v4798_v2  ;;  %7038 = vmatpush3.msra.mxu0 %v4808_v6 }
0x2cee   : > { %7039 = vmatprep.subr.mxu0 %v7396_v17 }
0x2cef   : > { %7040 = vmatpush3.msra.mxu0 %v4806_v26 }
0x2cf0   : > { %7044 = vmatprep.subr.mxu0 %v7396_v17  ;;  %v4889_v31 = vpop.permute.xlu0 %4888 }
0x2cf4   : > { %v4885_v29 = vpop.permute.xlu0 %4884 }
0x2cfa   : > { %v7307_v23 = vpop.eup %7306 }
0x2cfb   : > { %v4800_v24 = vsel %vm879_vm3, %v7307_v23, 0.0 }
0x2cfc   : > { %4801 = vadd.xlane.f32.xlu1 %v4800_v24 }
0x2d0d   : > { %4886 = vrot.lane.b32.xlu1 %v8319_v45, %s8722_s22 }
0x2d85   : > { %v4802_v51 = vpop.xlane.xlu1 %4801 }
0x2d86   : > { %7308 = vrcp.f32 %v4802_v51 }
0x2d89   : > { %v4887_v54 = vpop.permute.xlu1 %4886 }
0x2d93   : > { %v7309_v52 = vpop.eup %7308 }
0x2d94   : > { %v4804_v53 = vmul.f32 %v7309_v52, %v7307_v23 }
0x2d96   : > { %7042 = vmatmul.mubr.msk.f32.vlgmr.msra.gmra.mxu0 %vm879_vm3, %v4804_v53 }
0x2d97   : > { %7045 = vmatpush3.xpose.msk.msra.mxu0 %vm1041_vm4, %v4889_v31  ;;  %7048 = vmatprep.mubr.msk.f32.mxu0 %vm7397_vm2, %v7396_v17 }
0x2d98   : > { %7046 = vmatprep.subr.mxu0 %v7396_v17 }
0x2d9b   : > { %7047 = vmatpush3.xpose.msk.msra.mxu0 %vm1041_vm4, %v4887_v54 }
0x2d9c   : > { %7063 = vmatprep.subr.mxu0 %v7396_v17 }
0x2d9e   : > { %7049 = vmatmul.mubr.msk.f32.vlgmr.msra.gmra.mxu0 %vm1041_vm4, %v4885_v29 }
0x2d9f   : > { %7065 = vmatprep.mubr.msk.f32.mxu0 %vm7397_vm2, %v7396_v17 }
0x2e56   : > { %v8352_v56 = vpop.f32.mrf.mxu0 }
0x2e58   : > { %v7043_v57 = vpop.f32.mrf.mxu0 }
0x2e5e   : > { %v4962_v4 = vpop.f32.mrf.mxu0 }
0x2e5f   : > { %v4966_v34 = vmul.f32 0.35355338, %v4962_v4 }
0x2e60   : > { %v7050_v60 = vpop.f32.mrf.mxu0 }
0x2e61   : > { %v4967_v63 = vsel %vm879_vm3, %v4966_v34, -inf }
0x2e62   : > { %4968 = vmax.xlane.f32.xlu1 %v4967_v63 }
0x2e73   : > { %4978 = vrot.lane.b32.xlu1 %v8319_v45, %s8721_s20 }
0x2e77   : > { %5057 = vrot.lane.b32.xlu1 %v8271_v62, %s8726_s19 }
0x2e7b   : > { %5211 = vrot.lane.b32.xlu1 %v8319_v45, %s8725_s30 }
0x2e7f   : > { %5463 = vrot.lane.b32.xlu1 %v8315_v43, %s8717_s21 }
0x2e83   : > { %5459 = vrot.lane.b32.xlu1 %v4617_v47, %s8717_s21 }
0x2eeb   : > { %v4969_v0 = vpop.xlane.xlu1 %4968 }
0x2eec   : > { %v4970_v1 = vsub.f32 %v4966_v34, %v4969_v0 }
0x2eee   : > { %v4971_v27 = vmul.f32 1.442695, %v4970_v1 }
0x2eef   : > { %v4979_v13 = vpop.permute.xlu1 %4978 }
0x2ef0   : > { %7310 = vpow2.f32 %v4971_v27 }
0x2ef3   : > { %v5058_v22 = vpop.permute.xlu1 %5057 }
0x2ef7   : > { %v5212_v21 = vpop.permute.xlu1 %5211 }
0x2efb   : > { %v5464_v35 = vpop.permute.xlu1 %5463 }
0x2efd   : > { %v7311_v9 = vpop.eup %7310 }
0x2efe   : > { %v4973_v11 = vsel %vm879_vm3, %v7311_v9, 0.0 }
0x2eff   : > { %4974 = vadd.xlane.f32.xlu0 %v4973_v11  ;;  %v5460_v41 = vpop.permute.xlu1 %5459 }
0x2f15   : > { %4980 = vrot.lane.b32.xlu0 %v8315_v43, %s8721_s20  ;;  %s6222_s20 = scalar_lea.sflag [#allocation3], %s539_s2 }
0x2f19   : > { %5213 = vrot.lane.b32.xlu0 %v8315_v43, %s8725_s30 }
0x2f1d   : > { %5209 = vrot.lane.b32.xlu0 %v4617_v47, %s8725_s30  ;;  %s7338_s30 = sshll.u32 %s7410_s28, 4  ;;  %s7339_s30 = int_to_ptr.vmem [resolvable:$false] %s7338_s30 }
0x2f21   : > { %5461 = vrot.lane.b32.xlu0 %v8319_v45, %s8717_s21  ;;  %s6235_s21 = sshll.u32 %s541_s24, 4  ;;  %s6236_s21 = int_to_ptr.vmem [resolvable:$true] %s6235_s21 }
0x2f22   : > { %s7334_s22 = scalar_lea.vmem %s6236_s21, 128  ;;  %p7341_p0 = scmp.lt.s32.totalorder %s6236_s21, %s7339_s30 }
0x2f23   : > { %p7335_p11 = scmp.ne.s32.totalorder %s6236_s21, %s7334_s22 }
0x2f25   : > { %p7336_p12 = pnand %p7335_p11, %p7539_p5 }
0x2f27   : > { %p7337_p13 = pneg %p7336_p12 }
0x2f88   : > { %v4975_v62 = vpop.xlane.xlu0 %4974 }
0x2f89   : > { %7312 = vrcp.f32 %v4975_v62 }
0x2f8c   : > { %v4981_v12 = vpop.permute.xlu0 %4980 }
0x2f8d   : > { %7052 = vmatpush3.msra.mxu1 %v4981_v12 }
0x2f8e   : > { %7053 = vmatprep.subr.mxu1 %v7396_v17 }
0x2f8f   : > { %7054 = vmatpush3.msra.mxu1 %v4979_v13 }
0x2f90   : > { %7058 = vmatprep.subr.mxu1 %v7396_v17  ;;  %v5214_v28 = vpop.permute.xlu0 %5213 }
0x2f94   : > { %v5210_v33 = vpop.permute.xlu0 %5209 }
0x2f96   : > { %v7313_v19 = vpop.eup %7312 }
0x2f97   : > { %v4977_v20 = vmul.f32 %v7313_v19, %v7311_v9 }
0x2f98   : > { %v5462_v39 = vpop.permute.xlu0 %5461 }
0x2f99   : > { %7056 = vmatmul.mubr.msk.f32.vlgmr.msra.gmra.mxu1 %vm879_vm3, %v4977_v20 }
0x2f9a   : > { %7059 = vmatpush3.msra.mxu1 %v5058_v22  ;;  %7060 = vmatprep.mubr.msk.f32.mxu1 %vm7397_vm2, %v7396_v17 }
0x2f9b   : > { %7068 = vmatprep.subr.mxu1 %v7396_v17 }
0x3059   : > { %v5053_v5 = vpop.f32.mrf.mxu1 }
0x305a   : > { %7061 = vmatmul.mubr.msk.f32.vlgmr.msra.gmra.mxu1 %vm1041_vm4, %v5053_v5 }
0x305b   : > { %7069 = vmatpush3.xpose.msk.msra.mxu1 %vm1041_vm4, %v5214_v28  ;;  %v7057_v10 = vpop.f32.mrf.mxu1  ;;  %7072 = vmatprep.mubr.msk.f32.mxu1 %vm7397_vm2, %v7396_v17 }
0x305c   : > { %7070 = vmatprep.subr.mxu1 %v7396_v17 }
0x305f   : > { %7071 = vmatpush3.xpose.msk.msra.mxu1 %vm1041_vm4, %v5212_v21 }
0x3060   : > { %7087 = vmatprep.subr.mxu1 %v7396_v17 }
0x3062   : > { %7073 = vmatmul.mubr.msk.f32.vlgmr.msra.gmra.mxu1 %vm1041_vm4, %v5210_v33 }
0x3063   : > { %7088 = vmatpush3.xpose.msk.msra.mxu1 %vm1041_vm4, %v5464_v35  ;;  %7091 = vmatprep.mubr.msk.f32.mxu1 %vm7397_vm2, %v7396_v17 }
0x3064   : > { %7089 = vmatprep.subr.mxu1 %v7396_v17 }
0x3067   : > { %7090 = vmatpush3.xpose.msk.msra.mxu1 %vm1041_vm4, %v5462_v39 }
0x3068   : > { %7106 = vmatprep.subr.mxu1 %v7396_v17 }
0x306a   : > { %7092 = vmatmul.mubr.msk.f32.vlgmr.msra.gmra.mxu1 %vm1041_vm4, %v5460_v41 }
0x306b   : > { %7114 = vmatprep.mubr.msk.f32.mxu1 %vm7397_vm2, %v7396_v17 }
0x311a   : > { %v8395_v42 = vpop.f32.mrf.mxu1 }
0x311c   : > { %v7062_v44 = vpop.f32.mrf.mxu1 }
0x3122   : > { %v5287_v46 = vpop.f32.mrf.mxu1 }
0x3123   : > { %v5291_v47 = vmul.f32 0.35355338, %v5287_v46  ;;  %v6414_v46 = vld [vmem:[%s8661_s8 + $0x38] sm:$0xff] }
0x3124   : > { %v7074_v48 = vpop.f32.mrf.mxu1  ;;  %7107 = vmatpush3.msra.mxu1 %v6414_v46 }
0x3125   : > { %v5292_v49 = vsel %vm879_vm3, %v5291_v47, -inf  ;;  %7108 = vmatprep.subr.mxu1 %v7396_v17  ;;  %v6411_v48 = vld [vmem:[%s8661_s8 + $0x20] sm:$0xff] }
0x3126   : > { %5293 = vmax.xlane.f32.xlu0 %v5292_v49  ;;  %v6433_v49 = vld [vmem:[%s8663_s10 + $0xf8] sm:$0xff] }
0x312a   : > { %v5537_v59 = vpop.f32.mrf.mxu1 }
0x312b   : > { %v5541_v26 = vmul.f32 0.35355338, %v5537_v59  ;;  %v6432_v59 = vld [vmem:[%s8663_s10 + $0xf0] sm:$0xff] }
0x312c   : > { %v7093_v3 = vpop.f32.mrf.mxu1 }
0x312d   : > { %v5542_v23 = vsel %vm879_vm3, %v5541_v26, -inf  ;;  %v6431_v3 = vld [vmem:[%s8663_s10 + $0xe8] sm:$0xff] }
0x313c   : > { %5133 = vrot.lane.b32.xlu0 %v8278_v25, %s8726_s19 }
0x3140   : > { %5303 = vrot.lane.b32.xlu0 %v8319_v45, %s8718_s29 }
0x31af   : > { %v5294_v15 = vpop.xlane.xlu0 %5293 }
0x31b0   : > { %v5295_v30 = vsub.f32 %v5291_v47, %v5294_v15  ;;  %v6412_v47 = vld [vmem:[%s8661_s8 + $0x28] sm:$0xff]  ;;  %v6430_v15 = vld [vmem:[%s8663_s10 + $0xe0] sm:$0xff] }
0x31b2   : > { %v5296_v36 = vmul.f32 1.442695, %v5295_v30  ;;  %v6429_v30 = vld [vmem:[%s8663_s10 + $0xd8] sm:$0xff] }
0x31b3   : > { %v5134_v2 = vpop.permute.xlu0 %5133 }
0x31b4   : > { %7314 = vpow2.f32 %v5296_v36  ;;  %7064 = vmatpush3.msra.mxu0 %v5134_v2  ;;  %v6428_v36 = vld [vmem:[%s8663_s10 + $0xd0] sm:$0xff]  ;;  %v6427_v2 = vld [vmem:[%s8663_s10 + $0xc8] sm:$0xff] }
0x31b5   : > { %7066 = vmatmul.mubr.msk.f32.vlgmr.msra.gmra.mxu0 %vm1041_vm4, %v8352_v56  ;;  %7075 = vmatprep.subr.mxu0 %v7396_v17 }
0x31b6   : > { %7079 = vmatprep.mubr.msk.f32.mxu0 %vm7397_vm2, %v7396_v17 }
0x31b7   : > { %v5304_v52 = vpop.permute.xlu0 %5303 }
0x31c1   : > { %v7315_v6 = vpop.eup %7314 }
0x31c2   : > { %v5298_v25 = vsel %vm879_vm3, %v7315_v6, 0.0 }
0x31c3   : > { %5299 = vadd.xlane.f32.xlu1 %v5298_v25  ;;  %v6425_v25 = vld [vmem:[%s8663_s10 + $0xb8] sm:$0xff] }
0x31d4   : > { %5305 = vrot.lane.b32.xlu1 %v8315_v43, %s8718_s29 }
0x31f8   : > { %5543 = vmax.xlane.f32.xlu1 %v5542_v23  ;;  %v6423_v23 = vld [vmem:[%s8663_s10 + $0xa8] sm:$0xff] }
0x3209   : > { %5555 = vrot.lane.b32.xlu1 %v8315_v43, %s8719_s26 }
0x320d   : > { %5553 = vrot.lane.b32.xlu1 %v8319_v45, %s8719_s26 }
0x3211   : > { %5709 = vrot.lane.b32.xlu1 %v8291_v18, %s8726_s19 }
0x324c   : > { %v5300_v24 = vpop.xlane.xlu1 %5299 }
0x324d   : > { %7316 = vrcp.f32 %v5300_v24  ;;  %v6422_v24 = vld [vmem:[%s8663_s10 + $0xa0] sm:$0xff] }
0x3250   : > { %v5306_v51 = vpop.permute.xlu1 %5305 }
0x3251   : > { %7076 = vmatpush3.msra.mxu0 %v5306_v51  ;;  %v6421_v51 = vld [vmem:[%s8663_s10 + $0x98] sm:$0xff] }
0x3252   : > { %7077 = vmatprep.subr.mxu0 %v7396_v17 }
0x3253   : > { %7078 = vmatpush3.msra.mxu0 %v5304_v52 }
0x3254   : > { %7082 = vmatprep.subr.mxu0 %v7396_v17 }
0x325a   : > { %v7317_v53 = vpop.eup %7316 }
0x325b   : > { %v5302_v31 = vmul.f32 %v7317_v53, %v7315_v6  ;;  %v6426_v6 = vld [vmem:[%s8663_s10 + $0xc0] sm:$0xff] }
0x325d   : > { %7080 = vmatmul.mubr.msk.f32.vlgmr.msra.gmra.mxu0 %vm879_vm3, %v5302_v31 }
0x325e   : > { %7084 = vmatprep.mubr.msk.f32.mxu0 %vm7397_vm2, %v7396_v17 }
0x3275   : > { %v5205_v43 = vpop.f32.mrf.mxu0 }
0x3276   : > { %v5206_v9 = vadd.f32 %v5205_v43, %v8395_v42  ;;  %v5730_v43 = vrot.slane %v8303_v32, %v7607_v38 }
0x3277   : > { %v7067_v45 = vpop.f32.mrf.mxu0 }
0x3281   : > { %v5544_v18 = vpop.xlane.xlu1 %5543 }
0x3282   : > { %v5545_v54 = vsub.f32 %v5541_v26, %v5544_v18  ;;  %v6424_v26 = vld [vmem:[%s8663_s10 + $0xb0] sm:$0xff] }
0x3284   : > { %v5546_v29 = vmul.f32 1.442695, %v5545_v54  ;;  %v5735_v54 = vrot.slane %v8303_v32, %v3240_v50  ;;  %v5948_v50 = vld [vmem:[%s8666_s13 + $0x28] sm:$0xff] }
0x3285   : > { %v5556_v63 = vpop.permute.xlu1 %5555 }
0x3286   : > { %7318 = vpow2.f32 %v5546_v29 }
0x3289   : > { %v5554_v1 = vpop.permute.xlu1 %5553 }
0x328d   : > { %v5710_v22 = vpop.permute.xlu1 %5709 }
0x3293   : > { %v7319_v56 = vpop.eup %7318 }
0x3294   : > { %v5548_v57 = vsel %vm879_vm3, %v7319_v56, 0.0 }
0x3295   : > { %5549 = vadd.xlane.f32.xlu0 %v5548_v57  ;;  %v5950_v57 = vld [vmem:[%s8666_s13 + $0x38] sm:$0xff] }
0x32ab   : > { %5382 = vrot.lane.b32.xlu0 %v8263_v61, %s8726_s19 }
0x32af   : > { %5632 = vrot.lane.b32.xlu0 %v8249_v55, %s8726_s19  ;;  %s7340_s19 = scalar_lea.vmem %s7339_s30, 256 }
0x32b0   : > { %p7342_p1 = scmp.lt.s32.totalorder %s7340_s19, %s7334_s22 }
0x32b2   : > { %p7343_p2 = por %p7342_p1, %p7341_p0 }
0x32b4   : > { %p7344_p3 = pnand %p7343_p2, %p7337_p13 }
0x331d   : > { %v5378_v4 = vpop.f32.mrf.mxu0 }
0x331e   : > { %v5550_v34 = vpop.xlane.xlu0 %5549 }
0x331f   : > { %7320 = vrcp.f32 %v5550_v34  ;;  %v7081_v60 = vpop.f32.mrf.mxu0  ;;  %v5947_v34 = vld [vmem:[%s8666_s13 + $0x20] sm:$0xff] }
0x3320   : > { %v6420_v60 = vld [vmem:[%s8663_s10 + $0x90] sm:$0xff] }
0x3322   : > { %v5383_v0 = vpop.permute.xlu0 %5382 }
0x3323   : > { %7083 = vmatpush3.msra.mxu0 %v5383_v0  ;;  %v6418_v0 = vld [vmem:[%s8663_s10 + $0x80] sm:$0xff] }
0x3324   : > { %7085 = vmatmul.mubr.msk.f32.vlgmr.msra.gmra.mxu0 %vm1041_vm4, %v5378_v4  ;;  %7094 = vmatprep.subr.mxu0 %v7396_v17  ;;  %v5949_v4 = vld [vmem:[%s8666_s13 + $0x30] sm:$0xff] }
0x3325   : > { %7095 = vmatpush3.msra.mxu0 %v5556_v63  ;;  %7098 = vmatprep.mubr.msk.f32.mxu0 %vm7397_vm2, %v7396_v17  ;;  %v6419_v63 = vld [vmem:[%s8663_s10 + $0x88] sm:$0xff] }
0x3326   : > { %7096 = vmatprep.subr.mxu0 %v7396_v17  ;;  %v5633_v27 = vpop.permute.xlu0 %5632 }
0x3327   : > { %7097 = vmatpush3.msra.mxu0 %v5554_v1  ;;  %v6416_v1 = vld [vmem:[%s8662_s9 + $0x1] ss:$0 sm:$0xff] }
0x3328   : > { %7101 = vmatprep.subr.mxu0 %v7396_v17 }
0x332c   : > { %v7321_v55 = vpop.eup %7320 }
0x332d   : > { %v5552_v61 = vmul.f32 %v7321_v55, %v7319_v56 }
0x332f   : > { %7099 = vmatmul.mubr.msk.f32.vlgmr.msra.gmra.mxu0 %vm879_vm3, %v5552_v61 }
0x3330   : > { %7103 = vmatprep.mubr.msk.f32.mxu0 %vm7397_vm2, %v7396_v17  ;;  %7102 = vmatpush3.msra.mxu0 %v5633_v27 }
0x3331   : > { %7117 = vmatprep.subr.mxu0 %v7396_v17 }
0x33e4   : > { %v5454_v11 = vpop.f32.mrf.mxu0 }
0x33e5   : > { %v5458_v62 = vadd.f32 %v5454_v11, %v5206_v9 }
0x33e6   : > { %v7086_v12 = vpop.f32.mrf.mxu0 }
0x33e7   : > { %v6435_v12 = vld [vmem:[%s8664_s11 + $0x1] ss:$0 sm:$0xff] }
0x33ef   : > { %v5628_v13 = vpop.f32.mrf.mxu0 }
0x33f0   : > { %7104 = vmatmul.mubr.msk.f32.vlgmr.msra.gmra.mxu0 %vm1041_vm4, %v5628_v13 }
0x33f1   : > { %v7100_v19 = vpop.f32.mrf.mxu0  ;;  %7149 = vmatprep.mubr.msk.f32.mxu0 %vm7397_vm2, %v7396_v17  ;;  %7118 = vmatpush3.msra.mxu0 %v6433_v49 }
0x33f2   : > { %7119 = vmatprep.subr.mxu0 %v7396_v17 }
0x33f3   : > { %7120 = vmatpush3.msra.mxu0 %v6432_v59 }
0x33f4   : > { %7121 = vmatprep.subr.mxu0 %v7396_v17 }
0x33f5   : > { %7122 = vmatpush3.msra.mxu0 %v6431_v3  ;;  %v5941_v3 = vrot.slane %v8303_v32, %v3442_v16 }
0x33f6   : > { %7123 = vmatprep.subr.mxu0 %v7396_v17 }
0x33f7   : > { %7124 = vmatpush3.msra.mxu0 %v6430_v15 }
0x33f8   : > { %7125 = vmatprep.subr.mxu0 %v7396_v17 }
0x33f9   : > { %7126 = vmatpush3.msra.mxu0 %v6429_v30 }
0x33fa   : > { %7127 = vmatprep.subr.mxu0 %v7396_v17 }
0x33fb   : > { %7128 = vmatpush3.msra.mxu0 %v6428_v36  ;;  %v5951_v36 = vld [vmem:[%s8667_s14] sm:$0x7] }
0x33fc   : > { %7129 = vmatprep.subr.mxu0 %v7396_v17 }
0x33fd   : > { %7130 = vmatpush3.msra.mxu0 %v6427_v2  ;;  %v6101_v2 = vrot.slane %v5951_v36, %v7581_v8 }
0x33fe   : > { %7131 = vmatprep.subr.mxu0 %v7396_v17 }
0x33ff   : > { %7132 = vmatpush3.msra.mxu0 %v6426_v6 }
0x3400   : > { %7133 = vmatprep.subr.mxu0 %v7396_v17 }
0x3401   : > { %7134 = vmatpush3.msra.mxu0 %v6425_v25 }
0x3402   : > { %7135 = vmatprep.subr.mxu0 %v7396_v17 }
0x3403   : > { %7136 = vmatpush3.msra.mxu0 %v6424_v26 }
0x3404   : > { %7137 = vmatprep.subr.mxu0 %v7396_v17 }
0x3405   : > { %7138 = vmatpush3.msra.mxu0 %v6423_v23 }
0x3406   : > { %7139 = vmatprep.subr.mxu0 %v7396_v17 }
0x3407   : > { %7140 = vmatpush3.msra.mxu0 %v6422_v24 }
0x3408   : > { %7141 = vmatprep.subr.mxu0 %v7396_v17 }
0x3409   : > { %7142 = vmatpush3.msra.mxu0 %v6421_v51 }
0x340a   : > { %7143 = vmatprep.subr.mxu0 %v7396_v17 }
0x340b   : > { %7144 = vmatpush3.msra.mxu0 %v6420_v60  ;;  %v6129_v60 = vrot.slane %v5951_v36, %v7604_v37 }
0x340c   : > { %7145 = vmatprep.subr.mxu0 %v7396_v17 }
0x340d   : > { %7146 = vmatpush3.msra.mxu0 %v6419_v63 }
0x340e   : > { %7147 = vmatprep.subr.mxu0 %v7396_v17 }
0x340f   : > { %7148 = vmatpush3.msra.mxu0 %v6418_v0  ;;  %v6134_v0 = vrot.slane %v5951_v36, %v7607_v38 }
0x34b0   : > { %v5704_v20 = vpop.f32.mrf.mxu0 }
0x34b1   : > { %v5708_v5 = vadd.f32 %v5704_v20, %v5458_v62 }
0x34b2   : > { %v7105_v28 = vpop.f32.mrf.mxu0 }
0x34b3   : > { %v5712_v10 = vadd.f32 %v5710_v22, %v5708_v5 }
0x34b5   : > { %v5713_v21 = vadd.f32 %v5712_v10, %v8309_v40  ;;  %v6413_v40 = vld [vmem:[%s8661_s8 + $0x30] sm:$0xff] }
0x34b6   : > { %7109 = vmatpush3.msra.mxu1 %v6413_v40 }
0x34b7   : > { %v5714_v33 = vsel %vm558_vm0, %v5713_v21, 0.0  ;;  %7110 = vmatprep.subr.mxu1 %v7396_v17 }
0x34b8   : > { %5715 = vadd.xlane.f32.xlu0 %v5714_v33  ;;  %7111 = vmatpush3.msra.mxu1 %v6412_v47 }
0x34b9   : > { %7112 = vmatprep.subr.mxu1 %v7396_v17 }
0x34ba   : > { %7113 = vmatpush3.msra.mxu1 %v6411_v48  ;;  %v5936_v48 = vrot.slane %v8303_v32, %v3437_v14 }
0x34bb   : > { %7152 = vmatprep.subr.mxu1 %v7396_v17 }
0x3541   : > { %v5716_v35 = vpop.xlane.xlu0 %5715 }
0x3542   : > { %v5717_v39 = vmul.f32 0.03125, %v5716_v35 }
0x3544   : > { %v5718_v41 = vsub.f32 %v5713_v21, %v5717_v39  ;;  %v5946_v39 = vld [vmem:[%s8666_s13 + $0x18] sm:$0xff] }
0x3546   : > { %v5719_v42 = vmul.f32 %v5718_v41, %v5718_v41 }
0x3548   : > { %v5720_v44 = vsel %vm558_vm0, %v5719_v42, 0.0  ;;  %v5944_v42 = vld [vmem:[%s8666_s13 + $0x8] sm:$0xff] }
0x3549   : > { %5721 = vadd.xlane.f32.xlu1 %v5720_v44  ;;  %v5943_v44 = vld [vmem:[%s8666_s13] sm:$0xff] }
0x35d2   : > { %v5722_v52 = vpop.xlane.xlu1 %5721 }
0x35d3   : > { %v5723_v53 = vmul.f32 0.03125, %v5722_v52 }
0x35d5   : > { %v5724_v31 = vadd.f32 1e-05, %v5723_v53 }
0x35d7   : > { %7322 = vrsqrt.f32 %v5724_v31 }
0x35e4   : > { %v7323_v45 = vpop.eup %7322 }
0x35e5   : > { %v5726_v18 = vmul.f32 %v7323_v45, %v5718_v41  ;;  %v5945_v41 = vld [vmem:[%s8666_s13 + $0x10] sm:$0xff] }
0x35e7   : > { %v5731_v29 = vmul.f32 %v5730_v43, %v5726_v18 }
0x35e9   : > { %v5736_v56 = vadd.f32 %v5735_v54, %v5731_v29  ;;  %v6139_v29 = vld [vmem:[%s8668_s15 + $0x18] sm:$0xff] }
0x35eb   : > { %7115 = vmatmul.mubr.msk.f32.vlgmr.msra.gmra.mxu1 %vm558_vm0, %v5736_v56 }
0x35ec   : > { %7153 = vmatpush3.msra.mxu1 %v5950_v57  ;;  %7160 = vmatprep.mubr.msk.f32.mxu1 %vm7397_vm2, %v7396_v17  ;;  %v6136_v57 = vld [vmem:[%s8668_s15] sm:$0xff] }
0x35ed   : > { %7154 = vmatprep.subr.mxu1 %v7396_v17 }
0x35ee   : > { %7155 = vmatpush3.msra.mxu1 %v5949_v4 }
0x35ef   : > { %7156 = vmatprep.subr.mxu1 %v7396_v17 }
0x35f0   : > { %7157 = vmatpush3.msra.mxu1 %v5948_v50 }
0x35f1   : > { %7158 = vmatprep.subr.mxu1 %v7396_v17 }
0x35f2   : > { %7159 = vmatpush3.msra.mxu1 %v5947_v34 }
0x35f3   : > { %7161 = vmatmul.mubr.msk.f32.vlgmr.msra.gmra.mxu1 %vm558_vm0, %v8255_v58  ;;  %7163 = vmatprep.subr.mxu1 %v7396_v17 }
0x35f4   : > { %7171 = vmatprep.mubr.msk.f32.mxu1 %vm7397_vm2, %v7396_v17  ;;  %7164 = vmatpush3.msra.mxu1 %v5946_v39 }
0x35f5   : > { %7165 = vmatprep.subr.mxu1 %v7396_v17 }
0x35f6   : > { %7166 = vmatpush3.msra.mxu1 %v5945_v41 }
0x35f7   : > { %7167 = vmatprep.subr.mxu1 %v7396_v17 }
0x35f8   : > { %7168 = vmatpush3.msra.mxu1 %v5944_v42 }
0x35f9   : > { %7169 = vmatprep.subr.mxu1 %v7396_v17 }
0x35fa   : > { %7170 = vmatpush3.msra.mxu1 %v5943_v44 }
0x35fb   : > { %7174 = vmatprep.subr.mxu1 %v7396_v17 }
0x36ab   : > { %v5819_v55 = vpop.f32.mrf.mxu1 }
0x36ac   : > { %v5820_v61 = vadd.f32 %v6416_v1, %v5819_v55 }
0x36ad   : > { %v7116_v27 = vpop.f32.mrf.mxu1 }
0x36ae   : > { %v5823_v9 = vmax.f32 %v5820_v61, 0.0 }
0x36b0   : > { %7150 = vmatmul.mubr.f32.vlgmr.msra.gmra.mxu0 %v5823_v9 }
0x36b3   : > { %v6021_v11 = vpop.f32.mrf.mxu1 }
0x36b5   : > { %v7162_v62 = vpop.f32.mrf.mxu1 }
0x3770   : > { %v5915_v13 = vpop.f32.mrf.mxu0 }
0x3771   : > { %v5916_v19 = vadd.f32 %v6435_v12, %v5915_v13 }
0x3772   : > { %v7151_v20 = vpop.f32.mrf.mxu0 }
0x3773   : > { %v5919_v22 = vadd.f32 %v5916_v19, %v5736_v56  ;;  %v6137_v56 = vld [vmem:[%s8668_s15 + $0x8] sm:$0xff] }
0x3775   : > { %v5920_v5 = vsel %vm558_vm0, %v5919_v22, 0.0 }
0x3776   : > { %5921 = vadd.xlane.f32.xlu0 %v5920_v5 }
0x37ff   : > { %v5922_v28 = vpop.xlane.xlu0 %5921 }
0x3800   : > { %v5923_v10 = vmul.f32 0.03125, %v5922_v28 }
0x3802   : > { %v5924_v21 = vsub.f32 %v5919_v22, %v5923_v10 }
0x3804   : > { %v5925_v33 = vmul.f32 %v5924_v21, %v5924_v21 }
0x3806   : > { %v5926_v35 = vsel %vm558_vm0, %v5925_v33, 0.0 }
0x3807   : > { %5927 = vadd.xlane.f32.xlu0 %v5926_v35 }
0x3890   : > { %v5928_v46 = vpop.xlane.xlu0 %5927 }
0x3891   : > { %v5929_v40 = vmul.f32 0.03125, %v5928_v46 }
0x3893   : > { %v5930_v47 = vadd.f32 1e-05, %v5929_v40 }
0x3895   : > { %7324 = vrsqrt.f32 %v5930_v47 }
0x38a2   : > { %v7325_v49 = vpop.eup %7324 }
0x38a3   : > { %v5932_v59 = vmul.f32 %v7325_v49, %v5924_v21 }
0x38a5   : > { %v5937_v15 = vmul.f32 %v5936_v48, %v5932_v59 }
0x38a7   : > { %v5942_v30 = vadd.f32 %v5941_v3, %v5937_v15 }
0x38a9   : > { %7172 = vmatmul.mubr.msk.f32.vlgmr.msra.gmra.mxu1 %vm558_vm0, %v5942_v30 }
0x38aa   : > { %7182 = vmatprep.mubr.msk.f32.mxu1 %vm7397_vm2, %v7396_v17  ;;  %7175 = vmatpush3.msra.mxu1 %v6139_v29 }
0x38ab   : > { %7176 = vmatprep.subr.mxu1 %v7396_v17 }
0x3969   : > { %v6094_v14 = vpop.f32.mrf.mxu1 }
0x396a   : > { %v6095_v6 = vadd.f32 %v6094_v14, %v6021_v11 }
0x396b   : > { %v7173_v25 = vpop.f32.mrf.mxu1 }
0x396c   : > { %v6102_v26 = vadd.f32 %v6101_v2, %v6095_v6 }
0x396e   : > { %v6438_v7 = vmul.f32 -1.442695, %v6102_v26 }
0x3970   : > { %7326 = vpow2.f32 %v6438_v7 }
0x397d   : > { %v7327_v16 = vpop.eup %7326 }
0x397e   : > { %v6106_v32 = vadd.f32 1.0, %v7327_v16 }
0x3980   : > { %7328 = vrcp.f32 %v6106_v32 }
0x398d   : > { %v7329_v23 = vpop.eup %7328 }
0x398e   : > { %v6110_v24 = vsub.f32 1.0, %v7329_v23  ;;  %v6109_v51 = vmul.f32 %v7329_v23, %v5942_v30 }
0x3990   : > { %v6111_v52 = vmul.f32 %v6110_v24, %v8255_v58  ;;  %v6138_v58 = vld [vmem:[%s8668_s15 + $0x10] sm:$0xff] }
0x3991   : > { %7177 = vmatpush3.msra.mxu1 %v6138_v58 }
0x3992   : > { %v6112_v53 = vadd.f32 %v6111_v52, %v6109_v51  ;;  %7178 = vmatprep.subr.mxu1 %v7396_v17 }
0x3993   : > { %7179 = vmatpush3.msra.mxu1 %v6137_v56 }
0x3994   : > { %v6113_v31 = vsel %vm558_vm0, %v6112_v53, 0.0  ;;  %7180 = vmatprep.subr.mxu1 %v7396_v17  ;;  %v6439_v17 = vld [vmem:[%s8669_s16] ss:$0 sm:$0xff] }
0x3995   : > { %6114 = vadd.xlane.f32.xlu0 %v6113_v31  ;;  %7181 = vmatpush3.msra.mxu1 %v6136_v57 }
0x3a1e   : > { %v6115_v43 = vpop.xlane.xlu0 %6114 }
0x3a1f   : > { %v6116_v8 = vmul.f32 0.03125, %v6115_v43 }
0x3a21   : > { %v6117_v45 = vsub.f32 %v6112_v53, %v6116_v8 }
0x3a23   : > { %v6118_v18 = vmul.f32 %v6117_v45, %v6117_v45 }
0x3a25   : > { %v6119_v54 = vsel %vm558_vm0, %v6118_v18, 0.0 }
0x3a26   : > { %6120 = vadd.xlane.f32.xlu1 %v6119_v54 }
0x3aaf   : > { %v6121_v4 = vpop.xlane.xlu1 %6120 }
0x3ab0   : > { %v6122_v50 = vmul.f32 0.03125, %v6121_v4 }
0x3ab2   : > { %v6123_v34 = vadd.f32 1e-05, %v6122_v50 }
0x3ab4   : > { %7330 = vrsqrt.f32 %v6123_v34 }
0x3ac1   : > { %v7331_v63 = vpop.eup %7330 }
0x3ac2   : > { %v6125_v1 = vmul.f32 %v7331_v63, %v6117_v45 }
0x3ac4   : > { %v6130_v55 = vmul.f32 %v6129_v60, %v6125_v1 }
0x3ac6   : > { %v6135_v61 = vadd.f32 %v6134_v0, %v6130_v55 }
0x3ac8   : > { %7183 = vmatmul.mubr.msk.f32.vlgmr.msra.gmra.mxu1 %vm558_vm0, %v6135_v61 }
0x3b88   : > { %v6216_v27 = vpop.f32.mrf.mxu1 }
0x3b89   : > { %v6217_v37 = vadd.f32 %v6439_v17, %v6216_v27 }
0x3b8a   : > { %v7184_v38 = vpop.f32.mrf.mxu1 }
0x3b8b   : > { %6220 = vst.msk [vmem:[%s541_s24] sm:$0xff] %vm772_vm1, %v6217_v37 }
0x3b8c   : > { %7347 = shalt.err (!%p7344_p3)
}
0x3b8d   : > { %s7348_s18 = scalar_lea.hbm %s8617_s3, 128  ;;  %s7352_s5 = scalar_lea.hbm %s8670_s17, 256 }
0x3b8e   : > { %p7349_p4 = scmp.ne.s32.totalorder %s8617_s3, %s7348_s18  ;;  %p7353_p9 = scmp.lt.s32.totalorder %s8617_s3, %s8670_s17 }
0x3b8f   : > { %p7354_p10 = scmp.lt.s32.totalorder %s7352_s5, %s7348_s18 }
0x3b90   : > { %p7350_p7 = pnand %p7349_p4, %p7539_p5 }
0x3b91   : > { %p7355_p11 = por %p7354_p10, %p7353_p9 }
0x3b92   : > { %p7351_p8 = pneg %p7350_p7 }
0x3b94   : > { %p7356_p12 = pnand %p7355_p11, %p7351_p8 }
0x3b96   : > { %7359 = shalt.err (!%p7356_p12)
}
0x3b97   : > { %7185 = dma.vmem_to_hbm [thread:$0]  (%p7539_p5), %s6236_s21, 128, %s8617_s3, %s6222_s20  }
0x3b98 PF: > { %s8729_s24 = sld [smem:[#allocation5_spill]]  ;;  %p7191_p13 = scmp.ge.s32.totalorder %s7394_s27, 2 }
0x3b9a   : > { %p7188_p0 = pnand %p7191_p13, %p7543_p6 }
0x3b9c   : > { %p7189_p1 = pneg %p7188_p0 }
0x3b9e   : > { %s6247_s26 = sand.u32 1, %s8729_s24  }
0x3b9f   : > { %s6248_s22 = scalar_lea.sflag [#allocation3], %s6247_s26 }
0x3ba0   : > { %7377 = dma.done.wait (%p7189_p1), %s6248_s22, 128  }
0x3ba1   : > { %7379 = vsyncadd (%p7189_p1), %s6248_s22, 4294967168  ;;  %s8731_s27 = sld [smem:[#allocation7_spill]]  ;;  %s8734_s24 = smov %s7386_s25 }
0x3ba2   : > { %s8732_s28 = sld [smem:[#allocation6_spill]] }
0x3ba3   : > { %s8733_s26 = sld [smem:[#allocation8_spill]] }
0x3ba7   : > { %p27_p2 = scmp.ge.s32.totalorder %s8731_s27, 4  }
0x3ba8   : > { %s8735_s25 = smov %s8732_s28 }
0x3ba9   :  { %29 = sbr.rel (!%p27_p2) target bundleno = 10 (0xa), region = 134 }
0x3bae   :  { %6253 = vsyncpa [#allocation3], 1 }
0x3baf   :  { %6255 = vsyncpa [#allocation3 + $0x1], 1 }

</bundles_post_ra>
